<compile_context>
chip_gen: v6e
topology: v6e:2x2x1
jax: 0.10.0
libtpu: 0.0.40
codegen_flags: <defaults>
</compile_context>

<pallas_src>
import functools
import math

import numpy as np
import jax
import jax.numpy as jnp
from jax.experimental import pallas as pl
from jax.experimental.pallas import tpu as pltpu


def _conv_out_hw(h, w):
    # kernel=3, stride=2, padding=1  ->  ceil(h/2), ceil(w/2)
    return (h - 1) // 2 + 1, (w - 1) // 2 + 1


def _tap_selectors(h_in, w_in):
    """0/1 selectors S[t] of shape [M_out, M_in] (spatial-major gather).

    For a spatial-major activation X [M_in, C]:
      (S[t] @ X)[m_out, :] == X[input index read by 3x3 tap t at m_out, :]
    and is exactly 0 where the tap falls on the conv's zero padding.
    """
    h_out, w_out = _conv_out_hw(h_in, w_in)
    m_in, m_out = h_in * w_in, h_out * w_out
    sel = np.zeros((9, m_out, m_in), dtype=np.float32)
    for kh in range(3):
        for kw in range(3):
            t = kh * 3 + kw
            for oy in range(h_out):
                iy = 2 * oy + kh - 1
                if iy < 0 or iy >= h_in:
                    continue
                for ox in range(w_out):
                    ix = 2 * ox + kw - 1
                    if ix < 0 or ix >= w_in:
                        continue
                    sel[t, oy * w_out + ox, iy * w_in + ix] = 1.0
    return sel, (h_out, w_out)


def _fused_kernel(x_ref,
                  s1_ref, w1_ref, b1_ref,
                  s2_ref, w2_ref, b2_ref,
                  s3_ref, w3_ref, b3_ref,
                  o1_ref, o2_ref, o3_ref,
                  g1_ref, g2_ref, g3_ref):
    """A block of images per grid step; activations spatial-major [M, C]."""

    def conv(act, s_ref, w_ref, b_ref, g_ref):
        # act: [M_in, C_in] in compute dtype. Returns [M_out, C_out] float32.
        c_in = act.shape[1]
        # 9 gather matmuls; each tap's [M_out, C_in] result is written at its
        # static column block of the stacked-patch scratch G [M_out, 9*C_in].
        # Selector columns are one-hot (or all-zero on padding), so emitting
        # the gather directly in the compute dtype is exact.
        for t in range(9):                                 # statically unrolled
            g_ref[:, t * c_in:(t + 1) * c_in] = jnp.dot(s_ref[t], act)
        # One wide-K MXU matmul per layer (K = 9*C_in), f32 accumulation,
        # lane-dense [M_out, C_out] result; bias broadcast over rows.
        y = jnp.dot(g_ref[...], w_ref[...], preferred_element_type=jnp.float32)
        return y + b_ref[...]

    bb = x_ref.shape[0]
    for b in range(bb):                                    # statically unrolled
        y1 = conv(x_ref[b], s1_ref, w1_ref, b1_ref, g1_ref)        # [M1, 128]
        o1_ref[b] = y1.astype(o1_ref.dtype)
        y2 = conv(y1.astype(s2_ref.dtype), s2_ref, w2_ref, b2_ref, g2_ref)
        o2_ref[b] = y2.astype(o2_ref.dtype)                         # [M2, 64]
        y3 = conv(y2.astype(s3_ref.dtype), s3_ref, w3_ref, b3_ref, g3_ref)
        o3_ref[b] = y3.astype(o3_ref.dtype)                         # [M3, Cout]


def downsample_forward(x_nchw, params, *, compute_dtype=jnp.float32,
                       images_per_step=None):
    """x_nchw: [N, Cin, H, W]. Returns (x1, x2, x3) in NCHW like the PyTorch module.

    compute_dtype=jnp.bfloat16 enables the fast v6e/v7x MXU operand path
    (accumulation stays f32). images_per_step controls batch blocking of the
    grid (default: at most two grid steps).
    """
    n, c_in, h, w = x_nchw.shape
    c1 = params["w1"].shape[0]
    c2 = params["w2"].shape[0]
    c3 = params["w3"].shape[0]

    s1_np, (h1, w1d) = _tap_selectors(h, w)
    s2_np, (h2, w2d) = _tap_selectors(h1, w1d)
    s3_np, (h3, w3d) = _tap_selectors(h2, w2d)
    m0, m1, m2, m3 = h * w, h1 * w1d, h2 * w2d, h3 * w3d

    if images_per_step is None:
        images_per_step = max(1, (n + 1) // 2)   # at most 2 grid steps
    if n % images_per_step != 0:
        images_per_step = 1
    bb = images_per_step
    steps = n // bb

    cd = compute_dtype
    # Spatial-major ("flattened NHWC") activations [N, H*W, C]: buys lane-dense
    # (channel-last) matmul results and stores inside the kernel. Cast to the
    # compute dtype host-side so layer 1 needs no in-kernel cast pass.
    x_sm = jnp.transpose(x_nchw, (0, 2, 3, 1)).reshape(n, m0, c_in).astype(cd)

    def stack_weights(wgt):
        # [C_out, C_in, 3, 3] -> [9*C_in, C_out]; K index = (kh*3+kw)*C_in + ci
        co, ci = wgt.shape[0], wgt.shape[1]
        return jnp.transpose(wgt, (2, 3, 1, 0)).reshape(9 * ci, co).astype(cd)

    w1t = stack_weights(params["w1"])
    w2t = stack_weights(params["w2"])
    w3t = stack_weights(params["w3"])
    b1 = params["b1"].reshape(1, c1).astype(jnp.float32)
    b2 = params["b2"].reshape(1, c2).astype(jnp.float32)
    b3 = params["b3"].reshape(1, c3).astype(jnp.float32)
    s1 = jnp.asarray(s1_np, dtype=cd)
    s2 = jnp.asarray(s2_np, dtype=cd)
    s3 = jnp.asarray(s3_np, dtype=cd)

    operands = (x_sm, s1, w1t, b1, s2, w2t, b2, s3, w3t, b3)

    # Advisory cost estimate for XLA's scheduler.
    flops = 2 * n * 9 * (c_in * m1 * (m0 + c1)
                         + c1 * m2 * (m1 + c2)
                         + c2 * m3 * (m2 + c3))
    out_bytes = x_nchw.dtype.itemsize * n * (c1 * m1 + c2 * m2 + c3 * m3)
    bytes_accessed = sum(int(o.size) * o.dtype.itemsize for o in operands) + out_bytes

    def const_spec(a):  # full-array block, constant index_map -> fetched once
        return pl.BlockSpec(a.shape, lambda i, _nd=a.ndim: (0,) * _nd)

    out_dtype = x_nchw.dtype
    y1, y2, y3 = pl.pallas_call(
        _fused_kernel,
        grid=(steps,),
        in_specs=[
            pl.BlockSpec((bb, m0, c_in), lambda i: (i, 0, 0)),
            const_spec(s1), const_spec(w1t), const_spec(b1),
            const_spec(s2), const_spec(w2t), const_spec(b2),
            const_spec(s3), const_spec(w3t), const_spec(b3),
        ],
        out_specs=[
            pl.BlockSpec((bb, m1, c1), lambda i: (i, 0, 0)),
            pl.BlockSpec((bb, m2, c2), lambda i: (i, 0, 0)),
            pl.BlockSpec((bb, m3, c3), lambda i: (i, 0, 0)),
        ],
        out_shape=[
            jax.ShapeDtypeStruct((n, m1, c1), out_dtype),
            jax.ShapeDtypeStruct((n, m2, c2), out_dtype),
            jax.ShapeDtypeStruct((n, m3, c3), out_dtype),
        ],
        scratch_shapes=[
            pltpu.VMEM((m1, 9 * c_in), cd),   # stacked patches, layer 1
            pltpu.VMEM((m2, 9 * c1), cd),     # stacked patches, layer 2
            pltpu.VMEM((m3, 9 * c2), cd),     # stacked patches, layer 3
        ],
        compiler_params=pltpu.CompilerParams(
            dimension_semantics=("parallel",)),   # v7x: shard batch over 2 TCs
        cost_estimate=pl.CostEstimate(
            flops=flops, transcendentals=0, bytes_accessed=bytes_accessed),
    )(*operands)

    # Spatial-major [Ho*Wo, C] -> NCHW (tiny wrapper transposes).
    x1 = y1.reshape(n, h1, w1d, c1).transpose(0, 3, 1, 2)
    x2 = y2.reshape(n, h2, w2d, c2).transpose(0, 3, 1, 2)
    x3 = y3.reshape(n, h3, w3d, c3).transpose(0, 3, 1, 2)
    return x1, x2, x3


def init_params(key, in_channels, out_channels):
    """Deterministic init matching PyTorch Conv2d parameter shapes."""
    def conv_init(k, cout, cin):
        kw_, kb_ = jax.random.split(k)
        fan_in = cin * 3 * 3
        bound = 1.0 / math.sqrt(fan_in)
        wgt = jax.random.uniform(kw_, (cout, cin, 3, 3), jnp.float32, -bound, bound)
        b = jax.random.uniform(kb_, (cout,), jnp.float32, -bound, bound)
        return wgt, b

    k1, k2, k3 = jax.random.split(key, 3)
    w1, b1 = conv_init(k1, 128, in_channels)
    w2, b2 = conv_init(k2, 64, 128)
    w3, b3 = conv_init(k3, out_channels, 64)
    return {"w1": w1, "b1": b1, "w2": w2, "b2": b2, "w3": w3, "b3": b3}


def _reference_conv(x_nchw, wgt, b):
    y = jax.lax.conv_general_dilated(
        x_nchw, wgt, window_strides=(2, 2), padding=((1, 1), (1, 1)),
        dimension_numbers=("NCHW", "OIHW", "NCHW"))
    return y + b.reshape(1, -1, 1, 1)


if __name__ == "__main__":
    key = jax.random.PRNGKey(0)
    k_x, k_p = jax.random.split(key)

    in_channels, out_channels = 4, 32
    x = jax.random.normal(k_x, (2, in_channels, 16, 16), jnp.float32)
    params = init_params(k_p, in_channels, out_channels)

    # f32 path (default): semantics of the PyTorch module.
    fwd = jax.jit(downsample_forward)
    x1, x2, x3 = fwd(x, params)
    jax.block_until_ready((x1, x2, x3))

    # Sanity check against XLA's native conv.
    r1 = _reference_conv(x, params["w1"], params["b1"])
    r2 = _reference_conv(r1, params["w2"], params["b2"])
    r3 = _reference_conv(r2, params["w3"], params["b3"])
    assert x1.shape == (2, 128, 8, 8)
    assert x2.shape == (2, 64, 4, 4)
    assert x3.shape == (2, out_channels, 2, 2)
    for got, ref in ((x1, r1), (x2, r2), (x3, r3)):
        assert jnp.allclose(got, ref, atol=2e-4, rtol=2e-4), "mismatch vs reference conv"

    # bf16 operand / f32 accumulation path (v6e / v7x fast MXU), looser tolerance.
    fwd_bf16 = jax.jit(functools.partial(downsample_forward,
                                         compute_dtype=jnp.bfloat16))
    y1, y2, y3 = fwd_bf16(x, params)
    jax.block_until_ready((y1, y2, y3))
    for got, ref in ((y1, r1), (y2, r2), (y3, r3)):
        assert jnp.allclose(got, ref, atol=5e-2, rtol=5e-2), "bf16 path mismatch"

    print("KERNEL_OK")
</pallas_src>

<mosaic_0001>
module attributes {stable_mosaic.version = 11 : i64} {
  func.func @_fused_kernel(%arg0: i32, %arg1: memref<1x256x4xf32, #tpu.memory_space<vmem>>, %arg2: memref<9x64x256xf32, #tpu.memory_space<vmem>>, %arg3: memref<36x128xf32, #tpu.memory_space<vmem>>, %arg4: memref<1x128xf32, #tpu.memory_space<vmem>>, %arg5: memref<9x16x64xf32, #tpu.memory_space<vmem>>, %arg6: memref<1152x64xf32, #tpu.memory_space<vmem>>, %arg7: memref<1x64xf32, #tpu.memory_space<vmem>>, %arg8: memref<9x4x16xf32, #tpu.memory_space<vmem>>, %arg9: memref<576x32xf32, #tpu.memory_space<vmem>>, %arg10: memref<1x32xf32, #tpu.memory_space<vmem>>, %arg11: memref<1x64x128xf32, #tpu.memory_space<vmem>>, %arg12: memref<1x16x64xf32, #tpu.memory_space<vmem>>, %arg13: memref<1x4x32xf32, #tpu.memory_space<vmem>>, %arg14: memref<64x36xf32, #tpu.memory_space<vmem>>, %arg15: memref<16x1152xf32, #tpu.memory_space<vmem>>, %arg16: memref<4x576xf32, #tpu.memory_space<vmem>>) attributes {dimension_semantics = [#tpu.dimension_semantics<parallel>], iteration_bounds = array<i64: 2>, scalar_prefetch = 0 : i64, scratch_operands = 3 : i64, tpu.core_type = #tpu.core_type<tc>, window_params = [{transform_indices = @transform_0, window_bounds = array<i64: 1, 256, 4>}, {pipeline_mode = #tpu.pipeline_mode<synchronous>, transform_indices = @transform_1, window_bounds = array<i64: 9, 64, 256>}, {pipeline_mode = #tpu.pipeline_mode<synchronous>, transform_indices = @transform_2, window_bounds = array<i64: 36, 128>}, {pipeline_mode = #tpu.pipeline_mode<synchronous>, transform_indices = @transform_3, window_bounds = array<i64: 1, 128>}, {pipeline_mode = #tpu.pipeline_mode<synchronous>, transform_indices = @transform_4, window_bounds = array<i64: 9, 16, 64>}, {pipeline_mode = #tpu.pipeline_mode<synchronous>, transform_indices = @transform_5, window_bounds = array<i64: 1152, 64>}, {pipeline_mode = #tpu.pipeline_mode<synchronous>, transform_indices = @transform_6, window_bounds = array<i64: 1, 64>}, {pipeline_mode = #tpu.pipeline_mode<synchronous>, transform_indices = @transform_7, window_bounds = array<i64: 9, 4, 16>}, {pipeline_mode = #tpu.pipeline_mode<synchronous>, transform_indices = @transform_8, window_bounds = array<i64: 576, 32>}, {pipeline_mode = #tpu.pipeline_mode<synchronous>, transform_indices = @transform_9, window_bounds = array<i64: 1, 32>}, {transform_indices = @transform_10, window_bounds = array<i64: 1, 64, 128>}, {transform_indices = @transform_11, window_bounds = array<i64: 1, 16, 64>}, {transform_indices = @transform_12, window_bounds = array<i64: 1, 4, 32>}]} {
    %c0 = arith.constant 0 : index
    %c0_0 = arith.constant 0 : index
    %c0_1 = arith.constant 0 : index
    %0 = vector.load %arg1[%c0, %c0_0, %c0_1] : memref<1x256x4xf32, #tpu.memory_space<vmem>>, vector<1x256x4xf32>
    %1 = vector.shape_cast %0 : vector<1x256x4xf32> to vector<256x4xf32>
    %c0_2 = arith.constant 0 : index
    %c0_3 = arith.constant 0 : index
    %c0_4 = arith.constant 0 : index
    %2 = vector.load %arg2[%c0_2, %c0_3, %c0_4] : memref<9x64x256xf32, #tpu.memory_space<vmem>>, vector<1x64x256xf32>
    %3 = vector.shape_cast %2 : vector<1x64x256xf32> to vector<64x256xf32>
    %cst = arith.constant dense<0.000000e+00> : vector<64x4xf32>
    %4 = tpu.matmul %3, %1, %cst {dimension_numbers = #tpu.dot_dimension_numbers<[1], [0], [0], [1], [0, 0, 1, 1], [], []>} : vector<64x256xf32>, vector<256x4xf32>, vector<64x4xf32> -> vector<64x4xf32>
    %c0_5 = arith.constant 0 : index
    %c0_6 = arith.constant 0 : index
    %5 = vector.load %arg14[%c0_5, %c0_6] : memref<64x36xf32, #tpu.memory_space<vmem>>, vector<64x4xf32>
    tpu.vector_store %arg14[%c0_5, %c0_6], %4 {strides = array<i32>} : memref<64x36xf32, #tpu.memory_space<vmem>>, vector<64x4xf32>,
    %c1 = arith.constant 1 : index
    %c0_7 = arith.constant 0 : index
    %c0_8 = arith.constant 0 : index
    %6 = vector.load %arg2[%c1, %c0_7, %c0_8] : memref<9x64x256xf32, #tpu.memory_space<vmem>>, vector<1x64x256xf32>
    %7 = vector.shape_cast %6 : vector<1x64x256xf32> to vector<64x256xf32>
    %cst_9 = arith.constant dense<0.000000e+00> : vector<64x4xf32>
    %8 = tpu.matmul %7, %1, %cst_9 {dimension_numbers = #tpu.dot_dimension_numbers<[1], [0], [0], [1], [0, 0, 1, 1], [], []>} : vector<64x256xf32>, vector<256x4xf32>, vector<64x4xf32> -> vector<64x4xf32>
    %c0_10 = arith.constant 0 : index
    %c4 = arith.constant 4 : index
    %9 = vector.load %arg14[%c0_10, %c4] : memref<64x36xf32, #tpu.memory_space<vmem>>, vector<64x4xf32>
    tpu.vector_store %arg14[%c0_10, %c4], %8 {strides = array<i32>} : memref<64x36xf32, #tpu.memory_space<vmem>>, vector<64x4xf32>,
    %c2 = arith.constant 2 : index
    %c0_11 = arith.constant 0 : index
    %c0_12 = arith.constant 0 : index
    %10 = vector.load %arg2[%c2, %c0_11, %c0_12] : memref<9x64x256xf32, #tpu.memory_space<vmem>>, vector<1x64x256xf32>
    %11 = vector.shape_cast %10 : vector<1x64x256xf32> to vector<64x256xf32>
    %cst_13 = arith.constant dense<0.000000e+00> : vector<64x4xf32>
    %12 = tpu.matmul %11, %1, %cst_13 {dimension_numbers = #tpu.dot_dimension_numbers<[1], [0], [0], [1], [0, 0, 1, 1], [], []>} : vector<64x256xf32>, vector<256x4xf32>, vector<64x4xf32> -> vector<64x4xf32>
    %c0_14 = arith.constant 0 : index
    %c8 = arith.constant 8 : index
    %13 = vector.load %arg14[%c0_14, %c8] : memref<64x36xf32, #tpu.memory_space<vmem>>, vector<64x4xf32>
    tpu.vector_store %arg14[%c0_14, %c8], %12 {strides = array<i32>} : memref<64x36xf32, #tpu.memory_space<vmem>>, vector<64x4xf32>,
    %c3 = arith.constant 3 : index
    %c0_15 = arith.constant 0 : index
    %c0_16 = arith.constant 0 : index
    %14 = vector.load %arg2[%c3, %c0_15, %c0_16] : memref<9x64x256xf32, #tpu.memory_space<vmem>>, vector<1x64x256xf32>
    %15 = vector.shape_cast %14 : vector<1x64x256xf32> to vector<64x256xf32>
    %cst_17 = arith.constant dense<0.000000e+00> : vector<64x4xf32>
    %16 = tpu.matmul %15, %1, %cst_17 {dimension_numbers = #tpu.dot_dimension_numbers<[1], [0], [0], [1], [0, 0, 1, 1], [], []>} : vector<64x256xf32>, vector<256x4xf32>, vector<64x4xf32> -> vector<64x4xf32>
    %c0_18 = arith.constant 0 : index
    %c12 = arith.constant 12 : index
    %17 = vector.load %arg14[%c0_18, %c12] : memref<64x36xf32, #tpu.memory_space<vmem>>, vector<64x4xf32>
    tpu.vector_store %arg14[%c0_18, %c12], %16 {strides = array<i32>} : memref<64x36xf32, #tpu.memory_space<vmem>>, vector<64x4xf32>,
    %c4_19 = arith.constant 4 : index
    %c0_20 = arith.constant 0 : index
    %c0_21 = arith.constant 0 : index
    %18 = vector.load %arg2[%c4_19, %c0_20, %c0_21] : memref<9x64x256xf32, #tpu.memory_space<vmem>>, vector<1x64x256xf32>
    %19 = vector.shape_cast %18 : vector<1x64x256xf32> to vector<64x256xf32>
    %cst_22 = arith.constant dense<0.000000e+00> : vector<64x4xf32>
    %20 = tpu.matmul %19, %1, %cst_22 {dimension_numbers = #tpu.dot_dimension_numbers<[1], [0], [0], [1], [0, 0, 1, 1], [], []>} : vector<64x256xf32>, vector<256x4xf32>, vector<64x4xf32> -> vector<64x4xf32>
    %c0_23 = arith.constant 0 : index
    %c16 = arith.constant 16 : index
    %21 = vector.load %arg14[%c0_23, %c16] : memref<64x36xf32, #tpu.memory_space<vmem>>, vector<64x4xf32>
    tpu.vector_store %arg14[%c0_23, %c16], %20 {strides = array<i32>} : memref<64x36xf32, #tpu.memory_space<vmem>>, vector<64x4xf32>,
    %c5 = arith.constant 5 : index
    %c0_24 = arith.constant 0 : index
    %c0_25 = arith.constant 0 : index
    %22 = vector.load %arg2[%c5, %c0_24, %c0_25] : memref<9x64x256xf32, #tpu.memory_space<vmem>>, vector<1x64x256xf32>
    %23 = vector.shape_cast %22 : vector<1x64x256xf32> to vector<64x256xf32>
    %cst_26 = arith.constant dense<0.000000e+00> : vector<64x4xf32>
    %24 = tpu.matmul %23, %1, %cst_26 {dimension_numbers = #tpu.dot_dimension_numbers<[1], [0], [0], [1], [0, 0, 1, 1], [], []>} : vector<64x256xf32>, vector<256x4xf32>, vector<64x4xf32> -> vector<64x4xf32>
    %c0_27 = arith.constant 0 : index
    %c20 = arith.constant 20 : index
    %25 = vector.load %arg14[%c0_27, %c20] : memref<64x36xf32, #tpu.memory_space<vmem>>, vector<64x4xf32>
    tpu.vector_store %arg14[%c0_27, %c20], %24 {strides = array<i32>} : memref<64x36xf32, #tpu.memory_space<vmem>>, vector<64x4xf32>,
    %c6 = arith.constant 6 : index
    %c0_28 = arith.constant 0 : index
    %c0_29 = arith.constant 0 : index
    %26 = vector.load %arg2[%c6, %c0_28, %c0_29] : memref<9x64x256xf32, #tpu.memory_space<vmem>>, vector<1x64x256xf32>
    %27 = vector.shape_cast %26 : vector<1x64x256xf32> to vector<64x256xf32>
    %cst_30 = arith.constant dense<0.000000e+00> : vector<64x4xf32>
    %28 = tpu.matmul %27, %1, %cst_30 {dimension_numbers = #tpu.dot_dimension_numbers<[1], [0], [0], [1], [0, 0, 1, 1], [], []>} : vector<64x256xf32>, vector<256x4xf32>, vector<64x4xf32> -> vector<64x4xf32>
    %c0_31 = arith.constant 0 : index
    %c24 = arith.constant 24 : index
    %29 = vector.load %arg14[%c0_31, %c24] : memref<64x36xf32, #tpu.memory_space<vmem>>, vector<64x4xf32>
    tpu.vector_store %arg14[%c0_31, %c24], %28 {strides = array<i32>} : memref<64x36xf32, #tpu.memory_space<vmem>>, vector<64x4xf32>,
    %c7 = arith.constant 7 : index
    %c0_32 = arith.constant 0 : index
    %c0_33 = arith.constant 0 : index
    %30 = vector.load %arg2[%c7, %c0_32, %c0_33] : memref<9x64x256xf32, #tpu.memory_space<vmem>>, vector<1x64x256xf32>
    %31 = vector.shape_cast %30 : vector<1x64x256xf32> to vector<64x256xf32>
    %cst_34 = arith.constant dense<0.000000e+00> : vector<64x4xf32>
    %32 = tpu.matmul %31, %1, %cst_34 {dimension_numbers = #tpu.dot_dimension_numbers<[1], [0], [0], [1], [0, 0, 1, 1], [], []>} : vector<64x256xf32>, vector<256x4xf32>, vector<64x4xf32> -> vector<64x4xf32>
    %c0_35 = arith.constant 0 : index
    %c28 = arith.constant 28 : index
    %33 = vector.load %arg14[%c0_35, %c28] : memref<64x36xf32, #tpu.memory_space<vmem>>, vector<64x4xf32>
    tpu.vector_store %arg14[%c0_35, %c28], %32 {strides = array<i32>} : memref<64x36xf32, #tpu.memory_space<vmem>>, vector<64x4xf32>,
    %c8_36 = arith.constant 8 : index
    %c0_37 = arith.constant 0 : index
    %c0_38 = arith.constant 0 : index
    %34 = vector.load %arg2[%c8_36, %c0_37, %c0_38] : memref<9x64x256xf32, #tpu.memory_space<vmem>>, vector<1x64x256xf32>
    %35 = vector.shape_cast %34 : vector<1x64x256xf32> to vector<64x256xf32>
    %cst_39 = arith.constant dense<0.000000e+00> : vector<64x4xf32>
    %36 = tpu.matmul %35, %1, %cst_39 {dimension_numbers = #tpu.dot_dimension_numbers<[1], [0], [0], [1], [0, 0, 1, 1], [], []>} : vector<64x256xf32>, vector<256x4xf32>, vector<64x4xf32> -> vector<64x4xf32>
    %c0_40 = arith.constant 0 : index
    %c32 = arith.constant 32 : index
    %37 = vector.load %arg14[%c0_40, %c32] : memref<64x36xf32, #tpu.memory_space<vmem>>, vector<64x4xf32>
    tpu.vector_store %arg14[%c0_40, %c32], %36 {strides = array<i32>} : memref<64x36xf32, #tpu.memory_space<vmem>>, vector<64x4xf32>,
    %c0_41 = arith.constant 0 : index
    %c0_42 = arith.constant 0 : index
    %38 = vector.load %arg14[%c0_41, %c0_42] : memref<64x36xf32, #tpu.memory_space<vmem>>, vector<64x36xf32>
    %c0_43 = arith.constant 0 : index
    %c0_44 = arith.constant 0 : index
    %39 = vector.load %arg3[%c0_43, %c0_44] : memref<36x128xf32, #tpu.memory_space<vmem>>, vector<36x128xf32>
    %cst_45 = arith.constant dense<0.000000e+00> : vector<64x128xf32>
    %40 = tpu.matmul %38, %39, %cst_45 {dimension_numbers = #tpu.dot_dimension_numbers<[1], [0], [0], [1], [0, 0, 1, 1], [], []>} : vector<64x36xf32>, vector<36x128xf32>, vector<64x128xf32> -> vector<64x128xf32>
    %c0_46 = arith.constant 0 : index
    %c0_47 = arith.constant 0 : index
    %41 = vector.load %arg4[%c0_46, %c0_47] : memref<1x128xf32, #tpu.memory_space<vmem>>, vector<1x128xf32>
    %42 = vector.broadcast %41 : vector<1x128xf32> to vector<64x128xf32>
    %43 = arith.addf %40, %42 : vector<64x128xf32>
    %c0_48 = arith.constant 0 : index
    %c0_49 = arith.constant 0 : index
    %c0_50 = arith.constant 0 : index
    %44 = vector.load %arg11[%c0_48, %c0_49, %c0_50] : memref<1x64x128xf32, #tpu.memory_space<vmem>>, vector<1x64x128xf32>
    %45 = vector.shape_cast %44 : vector<1x64x128xf32> to vector<64x128xf32>
    %46 = vector.shape_cast %43 : vector<64x128xf32> to vector<1x64x128xf32>
    tpu.vector_store %arg11[%c0_48, %c0_49, %c0_50], %46 {strides = array<i32>} : memref<1x64x128xf32, #tpu.memory_space<vmem>>, vector<1x64x128xf32>,
    %c0_51 = arith.constant 0 : index
    %c0_52 = arith.constant 0 : index
    %c0_53 = arith.constant 0 : index
    %47 = vector.load %arg5[%c0_51, %c0_52, %c0_53] : memref<9x16x64xf32, #tpu.memory_space<vmem>>, vector<1x16x64xf32>
    %48 = vector.shape_cast %47 : vector<1x16x64xf32> to vector<16x64xf32>
    %cst_54 = arith.constant dense<0.000000e+00> : vector<16x128xf32>
    %49 = tpu.matmul %48, %43, %cst_54 {dimension_numbers = #tpu.dot_dimension_numbers<[1], [0], [0], [1], [0, 0, 1, 1], [], []>} : vector<16x64xf32>, vector<64x128xf32>, vector<16x128xf32> -> vector<16x128xf32>
    %c0_55 = arith.constant 0 : index
    %c0_56 = arith.constant 0 : index
    %50 = vector.load %arg15[%c0_55, %c0_56] : memref<16x1152xf32, #tpu.memory_space<vmem>>, vector<16x128xf32>
    tpu.vector_store %arg15[%c0_55, %c0_56], %49 {strides = array<i32>} : memref<16x1152xf32, #tpu.memory_space<vmem>>, vector<16x128xf32>,
    %c1_57 = arith.constant 1 : index
    %c0_58 = arith.constant 0 : index
    %c0_59 = arith.constant 0 : index
    %51 = vector.load %arg5[%c1_57, %c0_58, %c0_59] : memref<9x16x64xf32, #tpu.memory_space<vmem>>, vector<1x16x64xf32>
    %52 = vector.shape_cast %51 : vector<1x16x64xf32> to vector<16x64xf32>
    %cst_60 = arith.constant dense<0.000000e+00> : vector<16x128xf32>
    %53 = tpu.matmul %52, %43, %cst_60 {dimension_numbers = #tpu.dot_dimension_numbers<[1], [0], [0], [1], [0, 0, 1, 1], [], []>} : vector<16x64xf32>, vector<64x128xf32>, vector<16x128xf32> -> vector<16x128xf32>
    %c0_61 = arith.constant 0 : index
    %c128 = arith.constant 128 : index
    %54 = vector.load %arg15[%c0_61, %c128] : memref<16x1152xf32, #tpu.memory_space<vmem>>, vector<16x128xf32>
    tpu.vector_store %arg15[%c0_61, %c128], %53 {strides = array<i32>} : memref<16x1152xf32, #tpu.memory_space<vmem>>, vector<16x128xf32>,
    %c2_62 = arith.constant 2 : index
    %c0_63 = arith.constant 0 : index
    %c0_64 = arith.constant 0 : index
    %55 = vector.load %arg5[%c2_62, %c0_63, %c0_64] : memref<9x16x64xf32, #tpu.memory_space<vmem>>, vector<1x16x64xf32>
    %56 = vector.shape_cast %55 : vector<1x16x64xf32> to vector<16x64xf32>
    %cst_65 = arith.constant dense<0.000000e+00> : vector<16x128xf32>
    %57 = tpu.matmul %56, %43, %cst_65 {dimension_numbers = #tpu.dot_dimension_numbers<[1], [0], [0], [1], [0, 0, 1, 1], [], []>} : vector<16x64xf32>, vector<64x128xf32>, vector<16x128xf32> -> vector<16x128xf32>
    %c0_66 = arith.constant 0 : index
    %c256 = arith.constant 256 : index
    %58 = vector.load %arg15[%c0_66, %c256] : memref<16x1152xf32, #tpu.memory_space<vmem>>, vector<16x128xf32>
    tpu.vector_store %arg15[%c0_66, %c256], %57 {strides = array<i32>} : memref<16x1152xf32, #tpu.memory_space<vmem>>, vector<16x128xf32>,
    %c3_67 = arith.constant 3 : index
    %c0_68 = arith.constant 0 : index
    %c0_69 = arith.constant 0 : index
    %59 = vector.load %arg5[%c3_67, %c0_68, %c0_69] : memref<9x16x64xf32, #tpu.memory_space<vmem>>, vector<1x16x64xf32>
    %60 = vector.shape_cast %59 : vector<1x16x64xf32> to vector<16x64xf32>
    %cst_70 = arith.constant dense<0.000000e+00> : vector<16x128xf32>
    %61 = tpu.matmul %60, %43, %cst_70 {dimension_numbers = #tpu.dot_dimension_numbers<[1], [0], [0], [1], [0, 0, 1, 1], [], []>} : vector<16x64xf32>, vector<64x128xf32>, vector<16x128xf32> -> vector<16x128xf32>
    %c0_71 = arith.constant 0 : index
    %c384 = arith.constant 384 : index
    %62 = vector.load %arg15[%c0_71, %c384] : memref<16x1152xf32, #tpu.memory_space<vmem>>, vector<16x128xf32>
    tpu.vector_store %arg15[%c0_71, %c384], %61 {strides = array<i32>} : memref<16x1152xf32, #tpu.memory_space<vmem>>, vector<16x128xf32>,
    %c4_72 = arith.constant 4 : index
    %c0_73 = arith.constant 0 : index
    %c0_74 = arith.constant 0 : index
    %63 = vector.load %arg5[%c4_72, %c0_73, %c0_74] : memref<9x16x64xf32, #tpu.memory_space<vmem>>, vector<1x16x64xf32>
    %64 = vector.shape_cast %63 : vector<1x16x64xf32> to vector<16x64xf32>
    %cst_75 = arith.constant dense<0.000000e+00> : vector<16x128xf32>
    %65 = tpu.matmul %64, %43, %cst_75 {dimension_numbers = #tpu.dot_dimension_numbers<[1], [0], [0], [1], [0, 0, 1, 1], [], []>} : vector<16x64xf32>, vector<64x128xf32>, vector<16x128xf32> -> vector<16x128xf32>
    %c0_76 = arith.constant 0 : index
    %c512 = arith.constant 512 : index
    %66 = vector.load %arg15[%c0_76, %c512] : memref<16x1152xf32, #tpu.memory_space<vmem>>, vector<16x128xf32>
    tpu.vector_store %arg15[%c0_76, %c512], %65 {strides = array<i32>} : memref<16x1152xf32, #tpu.memory_space<vmem>>, vector<16x128xf32>,
    %c5_77 = arith.constant 5 : index
    %c0_78 = arith.constant 0 : index
    %c0_79 = arith.constant 0 : index
    %67 = vector.load %arg5[%c5_77, %c0_78, %c0_79] : memref<9x16x64xf32, #tpu.memory_space<vmem>>, vector<1x16x64xf32>
    %68 = vector.shape_cast %67 : vector<1x16x64xf32> to vector<16x64xf32>
    %cst_80 = arith.constant dense<0.000000e+00> : vector<16x128xf32>
    %69 = tpu.matmul %68, %43, %cst_80 {dimension_numbers = #tpu.dot_dimension_numbers<[1], [0], [0], [1], [0, 0, 1, 1], [], []>} : vector<16x64xf32>, vector<64x128xf32>, vector<16x128xf32> -> vector<16x128xf32>
    %c0_81 = arith.constant 0 : index
    %c640 = arith.constant 640 : index
    %70 = vector.load %arg15[%c0_81, %c640] : memref<16x1152xf32, #tpu.memory_space<vmem>>, vector<16x128xf32>
    tpu.vector_store %arg15[%c0_81, %c640], %69 {strides = array<i32>} : memref<16x1152xf32, #tpu.memory_space<vmem>>, vector<16x128xf32>,
    %c6_82 = arith.constant 6 : index
    %c0_83 = arith.constant 0 : index
    %c0_84 = arith.constant 0 : index
    %71 = vector.load %arg5[%c6_82, %c0_83, %c0_84] : memref<9x16x64xf32, #tpu.memory_space<vmem>>, vector<1x16x64xf32>
    %72 = vector.shape_cast %71 : vector<1x16x64xf32> to vector<16x64xf32>
    %cst_85 = arith.constant dense<0.000000e+00> : vector<16x128xf32>
    %73 = tpu.matmul %72, %43, %cst_85 {dimension_numbers = #tpu.dot_dimension_numbers<[1], [0], [0], [1], [0, 0, 1, 1], [], []>} : vector<16x64xf32>, vector<64x128xf32>, vector<16x128xf32> -> vector<16x128xf32>
    %c0_86 = arith.constant 0 : index
    %c768 = arith.constant 768 : index
    %74 = vector.load %arg15[%c0_86, %c768] : memref<16x1152xf32, #tpu.memory_space<vmem>>, vector<16x128xf32>
    tpu.vector_store %arg15[%c0_86, %c768], %73 {strides = array<i32>} : memref<16x1152xf32, #tpu.memory_space<vmem>>, vector<16x128xf32>,
    %c7_87 = arith.constant 7 : index
    %c0_88 = arith.constant 0 : index
    %c0_89 = arith.constant 0 : index
    %75 = vector.load %arg5[%c7_87, %c0_88, %c0_89] : memref<9x16x64xf32, #tpu.memory_space<vmem>>, vector<1x16x64xf32>
    %76 = vector.shape_cast %75 : vector<1x16x64xf32> to vector<16x64xf32>
    %cst_90 = arith.constant dense<0.000000e+00> : vector<16x128xf32>
    %77 = tpu.matmul %76, %43, %cst_90 {dimension_numbers = #tpu.dot_dimension_numbers<[1], [0], [0], [1], [0, 0, 1, 1], [], []>} : vector<16x64xf32>, vector<64x128xf32>, vector<16x128xf32> -> vector<16x128xf32>
    %c0_91 = arith.constant 0 : index
    %c896 = arith.constant 896 : index
    %78 = vector.load %arg15[%c0_91, %c896] : memref<16x1152xf32, #tpu.memory_space<vmem>>, vector<16x128xf32>
    tpu.vector_store %arg15[%c0_91, %c896], %77 {strides = array<i32>} : memref<16x1152xf32, #tpu.memory_space<vmem>>, vector<16x128xf32>,
    %c8_92 = arith.constant 8 : index
    %c0_93 = arith.constant 0 : index
    %c0_94 = arith.constant 0 : index
    %79 = vector.load %arg5[%c8_92, %c0_93, %c0_94] : memref<9x16x64xf32, #tpu.memory_space<vmem>>, vector<1x16x64xf32>
    %80 = vector.shape_cast %79 : vector<1x16x64xf32> to vector<16x64xf32>
    %cst_95 = arith.constant dense<0.000000e+00> : vector<16x128xf32>
    %81 = tpu.matmul %80, %43, %cst_95 {dimension_numbers = #tpu.dot_dimension_numbers<[1], [0], [0], [1], [0, 0, 1, 1], [], []>} : vector<16x64xf32>, vector<64x128xf32>, vector<16x128xf32> -> vector<16x128xf32>
    %c0_96 = arith.constant 0 : index
    %c1024 = arith.constant 1024 : index
    %82 = vector.load %arg15[%c0_96, %c1024] : memref<16x1152xf32, #tpu.memory_space<vmem>>, vector<16x128xf32>
    tpu.vector_store %arg15[%c0_96, %c1024], %81 {strides = array<i32>} : memref<16x1152xf32, #tpu.memory_space<vmem>>, vector<16x128xf32>,
    %c0_97 = arith.constant 0 : index
    %c0_98 = arith.constant 0 : index
    %83 = vector.load %arg15[%c0_97, %c0_98] : memref<16x1152xf32, #tpu.memory_space<vmem>>, vector<16x1152xf32>
    %c0_99 = arith.constant 0 : index
    %c0_100 = arith.constant 0 : index
    %84 = vector.load %arg6[%c0_99, %c0_100] : memref<1152x64xf32, #tpu.memory_space<vmem>>, vector<1152x64xf32>
    %cst_101 = arith.constant dense<0.000000e+00> : vector<16x64xf32>
    %85 = tpu.matmul %83, %84, %cst_101 {dimension_numbers = #tpu.dot_dimension_numbers<[1], [0], [0], [1], [0, 0, 1, 1], [], []>} : vector<16x1152xf32>, vector<1152x64xf32>, vector<16x64xf32> -> vector<16x64xf32>
    %c0_102 = arith.constant 0 : index
    %c0_103 = arith.constant 0 : index
    %86 = vector.load %arg7[%c0_102, %c0_103] : memref<1x64xf32, #tpu.memory_space<vmem>>, vector<1x64xf32>
    %87 = vector.broadcast %86 : vector<1x64xf32> to vector<16x64xf32>
    %88 = arith.addf %85, %87 : vector<16x64xf32>
    %c0_104 = arith.constant 0 : index
    %c0_105 = arith.constant 0 : index
    %c0_106 = arith.constant 0 : index
    %89 = vector.load %arg12[%c0_104, %c0_105, %c0_106] : memref<1x16x64xf32, #tpu.memory_space<vmem>>, vector<1x16x64xf32>
    %90 = vector.shape_cast %89 : vector<1x16x64xf32> to vector<16x64xf32>
    %91 = vector.shape_cast %88 : vector<16x64xf32> to vector<1x16x64xf32>
    tpu.vector_store %arg12[%c0_104, %c0_105, %c0_106], %91 {strides = array<i32>} : memref<1x16x64xf32, #tpu.memory_space<vmem>>, vector<1x16x64xf32>,
    %c0_107 = arith.constant 0 : index
    %c0_108 = arith.constant 0 : index
    %c0_109 = arith.constant 0 : index
    %92 = vector.load %arg8[%c0_107, %c0_108, %c0_109] : memref<9x4x16xf32, #tpu.memory_space<vmem>>, vector<1x4x16xf32>
    %93 = vector.shape_cast %92 : vector<1x4x16xf32> to vector<4x16xf32>
    %cst_110 = arith.constant dense<0.000000e+00> : vector<4x64xf32>
    %94 = tpu.matmul %93, %88, %cst_110 {dimension_numbers = #tpu.dot_dimension_numbers<[1], [0], [0], [1], [0, 0, 1, 1], [], []>} : vector<4x16xf32>, vector<16x64xf32>, vector<4x64xf32> -> vector<4x64xf32>
    %c0_111 = arith.constant 0 : index
    %c0_112 = arith.constant 0 : index
    %95 = vector.load %arg16[%c0_111, %c0_112] : memref<4x576xf32, #tpu.memory_space<vmem>>, vector<4x64xf32>
    tpu.vector_store %arg16[%c0_111, %c0_112], %94 {strides = array<i32>} : memref<4x576xf32, #tpu.memory_space<vmem>>, vector<4x64xf32>,
    %c1_113 = arith.constant 1 : index
    %c0_114 = arith.constant 0 : index
    %c0_115 = arith.constant 0 : index
    %96 = vector.load %arg8[%c1_113, %c0_114, %c0_115] : memref<9x4x16xf32, #tpu.memory_space<vmem>>, vector<1x4x16xf32>
    %97 = vector.shape_cast %96 : vector<1x4x16xf32> to vector<4x16xf32>
    %cst_116 = arith.constant dense<0.000000e+00> : vector<4x64xf32>
    %98 = tpu.matmul %97, %88, %cst_116 {dimension_numbers = #tpu.dot_dimension_numbers<[1], [0], [0], [1], [0, 0, 1, 1], [], []>} : vector<4x16xf32>, vector<16x64xf32>, vector<4x64xf32> -> vector<4x64xf32>
    %c0_117 = arith.constant 0 : index
    %c64 = arith.constant 64 : index
    %99 = vector.load %arg16[%c0_117, %c64] : memref<4x576xf32, #tpu.memory_space<vmem>>, vector<4x64xf32>
    tpu.vector_store %arg16[%c0_117, %c64], %98 {strides = array<i32>} : memref<4x576xf32, #tpu.memory_space<vmem>>, vector<4x64xf32>,
    %c2_118 = arith.constant 2 : index
    %c0_119 = arith.constant 0 : index
    %c0_120 = arith.constant 0 : index
    %100 = vector.load %arg8[%c2_118, %c0_119, %c0_120] : memref<9x4x16xf32, #tpu.memory_space<vmem>>, vector<1x4x16xf32>
    %101 = vector.shape_cast %100 : vector<1x4x16xf32> to vector<4x16xf32>
    %cst_121 = arith.constant dense<0.000000e+00> : vector<4x64xf32>
    %102 = tpu.matmul %101, %88, %cst_121 {dimension_numbers = #tpu.dot_dimension_numbers<[1], [0], [0], [1], [0, 0, 1, 1], [], []>} : vector<4x16xf32>, vector<16x64xf32>, vector<4x64xf32> -> vector<4x64xf32>
    %c0_122 = arith.constant 0 : index
    %c128_123 = arith.constant 128 : index
    %103 = vector.load %arg16[%c0_122, %c128_123] : memref<4x576xf32, #tpu.memory_space<vmem>>, vector<4x64xf32>
    tpu.vector_store %arg16[%c0_122, %c128_123], %102 {strides = array<i32>} : memref<4x576xf32, #tpu.memory_space<vmem>>, vector<4x64xf32>,
    %c3_124 = arith.constant 3 : index
    %c0_125 = arith.constant 0 : index
    %c0_126 = arith.constant 0 : index
    %104 = vector.load %arg8[%c3_124, %c0_125, %c0_126] : memref<9x4x16xf32, #tpu.memory_space<vmem>>, vector<1x4x16xf32>
    %105 = vector.shape_cast %104 : vector<1x4x16xf32> to vector<4x16xf32>
    %cst_127 = arith.constant dense<0.000000e+00> : vector<4x64xf32>
    %106 = tpu.matmul %105, %88, %cst_127 {dimension_numbers = #tpu.dot_dimension_numbers<[1], [0], [0], [1], [0, 0, 1, 1], [], []>} : vector<4x16xf32>, vector<16x64xf32>, vector<4x64xf32> -> vector<4x64xf32>
    %c0_128 = arith.constant 0 : index
    %c192 = arith.constant 192 : index
    %107 = vector.load %arg16[%c0_128, %c192] : memref<4x576xf32, #tpu.memory_space<vmem>>, vector<4x64xf32>
    tpu.vector_store %arg16[%c0_128, %c192], %106 {strides = array<i32>} : memref<4x576xf32, #tpu.memory_space<vmem>>, vector<4x64xf32>,
    %c4_129 = arith.constant 4 : index
    %c0_130 = arith.constant 0 : index
    %c0_131 = arith.constant 0 : index
    %108 = vector.load %arg8[%c4_129, %c0_130, %c0_131] : memref<9x4x16xf32, #tpu.memory_space<vmem>>, vector<1x4x16xf32>
    %109 = vector.shape_cast %108 : vector<1x4x16xf32> to vector<4x16xf32>
    %cst_132 = arith.constant dense<0.000000e+00> : vector<4x64xf32>
    %110 = tpu.matmul %109, %88, %cst_132 {dimension_numbers = #tpu.dot_dimension_numbers<[1], [0], [0], [1], [0, 0, 1, 1], [], []>} : vector<4x16xf32>, vector<16x64xf32>, vector<4x64xf32> -> vector<4x64xf32>
    %c0_133 = arith.constant 0 : index
    %c256_134 = arith.constant 256 : index
    %111 = vector.load %arg16[%c0_133, %c256_134] : memref<4x576xf32, #tpu.memory_space<vmem>>, vector<4x64xf32>
    tpu.vector_store %arg16[%c0_133, %c256_134], %110 {strides = array<i32>} : memref<4x576xf32, #tpu.memory_space<vmem>>, vector<4x64xf32>,
    %c5_135 = arith.constant 5 : index
    %c0_136 = arith.constant 0 : index
    %c0_137 = arith.constant 0 : index
    %112 = vector.load %arg8[%c5_135, %c0_136, %c0_137] : memref<9x4x16xf32, #tpu.memory_space<vmem>>, vector<1x4x16xf32>
    %113 = vector.shape_cast %112 : vector<1x4x16xf32> to vector<4x16xf32>
    %cst_138 = arith.constant dense<0.000000e+00> : vector<4x64xf32>
    %114 = tpu.matmul %113, %88, %cst_138 {dimension_numbers = #tpu.dot_dimension_numbers<[1], [0], [0], [1], [0, 0, 1, 1], [], []>} : vector<4x16xf32>, vector<16x64xf32>, vector<4x64xf32> -> vector<4x64xf32>
    %c0_139 = arith.constant 0 : index
    %c320 = arith.constant 320 : index
    %115 = vector.load %arg16[%c0_139, %c320] : memref<4x576xf32, #tpu.memory_space<vmem>>, vector<4x64xf32>
    tpu.vector_store %arg16[%c0_139, %c320], %114 {strides = array<i32>} : memref<4x576xf32, #tpu.memory_space<vmem>>, vector<4x64xf32>,
    %c6_140 = arith.constant 6 : index
    %c0_141 = arith.constant 0 : index
    %c0_142 = arith.constant 0 : index
    %116 = vector.load %arg8[%c6_140, %c0_141, %c0_142] : memref<9x4x16xf32, #tpu.memory_space<vmem>>, vector<1x4x16xf32>
    %117 = vector.shape_cast %116 : vector<1x4x16xf32> to vector<4x16xf32>
    %cst_143 = arith.constant dense<0.000000e+00> : vector<4x64xf32>
    %118 = tpu.matmul %117, %88, %cst_143 {dimension_numbers = #tpu.dot_dimension_numbers<[1], [0], [0], [1], [0, 0, 1, 1], [], []>} : vector<4x16xf32>, vector<16x64xf32>, vector<4x64xf32> -> vector<4x64xf32>
    %c0_144 = arith.constant 0 : index
    %c384_145 = arith.constant 384 : index
    %119 = vector.load %arg16[%c0_144, %c384_145] : memref<4x576xf32, #tpu.memory_space<vmem>>, vector<4x64xf32>
    tpu.vector_store %arg16[%c0_144, %c384_145], %118 {strides = array<i32>} : memref<4x576xf32, #tpu.memory_space<vmem>>, vector<4x64xf32>,
    %c7_146 = arith.constant 7 : index
    %c0_147 = arith.constant 0 : index
    %c0_148 = arith.constant 0 : index
    %120 = vector.load %arg8[%c7_146, %c0_147, %c0_148] : memref<9x4x16xf32, #tpu.memory_space<vmem>>, vector<1x4x16xf32>
    %121 = vector.shape_cast %120 : vector<1x4x16xf32> to vector<4x16xf32>
    %cst_149 = arith.constant dense<0.000000e+00> : vector<4x64xf32>
    %122 = tpu.matmul %121, %88, %cst_149 {dimension_numbers = #tpu.dot_dimension_numbers<[1], [0], [0], [1], [0, 0, 1, 1], [], []>} : vector<4x16xf32>, vector<16x64xf32>, vector<4x64xf32> -> vector<4x64xf32>
    %c0_150 = arith.constant 0 : index
    %c448 = arith.constant 448 : index
    %123 = vector.load %arg16[%c0_150, %c448] : memref<4x576xf32, #tpu.memory_space<vmem>>, vector<4x64xf32>
    tpu.vector_store %arg16[%c0_150, %c448], %122 {strides = array<i32>} : memref<4x576xf32, #tpu.memory_space<vmem>>, vector<4x64xf32>,
    %c8_151 = arith.constant 8 : index
    %c0_152 = arith.constant 0 : index
    %c0_153 = arith.constant 0 : index
    %124 = vector.load %arg8[%c8_151, %c0_152, %c0_153] : memref<9x4x16xf32, #tpu.memory_space<vmem>>, vector<1x4x16xf32>
    %125 = vector.shape_cast %124 : vector<1x4x16xf32> to vector<4x16xf32>
    %cst_154 = arith.constant dense<0.000000e+00> : vector<4x64xf32>
    %126 = tpu.matmul %125, %88, %cst_154 {dimension_numbers = #tpu.dot_dimension_numbers<[1], [0], [0], [1], [0, 0, 1, 1], [], []>} : vector<4x16xf32>, vector<16x64xf32>, vector<4x64xf32> -> vector<4x64xf32>
    %c0_155 = arith.constant 0 : index
    %c512_156 = arith.constant 512 : index
    %127 = vector.load %arg16[%c0_155, %c512_156] : memref<4x576xf32, #tpu.memory_space<vmem>>, vector<4x64xf32>
    tpu.vector_store %arg16[%c0_155, %c512_156], %126 {strides = array<i32>} : memref<4x576xf32, #tpu.memory_space<vmem>>, vector<4x64xf32>,
    %c0_157 = arith.constant 0 : index
    %c0_158 = arith.constant 0 : index
    %128 = vector.load %arg16[%c0_157, %c0_158] : memref<4x576xf32, #tpu.memory_space<vmem>>, vector<4x576xf32>
    %c0_159 = arith.constant 0 : index
    %c0_160 = arith.constant 0 : index
    %129 = vector.load %arg9[%c0_159, %c0_160] : memref<576x32xf32, #tpu.memory_space<vmem>>, vector<576x32xf32>
    %cst_161 = arith.constant dense<0.000000e+00> : vector<4x32xf32>
    %130 = tpu.matmul %128, %129, %cst_161 {dimension_numbers = #tpu.dot_dimension_numbers<[1], [0], [0], [1], [0, 0, 1, 1], [], []>} : vector<4x576xf32>, vector<576x32xf32>, vector<4x32xf32> -> vector<4x32xf32>
    %c0_162 = arith.constant 0 : index
    %c0_163 = arith.constant 0 : index
    %131 = vector.load %arg10[%c0_162, %c0_163] : memref<1x32xf32, #tpu.memory_space<vmem>>, vector<1x32xf32>
    %132 = vector.broadcast %131 : vector<1x32xf32> to vector<4x32xf32>
    %133 = arith.addf %130, %132 : vector<4x32xf32>
    %c0_164 = arith.constant 0 : index
    %c0_165 = arith.constant 0 : index
    %c0_166 = arith.constant 0 : index
    %134 = vector.load %arg13[%c0_164, %c0_165, %c0_166] : memref<1x4x32xf32, #tpu.memory_space<vmem>>, vector<1x4x32xf32>
    %135 = vector.shape_cast %134 : vector<1x4x32xf32> to vector<4x32xf32>
    %136 = vector.shape_cast %133 : vector<4x32xf32> to vector<1x4x32xf32>
    tpu.vector_store %arg13[%c0_164, %c0_165, %c0_166], %136 {strides = array<i32>} : memref<1x4x32xf32, #tpu.memory_space<vmem>>, vector<1x4x32xf32>,
    return
  }
  func.func @transform_0(%arg0: i32) -> (i32, i32, i32) {
    %c0_i32 = arith.constant 0 : i32
    %c0_i32_0 = arith.constant 0 : i32
    %c0_i32_1 = arith.constant 0 : i32
    return %arg0, %c0_i32, %c0_i32_0 : i32, i32, i32
  }
  func.func @transform_1(%arg0: i32) -> (i32, i32, i32) {
    %c0_i32 = arith.constant 0 : i32
    %c0_i32_0 = arith.constant 0 : i32
    %c0_i32_1 = arith.constant 0 : i32
    %c0_i32_2 = arith.constant 0 : i32
    return %c0_i32, %c0_i32_0, %c0_i32_1 : i32, i32, i32
  }
  func.func @transform_2(%arg0: i32) -> (i32, i32) {
    %c0_i32 = arith.constant 0 : i32
    %c0_i32_0 = arith.constant 0 : i32
    %c0_i32_1 = arith.constant 0 : i32
    return %c0_i32, %c0_i32_0 : i32, i32
  }
  func.func @transform_3(%arg0: i32) -> (i32, i32) {
    %c0_i32 = arith.constant 0 : i32
    %c0_i32_0 = arith.constant 0 : i32
    %c0_i32_1 = arith.constant 0 : i32
    return %c0_i32, %c0_i32_0 : i32, i32
  }
  func.func @transform_4(%arg0: i32) -> (i32, i32, i32) {
    %c0_i32 = arith.constant 0 : i32
    %c0_i32_0 = arith.constant 0 : i32
    %c0_i32_1 = arith.constant 0 : i32
    %c0_i32_2 = arith.constant 0 : i32
    return %c0_i32, %c0_i32_0, %c0_i32_1 : i32, i32, i32
  }
  func.func @transform_5(%arg0: i32) -> (i32, i32) {
    %c0_i32 = arith.constant 0 : i32
    %c0_i32_0 = arith.constant 0 : i32
    %c0_i32_1 = arith.constant 0 : i32
    return %c0_i32, %c0_i32_0 : i32, i32
  }
  func.func @transform_6(%arg0: i32) -> (i32, i32) {
    %c0_i32 = arith.constant 0 : i32
    %c0_i32_0 = arith.constant 0 : i32
    %c0_i32_1 = arith.constant 0 : i32
    return %c0_i32, %c0_i32_0 : i32, i32
  }
  func.func @transform_7(%arg0: i32) -> (i32, i32, i32) {
    %c0_i32 = arith.constant 0 : i32
    %c0_i32_0 = arith.constant 0 : i32
    %c0_i32_1 = arith.constant 0 : i32
    %c0_i32_2 = arith.constant 0 : i32
    return %c0_i32, %c0_i32_0, %c0_i32_1 : i32, i32, i32
  }
  func.func @transform_8(%arg0: i32) -> (i32, i32) {
    %c0_i32 = arith.constant 0 : i32
    %c0_i32_0 = arith.constant 0 : i32
    %c0_i32_1 = arith.constant 0 : i32
    return %c0_i32, %c0_i32_0 : i32, i32
  }
  func.func @transform_9(%arg0: i32) -> (i32, i32) {
    %c0_i32 = arith.constant 0 : i32
    %c0_i32_0 = arith.constant 0 : i32
    %c0_i32_1 = arith.constant 0 : i32
    return %c0_i32, %c0_i32_0 : i32, i32
  }
  func.func @transform_10(%arg0: i32) -> (i32, i32, i32) {
    %c0_i32 = arith.constant 0 : i32
    %c0_i32_0 = arith.constant 0 : i32
    %c0_i32_1 = arith.constant 0 : i32
    return %arg0, %c0_i32, %c0_i32_0 : i32, i32, i32
  }
  func.func @transform_11(%arg0: i32) -> (i32, i32, i32) {
    %c0_i32 = arith.constant 0 : i32
    %c0_i32_0 = arith.constant 0 : i32
    %c0_i32_1 = arith.constant 0 : i32
    return %arg0, %c0_i32, %c0_i32_0 : i32, i32, i32
  }
  func.func @transform_12(%arg0: i32) -> (i32, i32, i32) {
    %c0_i32 = arith.constant 0 : i32
    %c0_i32_0 = arith.constant 0 : i32
    %c0_i32_1 = arith.constant 0 : i32
    return %arg0, %c0_i32, %c0_i32_0 : i32, i32, i32
  }
}

</mosaic_0001>

<bundles_post_ra>
// kernel: downsample_forward.1
= control target key start
LH: loop header
LB: loop body
LE: loop exit
PB: predicated region body
PF: predicated region fallthrough
CT: control target
= control target key end

     0   :  { %s8391_s0 = inlined_call_operand.vmem [shape: f32[2,256,4], index: 0, kind: input, shape index: {}]   ;;  %s8392_s1 = inlined_call_operand.vmem [shape: f32[9,64,256], index: 1, kind: input, shape index: {}]   ;;  %s8393_s2 = inlined_call_operand.vmem [shape: f32[36,128], index: 2, kind: input, shape index: {}]   ;;  %s8394_s3 = inlined_call_operand.vmem [shape: f32[1,128], index: 3, kind: input, shape index: {}]   ;;  %s8395_s4 = inlined_call_operand.vmem [shape: f32[9,16,64], index: 4, kind: input, shape index: {}]   ;;  %s8396_s5 = inlined_call_operand.vmem [shape: f32[1152,64], index: 5, kind: input, shape index: {}]   ;;  %s8397_s6 = inlined_call_operand.vmem [shape: f32[1,64], index: 6, kind: input, shape index: {}]   ;;  %s8398_s7 = inlined_call_operand.vmem [shape: f32[9,4,16], index: 7, kind: input, shape index: {}]   ;;  %s8399_s8 = inlined_call_operand.vmem [shape: f32[576,32], index: 8, kind: input, shape index: {}]   ;;  %s8400_s9 = inlined_call_operand.vmem [shape: f32[1,32], index: 9, kind: input, shape index: {}]   ;;  %s8401_s10 = inlined_call_operand.hbm [shape: f32[2,64,128], index: 10, kind: output, shape index: {0}]   ;;  %s8402_s11 = inlined_call_operand.hbm [shape: f32[2,16,64], index: 11, kind: output, shape index: {1}]   ;;  %s8403_s12 = inlined_call_operand.hbm [shape: f32[2,4,32], index: 12, kind: output, shape index: {2}]  }
   0x1   :  { %8408 = sst [smem:[#allocation12_spill]] %s8391_s0 }
   0x2   :  { %8409 = sst [smem:[#allocation13_spill]] %s8392_s1 }
   0x3   :  { %8410 = sst [smem:[#allocation14_spill]] %s8393_s2 }
   0x4   :  { %8411 = sst [smem:[#allocation15_spill]] %s8394_s3 }
   0x5   :  { %8412 = sst [smem:[#allocation16_spill]] %s8395_s4 }
   0x6   :  { %8413 = sst [smem:[#allocation17_spill]] %s8396_s5 }
   0x7   :  { %18 = vsyncpa [#allocation6], 0 }
   0x8   :  { %20 = vsyncpa [#allocation6 + $0x1], 0 }
   0x9   :  { %21 = vsyncpa [#allocation8], 0 }
   0xa   :  { %23 = vsyncpa [#allocation8 + $0x1], 0  ;;  %s6227_s21 = smov 0   ;;  %s6229_s22 = smov 0  }
   0xb   :  { %s6231_s23 = smov 0   ;;  %s6233_s24 = smov 0  }
   0xc LB: > { %s6248_s25 = sadd.s32 4294967295, %s6145_s24   ;;  %s8404_s26 = sadd.s32 4294967294, %s6145_s24   ;;  %s6145_s24 = sphi %s6233_s24, %s8428_s24   ;;  %s6141_s23 = sphi %s6231_s23, %s8427_s23   ;;  %s6137_s22 = sphi %s6229_s22, %s8426_s22   ;;  %s6133_s21 = sphi %s6227_s21, %s8425_s21  }
   0xd   : > { %s6252_s27 = sadd.s32 1, %s6145_s24   ;;  %s251_s28 = sadd.s32 1, %s6141_s23 }
   0xe   : > { %s248_s29 = ssub.s32 %s6145_s24, %s6252_s27  ;;  %p261_p0 = scmp.ne.s32.totalorder %s6141_s23, %s6137_s22 }
   0xf   : > { %p249_p1 = scmp.eq.s32.totalorder %s248_s29, 0  ;;  %p262_p2 = scmp.eq.s32.totalorder %s6248_s25, 1 }
  0x10   : > { %p267_p3 = scmp.ne.s32.totalorder %s6137_s22, %s6133_s21  ;;  %p268_p4 = scmp.eq.s32.totalorder %s8404_s26, 1 }
  0x11   : > { %s6265_s30 = scalar_select %p249_p1, %s6141_s23, %s251_s28  }
  0x12   : > { %p6267_p5 = por %p262_p2, %p261_p0  ;;  %p6271_p6 = por %p268_p4, %p267_p3 }
  0x13   : > { %p4562_p7 = scmp.ge.s32.totalorder %s6145_s24, 1  ;;  %p373_p8 = scmp.lt.s32.totalorder %s6145_s24, 3 }
  0x15   : > { %p374_p9 = pnand %p4562_p7, %p373_p8 }
  0x16   : > { %p425_p10 = scmp.lt.s32.totalorder (!%p374_p9), %s6248_s25, 1  ;;  %s8416_s1 = sld [smem:[#allocation13_spill]] (!%p374_p9) }
  0x17   : > { %377 = sbr.rel (%p374_p9) target bundleno = 1826 (0x722), region = 60  ;;  %s8417_s0 = sld [smem:[#allocation12_spill]] (!%p374_p9) }
  0x18   : > { %s6147_s16 = smov (!%p374_p9), 4   ;;  %s6152_s28 = smov (!%p374_p9), 24  }
  0x19   : > { %s6153_s29 = smov (!%p374_p9), 28   ;;  %s8418_s2 = sld [smem:[#allocation14_spill]] (!%p374_p9) }
  0x1a   : > { %s6154_s18 = smov (!%p374_p9), 32   ;;  %s8419_s4 = sld [smem:[#allocation16_spill]] (!%p374_p9) }
  0x1b   : > { %s8420_s3 = sld [smem:[#allocation15_spill]] (!%p374_p9) }
  0x1c   : > { %v463_v0 = vld [vmem:[%s8416_s1 + $0x8] sm:$0xff]  ;;  %s426_s19 = scalar_select %p425_p10, %s6248_s25, 1  ;;  %v462_v34 = vld [vmem:[%s8416_s1] sm:$0xff]  ;;  %v465_v35 = vld [vmem:[%s8416_s1 + $0x18] sm:$0xff]  ;;  %vm583_vm0 = vcmask 31744   ;;  %vm746_vm1 = vcmask 64544  }
  0x1d   : > { %542 = vmatprep.mubr.f32.mxu0 %v463_v0  ;;  %v4569_v1 = vld [vmem:[%s8416_s1 + $0x88] sm:$0xff]  ;;  %v4568_v36 = vld [vmem:[%s8416_s1 + $0x80] sm:$0xff]  ;;  %v464_v37 = vld [vmem:[%s8416_s1 + $0x10] sm:$0xff]  ;;  %vm909_vm2 = vcmask 97344   ;;  %vm1941_vm3 = vcmask 1043456   ;;  %vm1072_vm4 = vcmask 130144  }
  0x1e   : > { %673 = vmatprep.mubr.f32.mxu1 %v4569_v1  ;;  %s4770_s20 = sshll.u32 %s426_s19, 8  ;;  %v467_v38 = vld [vmem:[%s8416_s1 + $0x28] sm:$0xff]  ;;  %v4571_v39 = vld [vmem:[%s8416_s1 + $0x98] sm:$0xff]  ;;  %v466_v40 = vld [vmem:[%s8416_s1 + $0x20] sm:$0xff]  ;;  %s6150_s19 = smov 16   ;;  %vm1235_vm5 = vcmask 162944  }
  0x1f   : > { %s6288_s26 = scalar_lea.vmem %s8417_s0, %s4770_s20  ;;  %v4570_v41 = vld [vmem:[%s8416_s1 + $0x90] sm:$0xff]  ;;  %v469_v42 = vld [vmem:[%s8416_s1 + $0x38] sm:$0xff]  ;;  %v4573_v43 = vld [vmem:[%s8416_s1 + $0xa8] sm:$0xff]  ;;  %s8405_s0 = smov 8   ;;  %vm1398_vm6 = vcmask 195744   ;;  %vm1561_vm7 = vcmask 228544  }
  0x20   : > { %v6291_v2 = vld [vmem:[%s6288_s26 + $0xf8] sm:$0xff]  ;;  %v6297_v4 = vld [vmem:[%s6288_s26 + $0xf0] sm:$0xff]  ;;  %v6306_v6 = vld [vmem:[%s6288_s26 + $0xe8] sm:$0xff]  ;;  %s6151_s20 = smov 20   ;;  %vm1724_vm8 = vcmask 261344   ;;  %vm1887_vm9 = vcmask 294144  }
  0x21   : > { %v6294_v3 = vld [vmem:[%s6288_s26 + $0x78] sm:$0xff]  ;;  %4773 = vmatprep.subr.mxu0 %v6291_v2  ;;  %v6301_v5 = vld [vmem:[%s6288_s26 + $0x70] sm:$0xff]  ;;  %4829 = vmatprep.subr.mxu1 %v6291_v2  ;;  %v6311_v7 = vld [vmem:[%s6288_s26 + $0x68] sm:$0xff]  ;;  %vm1916_vm10 = vcmask 293888   ;;  %vm2060_vm11 = vcmask 523264   ;;  %s8421_s5 = sld [smem:[#allocation17_spill]] }
  0x22   : > { %4774 = vmatpush3.msra.mxu0 %v6294_v3  ;;  %4830 = vmatpush3.msra.mxu1 %v6294_v3  ;;  %v6316_v8 = vld [vmem:[%s6288_s26 + $0xe0] sm:$0xff]  ;;  %v6326_v10 = vld [vmem:[%s6288_s26 + $0xd8] sm:$0xff]  ;;  %v6336_v12 = vld [vmem:[%s6288_s26 + $0xd0] sm:$0xff]  ;;  %vm6156_vm12 = vmmov 0   ;;  %vm3379_vm13 = vcmask 130048   ;;  %vm3453_vm14 = vcmask 519168  }
  0x23   : > { %4775 = vmatprep.subr.mxu0 %v6297_v4  ;;  %4831 = vmatprep.subr.mxu1 %v6297_v4  ;;  %v6321_v9 = vld [vmem:[%s6288_s26 + $0x60] sm:$0xff]  ;;  %v6331_v11 = vld [vmem:[%s6288_s26 + $0x58] sm:$0xff]  ;;  %v6341_v13 = vld [vmem:[%s6288_s26 + $0x50] sm:$0xff]  ;;  %vm3534_vm15 = vcmask 1043968  }
  0x24   : > { %4776 = vmatpush3.msra.mxu0 %v6301_v5  ;;  %4832 = vmatpush3.msra.mxu1 %v6301_v5  ;;  %v6346_v14 = vld [vmem:[%s6288_s26 + $0xc8] sm:$0xff]  ;;  %v6356_v16 = vld [vmem:[%s6288_s26 + $0xc0] sm:$0xff]  ;;  %v6366_v18 = vld [vmem:[%s6288_s26 + $0xb8] sm:$0xff] }
  0x25   : > { %4777 = vmatprep.subr.mxu0 %v6306_v6  ;;  %4833 = vmatprep.subr.mxu1 %v6306_v6  ;;  %v6351_v15 = vld [vmem:[%s6288_s26 + $0x48] sm:$0xff]  ;;  %v6361_v17 = vld [vmem:[%s6288_s26 + $0x40] sm:$0xff]  ;;  %v6371_v19 = vld [vmem:[%s6288_s26 + $0x38] sm:$0xff] }
  0x26   : > { %4778 = vmatpush3.msra.mxu0 %v6311_v7  ;;  %4834 = vmatpush3.msra.mxu1 %v6311_v7  ;;  %v6376_v20 = vld [vmem:[%s6288_s26 + $0xb0] sm:$0xff]  ;;  %v6386_v22 = vld [vmem:[%s6288_s26 + $0xa8] sm:$0xff]  ;;  %v6396_v24 = vld [vmem:[%s6288_s26 + $0xa0] sm:$0xff] }
  0x27   : > { %4779 = vmatprep.subr.mxu0 %v6316_v8  ;;  %4835 = vmatprep.subr.mxu1 %v6316_v8  ;;  %v6381_v21 = vld [vmem:[%s6288_s26 + $0x30] sm:$0xff]  ;;  %v6391_v23 = vld [vmem:[%s6288_s26 + $0x28] sm:$0xff]  ;;  %v6401_v25 = vld [vmem:[%s6288_s26 + $0x20] sm:$0xff] }
  0x28   : > { %4780 = vmatpush3.msra.mxu0 %v6321_v9  ;;  %4836 = vmatpush3.msra.mxu1 %v6321_v9  ;;  %v6406_v26 = vld [vmem:[%s6288_s26 + $0x98] sm:$0xff]  ;;  %v6416_v28 = vld [vmem:[%s6288_s26 + $0x90] sm:$0xff]  ;;  %v6426_v30 = vld [vmem:[%s6288_s26 + $0x88] sm:$0xff] }
  0x29   : > { %4781 = vmatprep.subr.mxu0 %v6326_v10  ;;  %4837 = vmatprep.subr.mxu1 %v6326_v10  ;;  %v6411_v27 = vld [vmem:[%s6288_s26 + $0x18] sm:$0xff]  ;;  %v6421_v29 = vld [vmem:[%s6288_s26 + $0x10] sm:$0xff]  ;;  %v6431_v31 = vld [vmem:[%s6288_s26 + $0x8] sm:$0xff] }
  0x2a   : > { %4782 = vmatpush3.msra.mxu0 %v6331_v11  ;;  %4838 = vmatpush3.msra.mxu1 %v6331_v11  ;;  %v6436_v32 = vld [vmem:[%s6288_s26 + $0x80] sm:$0xff]  ;;  %v468_v44 = vld [vmem:[%s8416_s1 + $0x30] sm:$0xff]  ;;  %v471_v46 = vld [vmem:[%s8416_s1 + $0x48] sm:$0xff] }
  0x2b   : > { %4783 = vmatprep.subr.mxu0 %v6336_v12  ;;  %4839 = vmatprep.subr.mxu1 %v6336_v12  ;;  %v6441_v33 = vld [vmem:[%s6288_s26] sm:$0xff]  ;;  %v4575_v47 = vld [vmem:[%s8416_s1 + $0xb8] sm:$0xff]  ;;  %v4574_v49 = vld [vmem:[%s8416_s1 + $0xb0] sm:$0xff]  ;;  %s6149_s26 = smov 12  }
  0x2c   : > { %4784 = vmatpush3.msra.mxu0 %v6341_v13  ;;  %4840 = vmatpush3.msra.mxu1 %v6341_v13  ;;  %v4572_v45 = vld [vmem:[%s8416_s1 + $0xa0] sm:$0xff]  ;;  %v473_v50 = vld [vmem:[%s8416_s1 + $0x58] sm:$0xff]  ;;  %v4577_v51 = vld [vmem:[%s8416_s1 + $0xc8] sm:$0xff] }
  0x2d   : > { %4785 = vmatprep.subr.mxu0 %v6346_v14  ;;  %4841 = vmatprep.subr.mxu1 %v6346_v14  ;;  %v470_v48 = vld [vmem:[%s8416_s1 + $0x40] sm:$0xff]  ;;  %v472_v52 = vld [vmem:[%s8416_s1 + $0x50] sm:$0xff]  ;;  %v475_v54 = vld [vmem:[%s8416_s1 + $0x68] sm:$0xff] }
  0x2e   : > { %4786 = vmatpush3.msra.mxu0 %v6351_v15  ;;  %4842 = vmatpush3.msra.mxu1 %v6351_v15  ;;  %v4576_v53 = vld [vmem:[%s8416_s1 + $0xc0] sm:$0xff]  ;;  %v4579_v55 = vld [vmem:[%s8416_s1 + $0xd8] sm:$0xff]  ;;  %v4578_v57 = vld [vmem:[%s8416_s1 + $0xd0] sm:$0xff] }
  0x2f   : > { %4787 = vmatprep.subr.mxu0 %v6356_v16  ;;  %4843 = vmatprep.subr.mxu1 %v6356_v16  ;;  %v474_v56 = vld [vmem:[%s8416_s1 + $0x60] sm:$0xff]  ;;  %v477_v58 = vld [vmem:[%s8416_s1 + $0x78] sm:$0xff]  ;;  %v4581_v59 = vld [vmem:[%s8416_s1 + $0xe8] sm:$0xff] }
  0x30   : > { %4788 = vmatpush3.msra.mxu0 %v6361_v17  ;;  %4844 = vmatpush3.msra.mxu1 %v6361_v17  ;;  %v476_v60 = vld [vmem:[%s8416_s1 + $0x70] sm:$0xff]  ;;  %v4580_v61 = vld [vmem:[%s8416_s1 + $0xe0] sm:$0xff]  ;;  %v4583_v62 = vld [vmem:[%s8416_s1 + $0xf8] sm:$0xff] }
  0x31   : > { %4789 = vmatprep.subr.mxu0 %v6366_v18  ;;  %4845 = vmatprep.subr.mxu1 %v6366_v18  ;;  %v4585_v63 = vld [vmem:[%s8416_s1 + $0x108] sm:$0xff]  ;;  %v4582_v0 = vld [vmem:[%s8416_s1 + $0xf0] sm:$0xff]  ;;  %v4584_v1 = vld [vmem:[%s8416_s1 + $0x100] sm:$0xff] }
  0x32   : > { %4790 = vmatpush3.msra.mxu0 %v6371_v19  ;;  %4846 = vmatpush3.msra.mxu1 %v6371_v19 }
  0x33   : > { %4791 = vmatprep.subr.mxu0 %v6376_v20  ;;  %4847 = vmatprep.subr.mxu1 %v6376_v20 }
  0x34   : > { %4792 = vmatpush3.msra.mxu0 %v6381_v21  ;;  %4848 = vmatpush3.msra.mxu1 %v6381_v21 }
  0x35   : > { %4793 = vmatprep.subr.mxu0 %v6386_v22  ;;  %4849 = vmatprep.subr.mxu1 %v6386_v22 }
  0x36   : > { %4794 = vmatpush3.msra.mxu0 %v6391_v23  ;;  %4850 = vmatpush3.msra.mxu1 %v6391_v23 }
  0x37   : > { %4795 = vmatprep.subr.mxu0 %v6396_v24  ;;  %4851 = vmatprep.subr.mxu1 %v6396_v24 }
  0x38   : > { %4796 = vmatpush3.msra.mxu0 %v6401_v25  ;;  %4852 = vmatpush3.msra.mxu1 %v6401_v25 }
  0x39   : > { %4797 = vmatprep.subr.mxu0 %v6406_v26  ;;  %4853 = vmatprep.subr.mxu1 %v6406_v26 }
  0x3a   : > { %4798 = vmatpush3.msra.mxu0 %v6411_v27  ;;  %4854 = vmatpush3.msra.mxu1 %v6411_v27 }
  0x3b   : > { %4799 = vmatprep.subr.mxu0 %v6416_v28  ;;  %4855 = vmatprep.subr.mxu1 %v6416_v28 }
  0x3c   : > { %4800 = vmatpush3.msra.mxu0 %v6421_v29  ;;  %4856 = vmatpush3.msra.mxu1 %v6421_v29 }
  0x3d   : > { %4801 = vmatprep.subr.mxu0 %v6426_v30  ;;  %4857 = vmatprep.subr.mxu1 %v6426_v30 }
  0x3e   : > { %4802 = vmatpush3.msra.mxu0 %v6431_v31  ;;  %4858 = vmatpush3.msra.mxu1 %v6431_v31 }
  0x3f   : > { %4803 = vmatprep.subr.mxu0 %v6436_v32  ;;  %4859 = vmatprep.subr.mxu1 %v6436_v32 }
  0x40   : > { %4804 = vmatpush3.msra.mxu0 %v6441_v33  ;;  %4860 = vmatpush3.msra.mxu1 %v6441_v33 }
  0x41   : > { %543 = vmatmul.mubr.f32.vlgmr.msra.gmra.mxu0 %v462_v34  ;;  %4885 = vmatprep.subr.mxu0 %v6291_v2  ;;  %v4587_v34 = vld [vmem:[%s8416_s1 + $0x118] sm:$0xff] }
  0x42   : > { %4886 = vmatpush3.msra.mxu0 %v6294_v3  ;;  %547 = vmatprep.mubr.f32.mxu0 %v465_v35  ;;  %v4601_v35 = vld [vmem:[%s8416_s1 + $0x188] sm:$0xff] }
  0x43   : > { %4887 = vmatprep.subr.mxu0 %v6297_v4  ;;  %674 = vmatmul.mubr.f32.vlgmr.msra.gmra.mxu1 %v4568_v36  ;;  %v4586_v36 = vld [vmem:[%s8416_s1 + $0x110] sm:$0xff] }
  0x44   : > { %4888 = vmatpush3.msra.mxu0 %v6301_v5  ;;  %4941 = vmatprep.subr.mxu1 %v6291_v2 }
  0x45   : > { %548 = vmatmul.mubr.f32.gmra.mxu0 %v464_v37  ;;  %4889 = vmatprep.subr.mxu0 %v6306_v6  ;;  %v4600_v37 = vld [vmem:[%s8416_s1 + $0x180] sm:$0xff] }
  0x46   : > { %4890 = vmatpush3.msra.mxu0 %v6311_v7  ;;  %4942 = vmatpush3.msra.mxu1 %v6294_v3 }
  0x47   : > { %4891 = vmatprep.subr.mxu0 %v6316_v8  ;;  %4943 = vmatprep.subr.mxu1 %v6297_v4 }
  0x48   : > { %552 = vmatprep.mubr.f32.mxu0 %v467_v38  ;;  %678 = vmatprep.mubr.f32.mxu1 %v4571_v39  ;;  %v4589_v38 = vld [vmem:[%s8416_s1 + $0x128] sm:$0xff]  ;;  %v4603_v39 = vld [vmem:[%s8416_s1 + $0x198] sm:$0xff] }
  0x49   : > { %4892 = vmatpush3.msra.mxu0 %v6321_v9  ;;  %4944 = vmatpush3.msra.mxu1 %v6301_v5 }
  0x4a   : > { %553 = vmatmul.mubr.f32.gmra.mxu0 %v466_v40  ;;  %679 = vmatmul.mubr.f32.gmra.mxu1 %v4570_v41  ;;  %v4588_v40 = vld [vmem:[%s8416_s1 + $0x120] sm:$0xff]  ;;  %v4602_v41 = vld [vmem:[%s8416_s1 + $0x190] sm:$0xff] }
  0x4b   : > { %4893 = vmatprep.subr.mxu0 %v6326_v10  ;;  %4945 = vmatprep.subr.mxu1 %v6306_v6 }
  0x4c   : > { %4894 = vmatpush3.msra.mxu0 %v6331_v11  ;;  %4946 = vmatpush3.msra.mxu1 %v6311_v7 }
  0x4d   : > { %4895 = vmatprep.subr.mxu0 %v6336_v12  ;;  %4947 = vmatprep.subr.mxu1 %v6316_v8 }
  0x4e   : > { %557 = vmatprep.mubr.f32.mxu0 %v469_v42  ;;  %683 = vmatprep.mubr.f32.mxu1 %v4573_v43  ;;  %v4591_v42 = vld [vmem:[%s8416_s1 + $0x138] sm:$0xff]  ;;  %v4605_v43 = vld [vmem:[%s8416_s1 + $0x1a8] sm:$0xff] }
  0x4f   : > { %4896 = vmatpush3.msra.mxu0 %v6341_v13  ;;  %4948 = vmatpush3.msra.mxu1 %v6321_v9 }
  0x50   : > { %558 = vmatmul.mubr.f32.gmra.mxu0 %v468_v44  ;;  %684 = vmatmul.mubr.f32.gmra.mxu1 %v4572_v45  ;;  %v4590_v44 = vld [vmem:[%s8416_s1 + $0x130] sm:$0xff]  ;;  %v4604_v45 = vld [vmem:[%s8416_s1 + $0x1a0] sm:$0xff] }
  0x51   : > { %4897 = vmatprep.subr.mxu0 %v6346_v14  ;;  %4949 = vmatprep.subr.mxu1 %v6326_v10 }
  0x52   : > { %4898 = vmatpush3.msra.mxu0 %v6351_v15  ;;  %4950 = vmatpush3.msra.mxu1 %v6331_v11 }
  0x53   : > { %4899 = vmatprep.subr.mxu0 %v6356_v16  ;;  %4951 = vmatprep.subr.mxu1 %v6336_v12 }
  0x54   : > { %562 = vmatprep.mubr.f32.mxu0 %v471_v46  ;;  %688 = vmatprep.mubr.f32.mxu1 %v4575_v47  ;;  %v4593_v46 = vld [vmem:[%s8416_s1 + $0x148] sm:$0xff]  ;;  %v4607_v47 = vld [vmem:[%s8416_s1 + $0x1b8] sm:$0xff] }
  0x55   : > { %4900 = vmatpush3.msra.mxu0 %v6361_v17  ;;  %4952 = vmatpush3.msra.mxu1 %v6341_v13 }
  0x56   : > { %563 = vmatmul.mubr.f32.gmra.mxu0 %v470_v48  ;;  %689 = vmatmul.mubr.f32.gmra.mxu1 %v4574_v49  ;;  %v4592_v48 = vld [vmem:[%s8416_s1 + $0x140] sm:$0xff]  ;;  %v4606_v49 = vld [vmem:[%s8416_s1 + $0x1b0] sm:$0xff] }
  0x57   : > { %4901 = vmatprep.subr.mxu0 %v6366_v18  ;;  %4953 = vmatprep.subr.mxu1 %v6346_v14 }
  0x58   : > { %4902 = vmatpush3.msra.mxu0 %v6371_v19  ;;  %4954 = vmatpush3.msra.mxu1 %v6351_v15 }
  0x59   : > { %4903 = vmatprep.subr.mxu0 %v6376_v20  ;;  %4955 = vmatprep.subr.mxu1 %v6356_v16 }
  0x5a   : > { %567 = vmatprep.mubr.f32.mxu0 %v473_v50  ;;  %693 = vmatprep.mubr.f32.mxu1 %v4577_v51  ;;  %v4595_v50 = vld [vmem:[%s8416_s1 + $0x158] sm:$0xff]  ;;  %v4609_v51 = vld [vmem:[%s8416_s1 + $0x1c8] sm:$0xff] }
  0x5b   : > { %4904 = vmatpush3.msra.mxu0 %v6381_v21  ;;  %4956 = vmatpush3.msra.mxu1 %v6361_v17 }
  0x5c   : > { %568 = vmatmul.mubr.f32.gmra.mxu0 %v472_v52  ;;  %694 = vmatmul.mubr.f32.gmra.mxu1 %v4576_v53  ;;  %v4594_v52 = vld [vmem:[%s8416_s1 + $0x150] sm:$0xff]  ;;  %v4608_v53 = vld [vmem:[%s8416_s1 + $0x1c0] sm:$0xff] }
  0x5d   : > { %4905 = vmatprep.subr.mxu0 %v6386_v22  ;;  %4957 = vmatprep.subr.mxu1 %v6366_v18 }
  0x5e   : > { %4906 = vmatpush3.msra.mxu0 %v6391_v23  ;;  %4958 = vmatpush3.msra.mxu1 %v6371_v19 }
  0x5f   : > { %4907 = vmatprep.subr.mxu0 %v6396_v24  ;;  %4959 = vmatprep.subr.mxu1 %v6376_v20 }
  0x60   : > { %572 = vmatprep.mubr.f32.mxu0 %v475_v54  ;;  %698 = vmatprep.mubr.f32.mxu1 %v4579_v55  ;;  %v4597_v54 = vld [vmem:[%s8416_s1 + $0x168] sm:$0xff]  ;;  %v4611_v55 = vld [vmem:[%s8416_s1 + $0x1d8] sm:$0xff] }
  0x61   : > { %4908 = vmatpush3.msra.mxu0 %v6401_v25  ;;  %4960 = vmatpush3.msra.mxu1 %v6381_v21 }
  0x62   : > { %573 = vmatmul.mubr.f32.gmra.mxu0 %v474_v56  ;;  %699 = vmatmul.mubr.f32.gmra.mxu1 %v4578_v57  ;;  %v4596_v56 = vld [vmem:[%s8416_s1 + $0x160] sm:$0xff]  ;;  %v4610_v57 = vld [vmem:[%s8416_s1 + $0x1d0] sm:$0xff] }
  0x63   : > { %4909 = vmatprep.subr.mxu0 %v6406_v26  ;;  %4961 = vmatprep.subr.mxu1 %v6386_v22 }
  0x64   : > { %4910 = vmatpush3.msra.mxu0 %v6411_v27  ;;  %4962 = vmatpush3.msra.mxu1 %v6391_v23 }
  0x65   : > { %4911 = vmatprep.subr.mxu0 %v6416_v28  ;;  %4963 = vmatprep.subr.mxu1 %v6396_v24 }
  0x66   : > { %577 = vmatprep.mubr.f32.mxu0 %v477_v58  ;;  %703 = vmatprep.mubr.f32.mxu1 %v4581_v59  ;;  %v4599_v58 = vld [vmem:[%s8416_s1 + $0x178] sm:$0xff]  ;;  %v4613_v59 = vld [vmem:[%s8416_s1 + $0x1e8] sm:$0xff] }
  0x67   : > { %4912 = vmatpush3.msra.mxu0 %v6421_v29  ;;  %4964 = vmatpush3.msra.mxu1 %v6401_v25 }
  0x68   : > { %578 = vmatmul.mubr.f32.gmra.mxu0 %v476_v60  ;;  %704 = vmatmul.mubr.f32.gmra.mxu1 %v4580_v61  ;;  %v4598_v60 = vld [vmem:[%s8416_s1 + $0x170] sm:$0xff]  ;;  %v4612_v61 = vld [vmem:[%s8416_s1 + $0x1e0] sm:$0xff] }
  0x69   : > { %4913 = vmatprep.subr.mxu0 %v6426_v30  ;;  %4965 = vmatprep.subr.mxu1 %v6406_v26 }
  0x6a   : > { %4914 = vmatpush3.msra.mxu0 %v6431_v31  ;;  %4966 = vmatpush3.msra.mxu1 %v6411_v27 }
  0x6b   : > { %4915 = vmatprep.subr.mxu0 %v6436_v32  ;;  %4967 = vmatprep.subr.mxu1 %v6416_v28 }
  0x6c   : > { %708 = vmatprep.mubr.f32.mxu1 %v4583_v62  ;;  %4916 = vmatpush3.msra.mxu0 %v6441_v33  ;;  %v4615_v62 = vld [vmem:[%s8416_s1 + $0x1f8] sm:$0xff] }
  0x6d   : > { %836 = vmatprep.mubr.f32.mxu0 %v4585_v63  ;;  %4968 = vmatpush3.msra.mxu1 %v6421_v29  ;;  %v4617_v63 = vld [vmem:[%s8416_s1 + $0x208] sm:$0xff] }
  0x6e   : > { %709 = vmatmul.mubr.f32.gmra.mxu1 %v4582_v0  ;;  %837 = vmatmul.mubr.f32.vlgmr.msra.gmra.mxu0 %v4584_v1  ;;  %v4614_v0 = vld [vmem:[%s8416_s1 + $0x1f0] sm:$0xff]  ;;  %v4616_v1 = vld [vmem:[%s8416_s1 + $0x200] sm:$0xff] }
  0x6f   : > { %4969 = vmatprep.subr.mxu1 %v6426_v30  ;;  %4997 = vmatprep.subr.mxu0 %v6291_v2 }
  0x70   : > { %4970 = vmatpush3.msra.mxu1 %v6431_v31  ;;  %4998 = vmatpush3.msra.mxu0 %v6294_v3 }
  0x71   : > { %4971 = vmatprep.subr.mxu1 %v6436_v32  ;;  %4999 = vmatprep.subr.mxu0 %v6297_v4 }
  0x72   : > { %841 = vmatprep.mubr.f32.mxu0 %v4587_v34  ;;  %4972 = vmatpush3.msra.mxu1 %v6441_v33  ;;  %v4619_v34 = vld [vmem:[%s8416_s1 + $0x218] sm:$0xff] }
  0x73   : > { %999 = vmatprep.mubr.f32.mxu1 %v4601_v35  ;;  %5000 = vmatpush3.msra.mxu0 %v6301_v5  ;;  %v4633_v35 = vld [vmem:[%s8416_s1 + $0x288] sm:$0xff] }
  0x74   : > { %842 = vmatmul.mubr.f32.gmra.mxu0 %v4586_v36  ;;  %1000 = vmatmul.mubr.f32.vlgmr.msra.gmra.mxu1 %v4600_v37  ;;  %v4618_v36 = vld [vmem:[%s8416_s1 + $0x210] sm:$0xff]  ;;  %v4632_v37 = vld [vmem:[%s8416_s1 + $0x280] sm:$0xff] }
  0x75   : > { %5001 = vmatprep.subr.mxu0 %v6306_v6  ;;  %5053 = vmatprep.subr.mxu1 %v6291_v2 }
  0x76   : > { %5002 = vmatpush3.msra.mxu0 %v6311_v7  ;;  %5054 = vmatpush3.msra.mxu1 %v6294_v3 }
  0x77   : > { %5003 = vmatprep.subr.mxu0 %v6316_v8  ;;  %5055 = vmatprep.subr.mxu1 %v6297_v4 }
  0x78   : > { %846 = vmatprep.mubr.f32.mxu0 %v4589_v38  ;;  %1004 = vmatprep.mubr.f32.mxu1 %v4603_v39  ;;  %v4621_v38 = vld [vmem:[%s8416_s1 + $0x228] sm:$0xff]  ;;  %v4635_v39 = vld [vmem:[%s8416_s1 + $0x298] sm:$0xff] }
  0x79   : > { %5004 = vmatpush3.msra.mxu0 %v6321_v9  ;;  %5056 = vmatpush3.msra.mxu1 %v6301_v5 }
  0x7a   : > { %847 = vmatmul.mubr.f32.gmra.mxu0 %v4588_v40  ;;  %1005 = vmatmul.mubr.f32.gmra.mxu1 %v4602_v41  ;;  %v4620_v40 = vld [vmem:[%s8416_s1 + $0x220] sm:$0xff]  ;;  %v4634_v41 = vld [vmem:[%s8416_s1 + $0x290] sm:$0xff] }
  0x7b   : > { %5005 = vmatprep.subr.mxu0 %v6326_v10  ;;  %5057 = vmatprep.subr.mxu1 %v6306_v6 }
  0x7c   : > { %5006 = vmatpush3.msra.mxu0 %v6331_v11  ;;  %5058 = vmatpush3.msra.mxu1 %v6311_v7 }
  0x7d   : > { %5007 = vmatprep.subr.mxu0 %v6336_v12  ;;  %5059 = vmatprep.subr.mxu1 %v6316_v8 }
  0x7e   : > { %851 = vmatprep.mubr.f32.mxu0 %v4591_v42  ;;  %1009 = vmatprep.mubr.f32.mxu1 %v4605_v43  ;;  %v4623_v42 = vld [vmem:[%s8416_s1 + $0x238] sm:$0xff]  ;;  %v4637_v43 = vld [vmem:[%s8416_s1 + $0x2a8] sm:$0xff] }
  0x7f   : > { %5008 = vmatpush3.msra.mxu0 %v6341_v13  ;;  %5060 = vmatpush3.msra.mxu1 %v6321_v9 }
  0x80   : > { %852 = vmatmul.mubr.f32.gmra.mxu0 %v4590_v44  ;;  %1010 = vmatmul.mubr.f32.gmra.mxu1 %v4604_v45  ;;  %v4622_v44 = vld [vmem:[%s8416_s1 + $0x230] sm:$0xff]  ;;  %v4636_v45 = vld [vmem:[%s8416_s1 + $0x2a0] sm:$0xff] }
  0x81   : > { %5009 = vmatprep.subr.mxu0 %v6346_v14  ;;  %5061 = vmatprep.subr.mxu1 %v6326_v10 }
  0x82   : > { %5010 = vmatpush3.msra.mxu0 %v6351_v15  ;;  %5062 = vmatpush3.msra.mxu1 %v6331_v11 }
  0x83   : > { %5011 = vmatprep.subr.mxu0 %v6356_v16  ;;  %5063 = vmatprep.subr.mxu1 %v6336_v12 }
  0x84   : > { %856 = vmatprep.mubr.f32.mxu0 %v4593_v46  ;;  %1014 = vmatprep.mubr.f32.mxu1 %v4607_v47  ;;  %v4625_v46 = vld [vmem:[%s8416_s1 + $0x248] sm:$0xff]  ;;  %v4639_v47 = vld [vmem:[%s8416_s1 + $0x2b8] sm:$0xff] }
  0x85   : > { %5012 = vmatpush3.msra.mxu0 %v6361_v17  ;;  %5064 = vmatpush3.msra.mxu1 %v6341_v13 }
  0x86   : > { %857 = vmatmul.mubr.f32.gmra.mxu0 %v4592_v48  ;;  %1015 = vmatmul.mubr.f32.gmra.mxu1 %v4606_v49  ;;  %v4624_v48 = vld [vmem:[%s8416_s1 + $0x240] sm:$0xff]  ;;  %v4638_v49 = vld [vmem:[%s8416_s1 + $0x2b0] sm:$0xff] }
  0x87   : > { %5013 = vmatprep.subr.mxu0 %v6366_v18  ;;  %5065 = vmatprep.subr.mxu1 %v6346_v14 }
  0x88   : > { %5014 = vmatpush3.msra.mxu0 %v6371_v19  ;;  %5066 = vmatpush3.msra.mxu1 %v6351_v15 }
  0x89   : > { %5015 = vmatprep.subr.mxu0 %v6376_v20  ;;  %5067 = vmatprep.subr.mxu1 %v6356_v16 }
  0x8a   : > { %861 = vmatprep.mubr.f32.mxu0 %v4595_v50  ;;  %1019 = vmatprep.mubr.f32.mxu1 %v4609_v51  ;;  %v4627_v50 = vld [vmem:[%s8416_s1 + $0x258] sm:$0xff]  ;;  %v4641_v51 = vld [vmem:[%s8416_s1 + $0x2c8] sm:$0xff] }
  0x8b   : > { %5016 = vmatpush3.msra.mxu0 %v6381_v21  ;;  %5068 = vmatpush3.msra.mxu1 %v6361_v17 }
  0x8c   : > { %862 = vmatmul.mubr.f32.gmra.mxu0 %v4594_v52  ;;  %1020 = vmatmul.mubr.f32.gmra.mxu1 %v4608_v53  ;;  %v4626_v52 = vld [vmem:[%s8416_s1 + $0x250] sm:$0xff]  ;;  %v4640_v53 = vld [vmem:[%s8416_s1 + $0x2c0] sm:$0xff] }
  0x8d   : > { %5017 = vmatprep.subr.mxu0 %v6386_v22  ;;  %5069 = vmatprep.subr.mxu1 %v6366_v18 }
  0x8e   : > { %5018 = vmatpush3.msra.mxu0 %v6391_v23  ;;  %5070 = vmatpush3.msra.mxu1 %v6371_v19 }
  0x8f   : > { %5019 = vmatprep.subr.mxu0 %v6396_v24  ;;  %5071 = vmatprep.subr.mxu1 %v6376_v20 }
  0x90   : > { %866 = vmatprep.mubr.f32.mxu0 %v4597_v54  ;;  %1024 = vmatprep.mubr.f32.mxu1 %v4611_v55  ;;  %v4629_v54 = vld [vmem:[%s8416_s1 + $0x268] sm:$0xff]  ;;  %v4643_v55 = vld [vmem:[%s8416_s1 + $0x2d8] sm:$0xff] }
  0x91   : > { %5020 = vmatpush3.msra.mxu0 %v6401_v25  ;;  %5072 = vmatpush3.msra.mxu1 %v6381_v21 }
  0x92   : > { %867 = vmatmul.mubr.f32.gmra.mxu0 %v4596_v56  ;;  %1025 = vmatmul.mubr.f32.gmra.mxu1 %v4610_v57  ;;  %v4628_v56 = vld [vmem:[%s8416_s1 + $0x260] sm:$0xff]  ;;  %v4642_v57 = vld [vmem:[%s8416_s1 + $0x2d0] sm:$0xff] }
  0x93   : > { %5021 = vmatprep.subr.mxu0 %v6406_v26  ;;  %5073 = vmatprep.subr.mxu1 %v6386_v22 }
  0x94   : > { %5022 = vmatpush3.msra.mxu0 %v6411_v27  ;;  %5074 = vmatpush3.msra.mxu1 %v6391_v23 }
  0x95   : > { %5023 = vmatprep.subr.mxu0 %v6416_v28  ;;  %5075 = vmatprep.subr.mxu1 %v6396_v24 }
  0x96   : > { %871 = vmatprep.mubr.f32.mxu0 %v4599_v58  ;;  %1029 = vmatprep.mubr.f32.mxu1 %v4613_v59  ;;  %v4631_v58 = vld [vmem:[%s8416_s1 + $0x278] sm:$0xff]  ;;  %v4645_v59 = vld [vmem:[%s8416_s1 + $0x2e8] sm:$0xff] }
  0x97   : > { %5024 = vmatpush3.msra.mxu0 %v6421_v29  ;;  %5076 = vmatpush3.msra.mxu1 %v6401_v25 }
  0x98   : > { %872 = vmatmul.mubr.f32.gmra.mxu0 %v4598_v60  ;;  %1030 = vmatmul.mubr.f32.gmra.mxu1 %v4612_v61  ;;  %v4630_v60 = vld [vmem:[%s8416_s1 + $0x270] sm:$0xff]  ;;  %v4644_v61 = vld [vmem:[%s8416_s1 + $0x2e0] sm:$0xff] }
  0x99   : > { %5025 = vmatprep.subr.mxu0 %v6426_v30  ;;  %5077 = vmatprep.subr.mxu1 %v6406_v26 }
  0x9a   : > { %5026 = vmatpush3.msra.mxu0 %v6431_v31  ;;  %5078 = vmatpush3.msra.mxu1 %v6411_v27 }
  0x9b   : > { %5027 = vmatprep.subr.mxu0 %v6436_v32  ;;  %5079 = vmatprep.subr.mxu1 %v6416_v28 }
  0x9c   : > { %1034 = vmatprep.mubr.f32.mxu1 %v4615_v62  ;;  %5028 = vmatpush3.msra.mxu0 %v6441_v33  ;;  %v4647_v62 = vld [vmem:[%s8416_s1 + $0x2f8] sm:$0xff] }
  0x9d   : > { %1162 = vmatprep.mubr.f32.mxu0 %v4617_v63  ;;  %5080 = vmatpush3.msra.mxu1 %v6421_v29  ;;  %v4649_v63 = vld [vmem:[%s8416_s1 + $0x308] sm:$0xff] }
  0x9e   : > { %1035 = vmatmul.mubr.f32.gmra.mxu1 %v4614_v0  ;;  %1163 = vmatmul.mubr.f32.vlgmr.msra.gmra.mxu0 %v4616_v1  ;;  %v4646_v0 = vld [vmem:[%s8416_s1 + $0x2f0] sm:$0xff]  ;;  %v4648_v1 = vld [vmem:[%s8416_s1 + $0x300] sm:$0xff] }
  0x9f   : > { %5081 = vmatprep.subr.mxu1 %v6426_v30  ;;  %5109 = vmatprep.subr.mxu0 %v6291_v2 }
  0xa0   : > { %5082 = vmatpush3.msra.mxu1 %v6431_v31  ;;  %5110 = vmatpush3.msra.mxu0 %v6294_v3 }
  0xa1   : > { %5083 = vmatprep.subr.mxu1 %v6436_v32  ;;  %5111 = vmatprep.subr.mxu0 %v6297_v4 }
  0xa2   : > { %1167 = vmatprep.mubr.f32.mxu0 %v4619_v34  ;;  %5084 = vmatpush3.msra.mxu1 %v6441_v33  ;;  %v4651_v34 = vld [vmem:[%s8416_s1 + $0x318] sm:$0xff] }
  0xa3   : > { %1325 = vmatprep.mubr.f32.mxu1 %v4633_v35  ;;  %5112 = vmatpush3.msra.mxu0 %v6301_v5  ;;  %v4665_v35 = vld [vmem:[%s8416_s1 + $0x388] sm:$0xff] }
  0xa4   : > { %1168 = vmatmul.mubr.f32.gmra.mxu0 %v4618_v36  ;;  %1326 = vmatmul.mubr.f32.vlgmr.msra.gmra.mxu1 %v4632_v37  ;;  %v4664_v36 = vld [vmem:[%s8416_s1 + $0x380] sm:$0xff]  ;;  %v4666_v37 = vld [vmem:[%s8416_s1 + $0x390] sm:$0xff] }
  0xa5   : > { %5113 = vmatprep.subr.mxu0 %v6306_v6  ;;  %5165 = vmatprep.subr.mxu1 %v6291_v2 }
  0xa6   : > { %5114 = vmatpush3.msra.mxu0 %v6311_v7  ;;  %5166 = vmatpush3.msra.mxu1 %v6294_v3 }
  0xa7   : > { %5115 = vmatprep.subr.mxu0 %v6316_v8  ;;  %5167 = vmatprep.subr.mxu1 %v6297_v4 }
  0xa8   : > { %1172 = vmatprep.mubr.f32.mxu0 %v4621_v38  ;;  %1330 = vmatprep.mubr.f32.mxu1 %v4635_v39  ;;  %v4655_v38 = vld [vmem:[%s8416_s1 + $0x338] sm:$0xff]  ;;  %v4686_v39 = vld [vmem:[%s8416_s1 + $0x430] sm:$0xff] }
  0xa9   : > { %5116 = vmatpush3.msra.mxu0 %v6321_v9  ;;  %5168 = vmatpush3.msra.mxu1 %v6301_v5 }
  0xaa   : > { %1173 = vmatmul.mubr.f32.gmra.mxu0 %v4620_v40  ;;  %1331 = vmatmul.mubr.f32.gmra.mxu1 %v4634_v41  ;;  %v4689_v40 = vld [vmem:[%s8416_s1 + $0x448] sm:$0xff]  ;;  %v4688_v41 = vld [vmem:[%s8416_s1 + $0x440] sm:$0xff] }
  0xab   : > { %5117 = vmatprep.subr.mxu0 %v6326_v10  ;;  %5169 = vmatprep.subr.mxu1 %v6306_v6 }
  0xac   : > { %5118 = vmatpush3.msra.mxu0 %v6331_v11  ;;  %5170 = vmatpush3.msra.mxu1 %v6311_v7 }
  0xad   : > { %5119 = vmatprep.subr.mxu0 %v6336_v12  ;;  %5171 = vmatprep.subr.mxu1 %v6316_v8 }
  0xae   : > { %1177 = vmatprep.mubr.f32.mxu0 %v4623_v42  ;;  %1335 = vmatprep.mubr.f32.mxu1 %v4637_v43  ;;  %v4691_v42 = vld [vmem:[%s8416_s1 + $0x458] sm:$0xff] }
  0xaf   : > { %5120 = vmatpush3.msra.mxu0 %v6341_v13  ;;  %5172 = vmatpush3.msra.mxu1 %v6321_v9 }
  0xb0   : > { %1178 = vmatmul.mubr.f32.gmra.mxu0 %v4622_v44  ;;  %1336 = vmatmul.mubr.f32.gmra.mxu1 %v4636_v45  ;;  %v4690_v44 = vld [vmem:[%s8416_s1 + $0x450] sm:$0xff]  ;;  %v4693_v45 = vld [vmem:[%s8416_s1 + $0x468] sm:$0xff] }
  0xb1   : > { %5121 = vmatprep.subr.mxu0 %v6346_v14  ;;  %5173 = vmatprep.subr.mxu1 %v6326_v10 }
  0xb2   : > { %5122 = vmatpush3.msra.mxu0 %v6351_v15  ;;  %5174 = vmatpush3.msra.mxu1 %v6331_v11 }
  0xb3   : > { %5123 = vmatprep.subr.mxu0 %v6356_v16  ;;  %5175 = vmatprep.subr.mxu1 %v6336_v12 }
  0xb4   : > { %1182 = vmatprep.mubr.f32.mxu0 %v4625_v46  ;;  %1340 = vmatprep.mubr.f32.mxu1 %v4639_v47 }
  0xb5   : > { %5124 = vmatpush3.msra.mxu0 %v6361_v17  ;;  %5176 = vmatpush3.msra.mxu1 %v6341_v13 }
  0xb6   : > { %1183 = vmatmul.mubr.f32.gmra.mxu0 %v4624_v48  ;;  %1341 = vmatmul.mubr.f32.gmra.mxu1 %v4638_v49 }
  0xb7   : > { %5125 = vmatprep.subr.mxu0 %v6366_v18  ;;  %5177 = vmatprep.subr.mxu1 %v6346_v14 }
  0xb8   : > { %5126 = vmatpush3.msra.mxu0 %v6371_v19  ;;  %5178 = vmatpush3.msra.mxu1 %v6351_v15 }
  0xb9   : > { %5127 = vmatprep.subr.mxu0 %v6376_v20  ;;  %5179 = vmatprep.subr.mxu1 %v6356_v16 }
  0xba   : > { %1187 = vmatprep.mubr.f32.mxu0 %v4627_v50  ;;  %1345 = vmatprep.mubr.f32.mxu1 %v4641_v51  ;;  %v4692_v51 = vld [vmem:[%s8416_s1 + $0x460] sm:$0xff] }
  0xbb   : > { %5128 = vmatpush3.msra.mxu0 %v6381_v21  ;;  %5180 = vmatpush3.msra.mxu1 %v6361_v17 }
  0xbc   : > { %1188 = vmatmul.mubr.f32.gmra.mxu0 %v4626_v52  ;;  %1346 = vmatmul.mubr.f32.gmra.mxu1 %v4640_v53  ;;  %v4695_v53 = vld [vmem:[%s8416_s1 + $0x478] sm:$0xff] }
  0xbd   : > { %5129 = vmatprep.subr.mxu0 %v6386_v22  ;;  %5181 = vmatprep.subr.mxu1 %v6366_v18 }
  0xbe   : > { %5130 = vmatpush3.msra.mxu0 %v6391_v23  ;;  %5182 = vmatpush3.msra.mxu1 %v6371_v19 }
  0xbf   : > { %5131 = vmatprep.subr.mxu0 %v6396_v24  ;;  %5183 = vmatprep.subr.mxu1 %v6376_v20 }
  0xc0   : > { %1192 = vmatprep.mubr.f32.mxu0 %v4629_v54  ;;  %1350 = vmatprep.mubr.f32.mxu1 %v4643_v55 }
  0xc1   : > { %5132 = vmatpush3.msra.mxu0 %v6401_v25  ;;  %5184 = vmatpush3.msra.mxu1 %v6381_v21 }
  0xc2   : > { %1193 = vmatmul.mubr.f32.gmra.mxu0 %v4628_v56  ;;  %1351 = vmatmul.mubr.f32.gmra.mxu1 %v4642_v57  ;;  %v4694_v56 = vld [vmem:[%s8416_s1 + $0x470] sm:$0xff] }
  0xc3   : > { %5133 = vmatprep.subr.mxu0 %v6406_v26  ;;  %5185 = vmatprep.subr.mxu1 %v6386_v22 }
  0xc4   : > { %5134 = vmatpush3.msra.mxu0 %v6411_v27  ;;  %5186 = vmatpush3.msra.mxu1 %v6391_v23 }
  0xc5   : > { %5135 = vmatprep.subr.mxu0 %v6416_v28  ;;  %5187 = vmatprep.subr.mxu1 %v6396_v24 }
  0xc6   : > { %1197 = vmatprep.mubr.f32.mxu0 %v4631_v58  ;;  %1355 = vmatprep.mubr.f32.mxu1 %v4645_v59 }
  0xc7   : > { %5136 = vmatpush3.msra.mxu0 %v6421_v29  ;;  %5188 = vmatpush3.msra.mxu1 %v6401_v25 }
  0xc8   : > { %1198 = vmatmul.mubr.f32.gmra.mxu0 %v4630_v60  ;;  %1356 = vmatmul.mubr.f32.gmra.mxu1 %v4644_v61 }
  0xc9   : > { %5137 = vmatprep.subr.mxu0 %v6426_v30  ;;  %5189 = vmatprep.subr.mxu1 %v6406_v26 }
  0xca   : > { %5138 = vmatpush3.msra.mxu0 %v6431_v31  ;;  %5190 = vmatpush3.msra.mxu1 %v6411_v27 }
  0xcb   : > { %5139 = vmatprep.subr.mxu0 %v6436_v32  ;;  %5191 = vmatprep.subr.mxu1 %v6416_v28 }
  0xcc   : > { %1360 = vmatprep.mubr.f32.mxu1 %v4647_v62  ;;  %5140 = vmatpush3.msra.mxu0 %v6441_v33 }
  0xcd   : > { %1488 = vmatprep.mubr.f32.mxu0 %v4649_v63  ;;  %5192 = vmatpush3.msra.mxu1 %v6421_v29 }
  0xce   : > { %1361 = vmatmul.mubr.f32.gmra.mxu1 %v4646_v0  ;;  %1489 = vmatmul.mubr.f32.vlgmr.msra.gmra.mxu0 %v4648_v1 }
  0xcf   : > { %5193 = vmatprep.subr.mxu1 %v6426_v30  ;;  %5221 = vmatprep.subr.mxu0 %v6291_v2  ;;  %v4650_v2 = vld [vmem:[%s8416_s1 + $0x310] sm:$0xff] }
  0xd0   : > { %5194 = vmatpush3.msra.mxu1 %v6431_v31  ;;  %5222 = vmatpush3.msra.mxu0 %v6294_v3  ;;  %v4653_v3 = vld [vmem:[%s8416_s1 + $0x328] sm:$0xff] }
  0xd1   : > { %5195 = vmatprep.subr.mxu1 %v6436_v32  ;;  %5223 = vmatprep.subr.mxu0 %v6297_v4  ;;  %v4667_v4 = vld [vmem:[%s8416_s1 + $0x398] sm:$0xff] }
  0xd2   : > { %1493 = vmatprep.mubr.f32.mxu0 %v4651_v34  ;;  %5196 = vmatpush3.msra.mxu1 %v6441_v33 }
  0xd3   : > { %1651 = vmatprep.mubr.f32.mxu1 %v4665_v35  ;;  %5224 = vmatpush3.msra.mxu0 %v6301_v5  ;;  %v4652_v5 = vld [vmem:[%s8416_s1 + $0x320] sm:$0xff] }
  0xd4   : > { %1494 = vmatmul.mubr.f32.gmra.mxu0 %v4650_v2  ;;  %1652 = vmatmul.mubr.f32.vlgmr.msra.gmra.mxu1 %v4664_v36 }
  0xd5   : > { %5225 = vmatprep.subr.mxu0 %v6306_v6  ;;  %1498 = vmatprep.mubr.f32.mxu0 %v4653_v3  ;;  %v4669_v6 = vld [vmem:[%s8416_s1 + $0x3a8] sm:$0xff] }
  0xd6   : > { %5226 = vmatpush3.msra.mxu0 %v6311_v7  ;;  %1656 = vmatprep.mubr.f32.mxu1 %v4667_v4  ;;  %v4668_v7 = vld [vmem:[%s8416_s1 + $0x3a0] sm:$0xff] }
  0xd7   : > { %5227 = vmatprep.subr.mxu0 %v6316_v8  ;;  %v4654_v8 = vld [vmem:[%s8416_s1 + $0x330] sm:$0xff] }
  0xd8   : > { %5228 = vmatpush3.msra.mxu0 %v6321_v9  ;;  %1657 = vmatmul.mubr.f32.gmra.mxu1 %v4666_v37  ;;  %v4657_v9 = vld [vmem:[%s8416_s1 + $0x348] sm:$0xff] }
  0xd9   : > { %1499 = vmatmul.mubr.f32.gmra.mxu0 %v4652_v5  ;;  %5229 = vmatprep.subr.mxu0 %v6326_v10  ;;  %v4671_v10 = vld [vmem:[%s8416_s1 + $0x3b8] sm:$0xff] }
  0xda   : > { %5230 = vmatpush3.msra.mxu0 %v6331_v11  ;;  %1503 = vmatprep.mubr.f32.mxu0 %v4655_v38  ;;  %v4670_v11 = vld [vmem:[%s8416_s1 + $0x3b0] sm:$0xff] }
  0xdb   : > { %5231 = vmatprep.subr.mxu0 %v6336_v12  ;;  %1661 = vmatprep.mubr.f32.mxu1 %v4669_v6  ;;  %v4656_v12 = vld [vmem:[%s8416_s1 + $0x340] sm:$0xff] }
  0xdc   : > { %5232 = vmatpush3.msra.mxu0 %v6341_v13  ;;  %1662 = vmatmul.mubr.f32.gmra.mxu1 %v4668_v7  ;;  %v4659_v13 = vld [vmem:[%s8416_s1 + $0x358] sm:$0xff] }
  0xdd   : > { %1504 = vmatmul.mubr.f32.gmra.mxu0 %v4654_v8  ;;  %5233 = vmatprep.subr.mxu0 %v6346_v14  ;;  %v4673_v14 = vld [vmem:[%s8416_s1 + $0x3c8] sm:$0xff] }
  0xde   : > { %5234 = vmatpush3.msra.mxu0 %v6351_v15  ;;  %1508 = vmatprep.mubr.f32.mxu0 %v4657_v9  ;;  %v4672_v15 = vld [vmem:[%s8416_s1 + $0x3c0] sm:$0xff] }
  0xdf   : > { %5235 = vmatprep.subr.mxu0 %v6356_v16  ;;  %1666 = vmatprep.mubr.f32.mxu1 %v4671_v10  ;;  %v4658_v16 = vld [vmem:[%s8416_s1 + $0x350] sm:$0xff] }
  0xe0   : > { %5236 = vmatpush3.msra.mxu0 %v6361_v17  ;;  %1667 = vmatmul.mubr.f32.gmra.mxu1 %v4670_v11  ;;  %v4661_v17 = vld [vmem:[%s8416_s1 + $0x368] sm:$0xff] }
  0xe1   : > { %1509 = vmatmul.mubr.f32.gmra.mxu0 %v4656_v12  ;;  %5237 = vmatprep.subr.mxu0 %v6366_v18  ;;  %v4675_v18 = vld [vmem:[%s8416_s1 + $0x3d8] sm:$0xff] }
  0xe2   : > { %5238 = vmatpush3.msra.mxu0 %v6371_v19  ;;  %1513 = vmatprep.mubr.f32.mxu0 %v4659_v13  ;;  %v4674_v19 = vld [vmem:[%s8416_s1 + $0x3d0] sm:$0xff] }
  0xe3   : > { %5239 = vmatprep.subr.mxu0 %v6376_v20  ;;  %1671 = vmatprep.mubr.f32.mxu1 %v4673_v14  ;;  %v4660_v20 = vld [vmem:[%s8416_s1 + $0x360] sm:$0xff] }
  0xe4   : > { %5240 = vmatpush3.msra.mxu0 %v6381_v21  ;;  %1672 = vmatmul.mubr.f32.gmra.mxu1 %v4672_v15  ;;  %v4663_v21 = vld [vmem:[%s8416_s1 + $0x378] sm:$0xff] }
  0xe5   : > { %1514 = vmatmul.mubr.f32.gmra.mxu0 %v4658_v16  ;;  %5241 = vmatprep.subr.mxu0 %v6386_v22  ;;  %v4677_v22 = vld [vmem:[%s8416_s1 + $0x3e8] sm:$0xff] }
  0xe6   : > { %5242 = vmatpush3.msra.mxu0 %v6391_v23  ;;  %1518 = vmatprep.mubr.f32.mxu0 %v4661_v17  ;;  %v4676_v23 = vld [vmem:[%s8416_s1 + $0x3e0] sm:$0xff] }
  0xe7   : > { %5243 = vmatprep.subr.mxu0 %v6396_v24  ;;  %1676 = vmatprep.mubr.f32.mxu1 %v4675_v18  ;;  %v4662_v24 = vld [vmem:[%s8416_s1 + $0x370] sm:$0xff] }
  0xe8   : > { %5244 = vmatpush3.msra.mxu0 %v6401_v25  ;;  %1677 = vmatmul.mubr.f32.gmra.mxu1 %v4674_v19  ;;  %v4681_v25 = vld [vmem:[%s8416_s1 + $0x408] sm:$0xff] }
  0xe9   : > { %1519 = vmatmul.mubr.f32.gmra.mxu0 %v4660_v20  ;;  %5245 = vmatprep.subr.mxu0 %v6406_v26  ;;  %v4679_v26 = vld [vmem:[%s8416_s1 + $0x3f8] sm:$0xff] }
  0xea   : > { %5246 = vmatpush3.msra.mxu0 %v6411_v27  ;;  %1523 = vmatprep.mubr.f32.mxu0 %v4663_v21  ;;  %v4678_v27 = vld [vmem:[%s8416_s1 + $0x3f0] sm:$0xff] }
  0xeb   : > { %5247 = vmatprep.subr.mxu0 %v6416_v28  ;;  %1681 = vmatprep.mubr.f32.mxu1 %v4677_v22  ;;  %v4680_v28 = vld [vmem:[%s8416_s1 + $0x400] sm:$0xff] }
  0xec   : > { %5248 = vmatpush3.msra.mxu0 %v6421_v29  ;;  %1682 = vmatmul.mubr.f32.gmra.mxu1 %v4676_v23  ;;  %v4683_v29 = vld [vmem:[%s8416_s1 + $0x418] sm:$0xff] }
  0xed   : > { %1524 = vmatmul.mubr.f32.gmra.mxu0 %v4662_v24  ;;  %5249 = vmatprep.subr.mxu0 %v6426_v30  ;;  %v4682_v30 = vld [vmem:[%s8416_s1 + $0x410] sm:$0xff] }
  0xee   : > { %5250 = vmatpush3.msra.mxu0 %v6431_v31  ;;  %1814 = vmatprep.mubr.f32.mxu0 %v4681_v25  ;;  %v4685_v31 = vld [vmem:[%s8416_s1 + $0x428] sm:$0xff] }
  0xef   : > { %5251 = vmatprep.subr.mxu0 %v6436_v32  ;;  %1686 = vmatprep.mubr.f32.mxu1 %v4679_v26  ;;  %v4684_v32 = vld [vmem:[%s8416_s1 + $0x420] sm:$0xff] }
  0xf0   : > { %5252 = vmatpush3.msra.mxu0 %v6441_v33  ;;  %1687 = vmatmul.mubr.f32.gmra.mxu1 %v4678_v27  ;;  %v4687_v33 = vld [vmem:[%s8416_s1 + $0x438] sm:$0xff] }
  0xf1   : > { %1815 = vmatmul.mubr.f32.vlgmr.msra.gmra.mxu0 %v4680_v28 }
  0xf2   : > { %1819 = vmatprep.mubr.f32.mxu0 %v4683_v29 }
  0xf5   : > { %1820 = vmatmul.mubr.f32.gmra.mxu0 %v4682_v30 }
  0xf6   : > { %1824 = vmatprep.mubr.f32.mxu0 %v4685_v31 }
  0xf9   : > { %1825 = vmatmul.mubr.f32.gmra.mxu0 %v4684_v32 }
  0xfa   : > { %1829 = vmatprep.mubr.f32.mxu0 %v4687_v33 }
  0xfd   : > { %1830 = vmatmul.mubr.f32.gmra.mxu0 %v4686_v39 }
  0xfe   : > { %1834 = vmatprep.mubr.f32.mxu0 %v4689_v40 }
 0x101   : > { %1835 = vmatmul.mubr.f32.gmra.mxu0 %v4688_v41  ;;  %v4805_v43 = vpop.f32.mrf.mxu0 }
 0x102   : > { %1839 = vmatprep.mubr.f32.mxu0 %v4691_v42 }
 0x103   : > { %v4806_v46 = vpop.f32.mrf.mxu0  ;;  %v4861_v47 = vpop.f32.mrf.mxu1 }
 0x104   : > { %v4807_v48 = vadd.f32 %v4806_v46, %v4805_v43 }
 0x105   : > { %1840 = vmatmul.mubr.f32.gmra.mxu0 %v4690_v44  ;;  %v4808_v49 = vpop.f32.mrf.mxu0  ;;  %v4862_v50 = vpop.f32.mrf.mxu1 }
 0x106   : > { %1844 = vmatprep.mubr.f32.mxu0 %v4693_v45  ;;  %584 = vst.msk [vmem:[#allocation2] sm:$0xff] %vm583_vm0, %v4807_v48  ;;  %v4863_v52 = vadd.f32 %v4862_v50, %v4861_v47 }
 0x107   : > { %v4809_v54 = vpop.f32.mrf.mxu0 }
 0x108   : > { %v4810_v55 = vadd.f32 %v4809_v54, %v4808_v49  ;;  %722 = vrot.lane.b32.xlu0 %v4863_v52, %s6147_s16 }
 0x109   : > { %1845 = vmatmul.mubr.f32.gmra.mxu0 %v4692_v51 }
 0x10a   : > { %1849 = vmatprep.mubr.f32.mxu0 %v4695_v53  ;;  %585 = vst.msk [vmem:[#allocation2 + $0x8] sm:$0xff] %vm583_vm0, %v4810_v55  ;;  %v4811_v57 = vpop.f32.mrf.mxu0  ;;  %v4864_v58 = vpop.f32.mrf.mxu1 }
 0x10c   : > { %v4812_v59 = vpop.f32.mrf.mxu0  ;;  %v4865_v60 = vpop.f32.mrf.mxu1 }
 0x10d   : > { %1850 = vmatmul.mubr.f32.gmra.mxu0 %v4694_v56  ;;  %v4813_v61 = vadd.f32 %v4812_v59, %v4811_v57  ;;  %v4866_v62 = vadd.f32 %v4865_v60, %v4864_v58 }
 0x10f   : > { %586 = vst.msk [vmem:[#allocation2 + $0x10] sm:$0xff] %vm583_vm0, %v4813_v61  ;;  %724 = vrot.lane.b32.xlu0 %v4866_v62, %s6147_s16 }
 0x110   : > { %v4814_v63 = vpop.f32.mrf.mxu0  ;;  %v4867_v0 = vpop.f32.mrf.mxu1 }
 0x112   : > { %v4815_v1 = vpop.f32.mrf.mxu0  ;;  %v4868_v34 = vpop.f32.mrf.mxu1 }
 0x113   : > { %v4816_v35 = vadd.f32 %v4815_v1, %v4814_v63  ;;  %v4869_v2 = vadd.f32 %v4868_v34, %v4867_v0 }
 0x115   : > { %587 = vst.msk [vmem:[#allocation2 + $0x18] sm:$0xff] %vm583_vm0, %v4816_v35  ;;  %726 = vrot.lane.b32.xlu1 %v4869_v2, %s6147_s16 }
 0x116   : > { %v4817_v36 = vpop.f32.mrf.mxu0  ;;  %v4870_v3 = vpop.f32.mrf.mxu1 }
 0x118   : > { %v4818_v4 = vpop.f32.mrf.mxu0  ;;  %v4871_v37 = vpop.f32.mrf.mxu1 }
 0x119   : > { %v4819_v5 = vadd.f32 %v4818_v4, %v4817_v36  ;;  %v4872_v38 = vadd.f32 %v4871_v37, %v4870_v3 }
 0x11b   : > { %588 = vst.msk [vmem:[#allocation2 + $0x20] sm:$0xff] %vm583_vm0, %v4819_v5  ;;  %728 = vrot.lane.b32.xlu0 %v4872_v38, %s6147_s16 }
 0x11c   : > { %v4820_v6 = vpop.f32.mrf.mxu0  ;;  %v4873_v7 = vpop.f32.mrf.mxu1 }
 0x11e   : > { %v4821_v8 = vpop.f32.mrf.mxu0  ;;  %v4874_v9 = vpop.f32.mrf.mxu1 }
 0x11f   : > { %v4822_v10 = vadd.f32 %v4821_v8, %v4820_v6  ;;  %v4875_v11 = vadd.f32 %v4874_v9, %v4873_v7 }
 0x121   : > { %589 = vst.msk [vmem:[#allocation2 + $0x28] sm:$0xff] %vm583_vm0, %v4822_v10  ;;  %730 = vrot.lane.b32.xlu0 %v4875_v11, %s6147_s16 }
 0x122   : > { %v4823_v12 = vpop.f32.mrf.mxu0  ;;  %v4876_v13 = vpop.f32.mrf.mxu1 }
 0x124   : > { %v4824_v14 = vpop.f32.mrf.mxu0  ;;  %v4877_v15 = vpop.f32.mrf.mxu1 }
 0x125   : > { %v4825_v16 = vadd.f32 %v4824_v14, %v4823_v12  ;;  %v4878_v17 = vadd.f32 %v4877_v15, %v4876_v13 }
 0x127   : > { %590 = vst.msk [vmem:[#allocation2 + $0x30] sm:$0xff] %vm583_vm0, %v4825_v16  ;;  %732 = vrot.lane.b32.xlu0 %v4878_v17, %s6147_s16 }
 0x128   : > { %v4826_v18 = vpop.f32.mrf.mxu0  ;;  %v4879_v19 = vpop.f32.mrf.mxu1 }
 0x12a   : > { %v4827_v20 = vpop.f32.mrf.mxu0  ;;  %v4880_v21 = vpop.f32.mrf.mxu1 }
 0x12b   : > { %v4828_v22 = vadd.f32 %v4827_v20, %v4826_v18  ;;  %v4881_v23 = vadd.f32 %v4880_v21, %v4879_v19 }
 0x12d   : > { %591 = vst.msk [vmem:[#allocation2 + $0x38] sm:$0xff] %vm583_vm0, %v4828_v22  ;;  %734 = vrot.lane.b32.xlu0 %v4881_v23, %s6147_s16 }
 0x12e   : > { %v4882_v24 = vpop.f32.mrf.mxu1  ;;  %v4917_v25 = vpop.f32.mrf.mxu0 }
 0x130   : > { %v4883_v26 = vpop.f32.mrf.mxu1  ;;  %v4918_v27 = vpop.f32.mrf.mxu0 }
 0x131   : > { %v4884_v28 = vadd.f32 %v4883_v26, %v4882_v24  ;;  %v4919_v29 = vadd.f32 %v4918_v27, %v4917_v25 }
 0x133   : > { %885 = vrot.lane.b32.xlu1 %v4919_v29, %s8405_s0  ;;  %736 = vrot.lane.b32.xlu0 %v4884_v28, %s6147_s16  ;;  %s4771_s16 = sshll.u32 %s6248_s25, 10 }
 0x134   : > { %v4920_v30 = vpop.f32.mrf.mxu0  ;;  %v4973_v31 = vpop.f32.mrf.mxu1 }
 0x136   : > { %v4921_v32 = vpop.f32.mrf.mxu0  ;;  %v4974_v33 = vpop.f32.mrf.mxu1 }
 0x137   : > { %v4922_v39 = vadd.f32 %v4921_v32, %v4920_v30  ;;  %v4975_v40 = vadd.f32 %v4974_v33, %v4973_v31 }
 0x139   : > { %887 = vrot.lane.b32.xlu1 %v4922_v39, %s8405_s0  ;;  %1048 = vrot.lane.b32.xlu0 %v4975_v40, %s6149_s26 }
 0x13a   : > { %v4923_v41 = vpop.f32.mrf.mxu0  ;;  %v4976_v42 = vpop.f32.mrf.mxu1 }
 0x13c   : > { %v4924_v43 = vpop.f32.mrf.mxu0  ;;  %v4977_v44 = vpop.f32.mrf.mxu1 }
 0x13d   : > { %v4978_v45 = vadd.f32 %v4977_v44, %v4976_v42  ;;  %v4925_v48 = vadd.f32 %v4924_v43, %v4923_v41 }
 0x13f   : > { %1050 = vrot.lane.b32.xlu1 %v4978_v45, %s6149_s26 }
 0x140   : > { %v4926_v46 = vpop.f32.mrf.mxu0  ;;  %v4979_v47 = vpop.f32.mrf.mxu1 }
 0x142   : > { %v4927_v49 = vpop.f32.mrf.mxu0  ;;  %v4980_v50 = vpop.f32.mrf.mxu1 }
 0x143   : > { %v4928_v51 = vadd.f32 %v4927_v49, %v4926_v46  ;;  %889 = vrot.lane.b32.xlu1 %v4925_v48, %s8405_s0  ;;  %v4981_v52 = vadd.f32 %v4980_v50, %v4979_v47 }
 0x145   : > { %891 = vrot.lane.b32.xlu0 %v4928_v51, %s8405_s0 }
 0x146   : > { %v4929_v53 = vpop.f32.mrf.mxu0  ;;  %v4982_v54 = vpop.f32.mrf.mxu1 }
 0x147   : > { %1052 = vrot.lane.b32.xlu1 %v4981_v52, %s6149_s26 }
 0x148   : > { %v4930_v55 = vpop.f32.mrf.mxu0  ;;  %v4983_v56 = vpop.f32.mrf.mxu1 }
 0x149   : > { %v4931_v57 = vadd.f32 %v4930_v55, %v4929_v53  ;;  %v4984_v58 = vadd.f32 %v4983_v56, %v4982_v54 }
 0x14b   : > { %1054 = vrot.lane.b32.xlu0 %v4984_v58, %s6149_s26  ;;  %893 = vrot.lane.b32.xlu1 %v4931_v57, %s8405_s0 }
 0x14c   : > { %v4932_v59 = vpop.f32.mrf.mxu0  ;;  %v4985_v60 = vpop.f32.mrf.mxu1 }
 0x14e   : > { %v4933_v61 = vpop.f32.mrf.mxu0  ;;  %v4986_v62 = vpop.f32.mrf.mxu1 }
 0x14f   : > { %v4934_v63 = vadd.f32 %v4933_v61, %v4932_v59  ;;  %v4987_v0 = vadd.f32 %v4986_v62, %v4985_v60 }
 0x151   : > { %895 = vrot.lane.b32.xlu0 %v4934_v63, %s8405_s0  ;;  %1056 = vrot.lane.b32.xlu1 %v4987_v0, %s6149_s26 }
 0x152   : > { %v4935_v1 = vpop.f32.mrf.mxu0  ;;  %v4988_v34 = vpop.f32.mrf.mxu1 }
 0x154   : > { %v4936_v35 = vpop.f32.mrf.mxu0  ;;  %v4989_v2 = vpop.f32.mrf.mxu1 }
 0x155   : > { %v4937_v36 = vadd.f32 %v4936_v35, %v4935_v1  ;;  %v4990_v3 = vadd.f32 %v4989_v2, %v4988_v34 }
 0x157   : > { %1058 = vrot.lane.b32.xlu0 %v4990_v3, %s6149_s26  ;;  %897 = vrot.lane.b32.xlu1 %v4937_v36, %s8405_s0 }
 0x158   : > { %v4938_v4 = vpop.f32.mrf.mxu0  ;;  %v4991_v37 = vpop.f32.mrf.mxu1 }
 0x15a   : > { %v4939_v5 = vpop.f32.mrf.mxu0  ;;  %v4992_v38 = vpop.f32.mrf.mxu1 }
 0x15b   : > { %v4940_v6 = vadd.f32 %v4939_v5, %v4938_v4  ;;  %v4993_v7 = vadd.f32 %v4992_v38, %v4991_v37 }
 0x15d   : > { %899 = vrot.lane.b32.xlu0 %v4940_v6, %s8405_s0  ;;  %1060 = vrot.lane.b32.xlu1 %v4993_v7, %s6149_s26 }
 0x15e   : > { %v4994_v8 = vpop.f32.mrf.mxu1  ;;  %v5029_v9 = vpop.f32.mrf.mxu0 }
 0x160   : > { %v4995_v10 = vpop.f32.mrf.mxu1  ;;  %v5030_v11 = vpop.f32.mrf.mxu0 }
 0x161   : > { %v4996_v12 = vadd.f32 %v4995_v10, %v4994_v8  ;;  %v5031_v15 = vadd.f32 %v5030_v11, %v5029_v9 }
 0x163   : > { %1062 = vrot.lane.b32.xlu0 %v4996_v12, %s6149_s26 }
 0x164   : > { %v5032_v13 = vpop.f32.mrf.mxu0  ;;  %v5085_v14 = vpop.f32.mrf.mxu1 }
 0x166   : > { %v5033_v16 = vpop.f32.mrf.mxu0  ;;  %v5086_v17 = vpop.f32.mrf.mxu1 }
 0x167   : > { %v5087_v18 = vadd.f32 %v5086_v17, %v5085_v14  ;;  %1211 = vrot.lane.b32.xlu0 %v5031_v15, %s6150_s19  ;;  %v5034_v19 = vadd.f32 %v5033_v16, %v5032_v13 }
 0x169   : > { %1374 = vrot.lane.b32.xlu1 %v5087_v18, %s6151_s20 }
 0x16a   : > { %v5035_v20 = vpop.f32.mrf.mxu0  ;;  %v5088_v21 = vpop.f32.mrf.mxu1 }
 0x16b   : > { %1213 = vrot.lane.b32.xlu0 %v5034_v19, %s6150_s19 }
 0x16c   : > { %v5036_v22 = vpop.f32.mrf.mxu0  ;;  %v5089_v23 = vpop.f32.mrf.mxu1 }
 0x16d   : > { %v5037_v24 = vadd.f32 %v5036_v22, %v5035_v20  ;;  %v5090_v25 = vadd.f32 %v5089_v23, %v5088_v21 }
 0x16f   : > { %1215 = vrot.lane.b32.xlu1 %v5037_v24, %s6150_s19  ;;  %1376 = vrot.lane.b32.xlu0 %v5090_v25, %s6151_s20 }
 0x170   : > { %v5038_v26 = vpop.f32.mrf.mxu0  ;;  %v5091_v27 = vpop.f32.mrf.mxu1 }
 0x172   : > { %v5039_v28 = vpop.f32.mrf.mxu0  ;;  %v5092_v29 = vpop.f32.mrf.mxu1 }
 0x173   : > { %v5040_v30 = vadd.f32 %v5039_v28, %v5038_v26  ;;  %v5093_v31 = vadd.f32 %v5092_v29, %v5091_v27 }
 0x175   : > { %1217 = vrot.lane.b32.xlu1 %v5040_v30, %s6150_s19  ;;  %1378 = vrot.lane.b32.xlu0 %v5093_v31, %s6151_s20 }
 0x176   : > { %v5041_v32 = vpop.f32.mrf.mxu0  ;;  %v5094_v33 = vpop.f32.mrf.mxu1 }
 0x178   : > { %v5042_v39 = vpop.f32.mrf.mxu0  ;;  %v5095_v40 = vpop.f32.mrf.mxu1 }
 0x179   : > { %v5043_v41 = vadd.f32 %v5042_v39, %v5041_v32  ;;  %v5096_v42 = vadd.f32 %v5095_v40, %v5094_v33 }
 0x17a   : > { %v723_v43 = vpop.permute.xlu0 %722 }
 0x17b   : > { %1219 = vrot.lane.b32.xlu1 %v5043_v41, %s6150_s19  ;;  %1380 = vrot.lane.b32.xlu0 %v5096_v42, %s6151_s20  ;;  %747 = vst.msk [vmem:[#allocation2] sm:$0xff] %vm746_vm1, %v723_v43 }
 0x17c   : > { %v5044_v44 = vpop.f32.mrf.mxu0  ;;  %v5097_v45 = vpop.f32.mrf.mxu1 }
 0x17e   : > { %v5045_v46 = vpop.f32.mrf.mxu0  ;;  %v5098_v47 = vpop.f32.mrf.mxu1 }
 0x17f   : > { %v5046_v48 = vadd.f32 %v5045_v46, %v5044_v44  ;;  %v5099_v49 = vadd.f32 %v5098_v47, %v5097_v45  ;;  %v1908_v44 = vld [vmem:[%s8418_s2 + $0x20] sm:$0xf] }
 0x180   : > { %5656 = vmatprep.subr.msk.mxu1 %vm1941_vm3, %v1908_v44 }
 0x181   : > { %1221 = vrot.lane.b32.xlu1 %v5046_v48, %s6150_s19  ;;  %1382 = vrot.lane.b32.xlu0 %v5099_v49, %s6151_s20  ;;  %v725_v50 = vpop.permute.xlu0 %724 }
 0x182   : > { %v5047_v51 = vpop.f32.mrf.mxu0  ;;  %v5100_v52 = vpop.f32.mrf.mxu1  ;;  %748 = vst.msk [vmem:[#allocation2 + $0x8] sm:$0xff] %vm746_vm1, %v725_v50  ;;  %5657 = vmatpush3.msk.msra.mxu1 %vm1941_vm3, %v1908_v44 }
 0x184   : > { %v5048_v53 = vpop.f32.mrf.mxu0  ;;  %v5101_v54 = vpop.f32.mrf.mxu1 }
 0x185   : > { %v5049_v55 = vadd.f32 %v5048_v53, %v5047_v51  ;;  %v5102_v56 = vadd.f32 %v5101_v54, %v5100_v52  ;;  %v1907_v51 = vld [vmem:[%s8418_s2 + $0x18] sm:$0xff]  ;;  %v1906_v53 = vld [vmem:[%s8418_s2 + $0x10] sm:$0xff] }
 0x186   : > { %5658 = vmatprep.subr.mxu1 %v1907_v51 }
 0x187   : > { %1223 = vrot.lane.b32.xlu1 %v5049_v55, %s6150_s19  ;;  %1384 = vrot.lane.b32.xlu0 %v5102_v56, %s6151_s20  ;;  %v727_v57 = vpop.permute.xlu1 %726 }
 0x188   : > { %v5050_v58 = vpop.f32.mrf.mxu0  ;;  %v5103_v59 = vpop.f32.mrf.mxu1  ;;  %749 = vst.msk [vmem:[#allocation2 + $0x10] sm:$0xff] %vm746_vm1, %v727_v57  ;;  %5659 = vmatpush3.msra.mxu1 %v1907_v51 }
 0x189   : > { %5660 = vmatprep.subr.mxu1 %v1906_v53 }
 0x18a   : > { %v5051_v60 = vpop.f32.mrf.mxu0  ;;  %v5104_v61 = vpop.f32.mrf.mxu1  ;;  %5661 = vmatpush3.msra.mxu1 %v1906_v53 }
 0x18b   : > { %v5052_v62 = vadd.f32 %v5051_v60, %v5050_v58  ;;  %v5105_v63 = vadd.f32 %v5104_v61, %v5103_v59  ;;  %v1905_v58 = vld [vmem:[%s8418_s2 + $0x8] sm:$0xff]  ;;  %v1904_v61 = vld [vmem:[%s8418_s2] sm:$0xff]  ;;  %s6157_s2 = smov 64  }
 0x18c   : > { %5662 = vmatprep.subr.mxu1 %v1905_v58 }
 0x18d   : > { %1386 = vrot.lane.b32.xlu1 %v5105_v63, %s6151_s20  ;;  %1225 = vrot.lane.b32.xlu0 %v5052_v62, %s6150_s19  ;;  %v729_v0 = vpop.permute.xlu0 %728 }
 0x18e   : > { %v5106_v1 = vpop.f32.mrf.mxu1  ;;  %v5141_v34 = vpop.f32.mrf.mxu0  ;;  %750 = vst.msk [vmem:[#allocation2 + $0x18] sm:$0xff] %vm746_vm1, %v729_v0  ;;  %5663 = vmatpush3.msra.mxu1 %v1905_v58 }
 0x18f   : > { %5664 = vmatprep.subr.mxu1 %v1904_v61 }
 0x190   : > { %v5107_v35 = vpop.f32.mrf.mxu1  ;;  %v5142_v2 = vpop.f32.mrf.mxu0  ;;  %5665 = vmatpush3.msra.mxu1 %v1904_v61 }
 0x191   : > { %v5108_v36 = vadd.f32 %v5107_v35, %v5106_v1  ;;  %v5143_v5 = vadd.f32 %v5142_v2, %v5141_v34 }
 0x193   : > { %1388 = vrot.lane.b32.xlu1 %v5108_v36, %s6151_s20  ;;  %v731_v3 = vpop.permute.xlu0 %730  ;;  %s7268_s20 = sand.u32 1, %s6137_s22  }
 0x194   : > { %v5144_v4 = vpop.f32.mrf.mxu0  ;;  %v5197_v37 = vpop.f32.mrf.mxu1  ;;  %751 = vst.msk [vmem:[#allocation2 + $0x20] sm:$0xff] %vm746_vm1, %v731_v3  ;;  %s4563_s15 = sshll.u32 %s7268_s20, 6 }
 0x196   : > { %v5145_v38 = vpop.f32.mrf.mxu0  ;;  %v5198_v6 = vpop.f32.mrf.mxu1 }
 0x197   : > { %v5146_v7 = vadd.f32 %v5145_v38, %v5144_v4  ;;  %v5199_v8 = vadd.f32 %v5198_v6, %v5197_v37  ;;  %1537 = vrot.lane.b32.xlu1 %v5143_v5, %s6152_s28 }
 0x198   : > { %v5200_v9 = vpop.f32.mrf.mxu1 }
 0x199   : > { %v5147_v10 = vpop.f32.mrf.mxu0  ;;  %1539 = vrot.lane.b32.xlu0 %v5146_v7, %s6152_s28  ;;  %v733_v11 = vpop.permute.xlu0 %732 }
 0x19a   : > { %v5201_v12 = vpop.f32.mrf.mxu1  ;;  %752 = vst.msk [vmem:[#allocation2 + $0x28] sm:$0xff] %vm746_vm1, %v733_v11 }
 0x19b   : > { %v5148_v13 = vpop.f32.mrf.mxu0  ;;  %v5202_v14 = vadd.f32 %v5201_v12, %v5200_v9  ;;  %1700 = vrot.lane.b32.xlu1 %v5199_v8, %s6153_s29 }
 0x19c   : > { %v5203_v15 = vpop.f32.mrf.mxu1  ;;  %v5149_v16 = vadd.f32 %v5148_v13, %v5147_v10 }
 0x19d   : > { %v5150_v17 = vpop.f32.mrf.mxu0  ;;  %1702 = vrot.lane.b32.xlu0 %v5202_v14, %s6153_s29 }
 0x19e   : > { %v5204_v18 = vpop.f32.mrf.mxu1 }
 0x19f   : > { %v5151_v19 = vpop.f32.mrf.mxu0  ;;  %v5205_v20 = vadd.f32 %v5204_v18, %v5203_v15  ;;  %1541 = vrot.lane.b32.xlu1 %v5149_v16, %s6152_s28  ;;  %v735_v21 = vpop.permute.xlu0 %734 }
 0x1a0   : > { %v5152_v22 = vadd.f32 %v5151_v19, %v5150_v17  ;;  %v5206_v23 = vpop.f32.mrf.mxu1  ;;  %753 = vst.msk [vmem:[#allocation2 + $0x30] sm:$0xff] %vm746_vm1, %v735_v21 }
 0x1a1   : > { %v5153_v24 = vpop.f32.mrf.mxu0 }
 0x1a2   : > { %1543 = vrot.lane.b32.xlu0 %v5152_v22, %s6152_s28  ;;  %v5207_v25 = vpop.f32.mrf.mxu1 }
 0x1a3   : > { %v5154_v26 = vpop.f32.mrf.mxu0  ;;  %v5208_v27 = vadd.f32 %v5207_v25, %v5206_v23  ;;  %1704 = vrot.lane.b32.xlu1 %v5205_v20, %s6153_s29 }
 0x1a4   : > { %v5209_v28 = vpop.f32.mrf.mxu1  ;;  %v5155_v29 = vadd.f32 %v5154_v26, %v5153_v24 }
 0x1a5   : > { %v5156_v30 = vpop.f32.mrf.mxu0  ;;  %v886_v31 = vpop.permute.xlu1 %885 }
 0x1a6   : > { %1706 = vrot.lane.b32.xlu0 %v5208_v27, %s6153_s29  ;;  %v5210_v32 = vpop.f32.mrf.mxu1  ;;  %910 = vst.msk [vmem:[#allocation2] sm:$0xff] %vm909_vm2, %v886_v31  ;;  %v737_v33 = vpop.permute.xlu0 %736 }
 0x1a7   : > { %v5157_v39 = vpop.f32.mrf.mxu0  ;;  %v5211_v40 = vadd.f32 %v5210_v32, %v5209_v28  ;;  %1545 = vrot.lane.b32.xlu1 %v5155_v29, %s6152_s28  ;;  %754 = vst.msk [vmem:[#allocation2 + $0x38] sm:$0xff] %vm746_vm1, %v737_v33 }
 0x1a8   : > { %v5158_v41 = vadd.f32 %v5157_v39, %v5156_v30  ;;  %v5212_v42 = vpop.f32.mrf.mxu1 }
 0x1a9   : > { %v5159_v43 = vpop.f32.mrf.mxu0 }
 0x1aa   : > { %1547 = vrot.lane.b32.xlu0 %v5158_v41, %s6152_s28  ;;  %v5213_v45 = vpop.f32.mrf.mxu1 }
 0x1ab   : > { %v5160_v46 = vpop.f32.mrf.mxu0  ;;  %v5214_v47 = vadd.f32 %v5213_v45, %v5212_v42  ;;  %1708 = vrot.lane.b32.xlu1 %v5211_v40, %s6153_s29  ;;  %v888_v48 = vpop.permute.xlu1 %887 }
 0x1ac   : > { %v5215_v49 = vpop.f32.mrf.mxu1  ;;  %911 = vst.msk [vmem:[#allocation2 + $0x8] sm:$0xff] %vm909_vm2, %v888_v48  ;;  %v1049_v50 = vpop.permute.xlu0 %1048  ;;  %v5161_v56 = vadd.f32 %v5160_v46, %v5159_v43 }
 0x1ad   : > { %v5162_v52 = vpop.f32.mrf.mxu0  ;;  %1073 = vst.msk [vmem:[#allocation2] sm:$0xff] %vm1072_vm4, %v1049_v50 }
 0x1ae   : > { %1710 = vrot.lane.b32.xlu0 %v5214_v47, %s6153_s29  ;;  %v5216_v55 = vpop.f32.mrf.mxu1 }
 0x1af   : > { %v5163_v54 = vpop.f32.mrf.mxu0  ;;  %v5217_v62 = vadd.f32 %v5216_v55, %v5215_v49 }
 0x1b0   : > { %v5164_v57 = vadd.f32 %v5163_v54, %v5162_v52  ;;  %v5218_v7 = vpop.f32.mrf.mxu1 }
 0x1b1   : > { %v5253_v59 = vpop.f32.mrf.mxu0  ;;  %v1051_v60 = vpop.permute.xlu1 %1050 }
 0x1b2   : > { %1549 = vrot.lane.b32.xlu0 %v5161_v56, %s6152_s28  ;;  %1551 = vrot.lane.b32.xlu1 %v5164_v57, %s6152_s28  ;;  %1074 = vst.msk [vmem:[#allocation2 + $0x8] sm:$0xff] %vm1072_vm4, %v1051_v60  ;;  %v5219_v12 = vpop.f32.mrf.mxu1  ;;  %s4564_s28 = sshll.u32 %s7268_s20, 4 }
 0x1b3   : > { %v5254_v63 = vpop.f32.mrf.mxu0  ;;  %v5220_v18 = vadd.f32 %v5219_v12, %v5218_v7  ;;  %s7960_s19 = scalar_lea.vmem [#allocation7], %s4564_s28  ;;  %s4388_s28 = sand.u32 1, %s6248_s25  }
 0x1b4   : > { %v5255_v0 = vadd.f32 %v5254_v63, %v5253_v59 }
 0x1b5   : > { %v5256_v1 = vpop.f32.mrf.mxu0  ;;  %v890_v34 = vpop.permute.xlu1 %889 }
 0x1b6   : > { %1863 = vrot.lane.b32.xlu1 %v5255_v0, %s6154_s18  ;;  %1712 = vrot.lane.b32.xlu0 %v5217_v62, %s6153_s29  ;;  %912 = vst.msk [vmem:[#allocation2 + $0x10] sm:$0xff] %vm909_vm2, %v890_v34 }
 0x1b7   : > { %v5257_v35 = vpop.f32.mrf.mxu0  ;;  %v892_v2 = vpop.permute.xlu0 %891 }
 0x1b8   : > { %v5258_v36 = vadd.f32 %v5257_v35, %v5256_v1  ;;  %913 = vst.msk [vmem:[#allocation2 + $0x18] sm:$0xff] %vm909_vm2, %v892_v2 }
 0x1b9   : > { %v5259_v3 = vpop.f32.mrf.mxu0  ;;  %v1053_v4 = vpop.permute.xlu1 %1052 }
 0x1ba   : > { %1865 = vrot.lane.b32.xlu1 %v5258_v36, %s6154_s18  ;;  %1075 = vst.msk [vmem:[#allocation2 + $0x10] sm:$0xff] %vm1072_vm4, %v1053_v4 }
 0x1bb   : > { %v5260_v37 = vpop.f32.mrf.mxu0 }
 0x1bc   : > { %v5261_v5 = vadd.f32 %v5260_v37, %v5259_v3 }
 0x1bd   : > { %v5262_v38 = vpop.f32.mrf.mxu0  ;;  %v1055_v6 = vpop.permute.xlu0 %1054 }
 0x1be   : > { %1867 = vrot.lane.b32.xlu1 %v5261_v5, %s6154_s18  ;;  %1076 = vst.msk [vmem:[#allocation2 + $0x18] sm:$0xff] %vm1072_vm4, %v1055_v6  ;;  %v894_v8 = vpop.permute.xlu1 %893 }
 0x1bf   : > { %v5263_v9 = vpop.f32.mrf.mxu0  ;;  %914 = vst.msk [vmem:[#allocation2 + $0x20] sm:$0xff] %vm909_vm2, %v894_v8 }
 0x1c0   : > { %v5264_v10 = vadd.f32 %v5263_v9, %v5262_v38 }
 0x1c1   : > { %v5265_v11 = vpop.f32.mrf.mxu0 }
 0x1c2   : > { %1869 = vrot.lane.b32.xlu1 %v5264_v10, %s6154_s18 }
 0x1c3   : > { %v5266_v13 = vpop.f32.mrf.mxu0  ;;  %v896_v14 = vpop.permute.xlu0 %895 }
 0x1c4   : > { %v5267_v15 = vadd.f32 %v5266_v13, %v5265_v11  ;;  %915 = vst.msk [vmem:[#allocation2 + $0x28] sm:$0xff] %vm909_vm2, %v896_v14  ;;  %v1057_v16 = vpop.permute.xlu1 %1056 }
 0x1c5   : > { %v5268_v17 = vpop.f32.mrf.mxu0  ;;  %1077 = vst.msk [vmem:[#allocation2 + $0x20] sm:$0xff] %vm1072_vm4, %v1057_v16  ;;  %v2058_v16 = vld [vmem:[%s8419_s4] sm:$0xff] }
 0x1c6   : > { %1871 = vrot.lane.b32.xlu1 %v5267_v15, %s6154_s18 }
 0x1c7   : > { %v5269_v19 = vpop.f32.mrf.mxu0 }
 0x1c8   : > { %v5270_v20 = vadd.f32 %v5269_v19, %v5268_v17  ;;  %v4708_v17 = vld [vmem:[%s8419_s4 + $0x10] sm:$0xff] }
 0x1c9   : > { %v5271_v21 = vpop.f32.mrf.mxu0  ;;  %v1059_v22 = vpop.permute.xlu0 %1058  ;;  %5713 = vmatprep.mubr.msk.f32.mxu0 %vm2060_vm11, %v4708_v17  ;;  %v2854_v17 = vld [vmem:[%s8421_s5 + $0x20] sm:$0xff] }
 0x1ca   : > { %1873 = vrot.lane.b32.xlu0 %v5270_v20, %s6154_s18  ;;  %1714 = vrot.lane.b32.xlu1 %v5220_v18, %s6153_s29  ;;  %1078 = vst.msk [vmem:[#allocation2 + $0x28] sm:$0xff] %vm1072_vm4, %v1059_v22  ;;  %v898_v23 = vpop.permute.xlu1 %897  ;;  %v4696_v18 = vld [vmem:[%s8420_s3] ss:$0 sm:$0xff]  ;;  %s4772_s29 = sshll.u32 %s6248_s25, 8 }
 0x1cb   : > { %v5272_v24 = vpop.f32.mrf.mxu0  ;;  %916 = vst.msk [vmem:[#allocation2 + $0x30] sm:$0xff] %vm909_vm2, %v898_v23 }
 0x1cc   : > { %v5273_v25 = vadd.f32 %v5272_v24, %v5271_v21 }
 0x1cd   : > { %v5274_v26 = vpop.f32.mrf.mxu0 }
 0x1ce   : > { %1875 = vrot.lane.b32.xlu0 %v5273_v25, %s6154_s18 }
 0x1cf   : > { %v5275_v27 = vpop.f32.mrf.mxu0  ;;  %v900_v28 = vpop.permute.xlu0 %899 }
 0x1d0   : > { %v5276_v29 = vadd.f32 %v5275_v27, %v5274_v26  ;;  %917 = vst.msk [vmem:[#allocation2 + $0x38] sm:$0xff] %vm909_vm2, %v900_v28  ;;  %v1061_v30 = vpop.permute.xlu1 %1060 }
 0x1d1   : > { %1079 = vst.msk [vmem:[#allocation2 + $0x30] sm:$0xff] %vm1072_vm4, %v1061_v30 }
 0x1d2   : > { %1877 = vrot.lane.b32.xlu1 %v5276_v29, %s6154_s18  ;;  %s7278_s18 = scalar_lea.vmem [#allocation5], %s4563_s15  ;;  %s8290_s15 = scalar_lea.hbm %s8402_s11, %s4772_s29 }
 0x1d3   : > { %s4407_s26 = sshll.u32 %s7278_s18, 4  ;;  %s6158_s29 = smov [#allocation7]   ;;  %s8285_s26 = int_to_ptr.vmem [resolvable:$true] %s4407_s26 }
 0x1d5   : > { %v1063_v31 = vpop.permute.xlu0 %1062 }
 0x1d6   : > { %1080 = vst.msk [vmem:[#allocation2 + $0x38] sm:$0xff] %vm1072_vm4, %v1063_v31 }
 0x1d9   : > { %v1212_v32 = vpop.permute.xlu0 %1211 }
 0x1da   : > { %1236 = vst.msk [vmem:[#allocation2] sm:$0xff] %vm1235_vm5, %v1212_v32 }
 0x1db   : > { %v1375_v33 = vpop.permute.xlu1 %1374 }
 0x1dc   : > { %1399 = vst.msk [vmem:[#allocation2] sm:$0xff] %vm1398_vm6, %v1375_v33 }
 0x1dd   : > { %v1214_v39 = vpop.permute.xlu0 %1213 }
 0x1de   : > { %1237 = vst.msk [vmem:[#allocation2 + $0x8] sm:$0xff] %vm1235_vm5, %v1214_v39 }
 0x1e1   : > { %v1216_v40 = vpop.permute.xlu1 %1215  ;;  %v1377_v41 = vpop.permute.xlu0 %1376 }
 0x1e2   : > { %1238 = vst.msk [vmem:[#allocation2 + $0x10] sm:$0xff] %vm1235_vm5, %v1216_v40  ;;  %v2059_v40 = vld [vmem:[%s8419_s4 + $0x8] sm:$0xff] }
 0x1e3   : > { %1400 = vst.msk [vmem:[#allocation2 + $0x8] sm:$0xff] %vm1398_vm6, %v1377_v41  ;;  %v4709_v41 = vld [vmem:[%s8419_s4 + $0x18] sm:$0xff] }
 0x1e7   : > { %v1218_v42 = vpop.permute.xlu1 %1217  ;;  %v1379_v43 = vpop.permute.xlu0 %1378 }
 0x1e8   : > { %1239 = vst.msk [vmem:[#allocation2 + $0x18] sm:$0xff] %vm1235_vm5, %v1218_v42  ;;  %v4716_v42 = vld [vmem:[%s8419_s4 + $0x30] sm:$0xff] }
 0x1e9   : > { %1401 = vst.msk [vmem:[#allocation2 + $0x10] sm:$0xff] %vm1398_vm6, %v1379_v43  ;;  %v4712_v43 = vld [vmem:[%s8419_s4 + $0x20] sm:$0xff] }
 0x1ed   : > { %v1220_v44 = vpop.permute.xlu1 %1219  ;;  %v1381_v45 = vpop.permute.xlu0 %1380 }
 0x1ee   : > { %1240 = vst.msk [vmem:[#allocation2 + $0x20] sm:$0xff] %vm1235_vm5, %v1220_v44  ;;  %v4717_v44 = vld [vmem:[%s8419_s4 + $0x38] sm:$0xff] }
 0x1ef   : > { %1402 = vst.msk [vmem:[#allocation2 + $0x18] sm:$0xff] %vm1398_vm6, %v1381_v45  ;;  %v4713_v45 = vld [vmem:[%s8419_s4 + $0x28] sm:$0xff] }
 0x1f3   : > { %v1222_v46 = vpop.permute.xlu1 %1221  ;;  %v1383_v47 = vpop.permute.xlu0 %1382 }
 0x1f4   : > { %1241 = vst.msk [vmem:[#allocation2 + $0x28] sm:$0xff] %vm1235_vm5, %v1222_v46  ;;  %v4724_v46 = vld [vmem:[%s8419_s4 + $0x50] sm:$0xff] }
 0x1f5   : > { %1403 = vst.msk [vmem:[#allocation2 + $0x20] sm:$0xff] %vm1398_vm6, %v1383_v47  ;;  %v4720_v47 = vld [vmem:[%s8419_s4 + $0x40] sm:$0xff] }
 0x1f9   : > { %v1224_v48 = vpop.permute.xlu1 %1223  ;;  %v1385_v49 = vpop.permute.xlu0 %1384 }
 0x1fa   : > { %1242 = vst.msk [vmem:[#allocation2 + $0x30] sm:$0xff] %vm1235_vm5, %v1224_v48  ;;  %v4725_v48 = vld [vmem:[%s8419_s4 + $0x58] sm:$0xff] }
 0x1fb   : > { %1404 = vst.msk [vmem:[#allocation2 + $0x28] sm:$0xff] %vm1398_vm6, %v1385_v49  ;;  %v4721_v49 = vld [vmem:[%s8419_s4 + $0x48] sm:$0xff] }
 0x1ff   : > { %v1387_v50 = vpop.permute.xlu1 %1386  ;;  %v1226_v51 = vpop.permute.xlu0 %1225 }
 0x200   : > { %1405 = vst.msk [vmem:[#allocation2 + $0x30] sm:$0xff] %vm1398_vm6, %v1387_v50  ;;  %v4732_v50 = vld [vmem:[%s8419_s4 + $0x70] sm:$0xff] }
 0x201   : > { %1243 = vst.msk [vmem:[#allocation2 + $0x38] sm:$0xff] %vm1235_vm5, %v1226_v51  ;;  %v4728_v51 = vld [vmem:[%s8419_s4 + $0x60] sm:$0xff] }
 0x205   : > { %v1389_v52 = vpop.permute.xlu1 %1388 }
 0x206   : > { %1406 = vst.msk [vmem:[#allocation2 + $0x38] sm:$0xff] %vm1398_vm6, %v1389_v52  ;;  %v4733_v52 = vld [vmem:[%s8419_s4 + $0x78] sm:$0xff] }
 0x209   : > { %v1538_v53 = vpop.permute.xlu1 %1537 }
 0x20a   : > { %1562 = vst.msk [vmem:[#allocation2] sm:$0xff] %vm1561_vm7, %v1538_v53  ;;  %v4729_v53 = vld [vmem:[%s8419_s4 + $0x68] sm:$0xff] }
 0x20b   : > { %v1540_v54 = vpop.permute.xlu0 %1539 }
 0x20c   : > { %1563 = vst.msk [vmem:[#allocation2 + $0x8] sm:$0xff] %vm1561_vm7, %v1540_v54  ;;  %v2881_v54 = vld [vmem:[%s8421_s5 + $0xf8] sm:$0xff] }
 0x20d   : > { %v1701_v55 = vpop.permute.xlu1 %1700 }
 0x20e   : > { %1725 = vst.msk [vmem:[#allocation2] sm:$0xff] %vm1724_vm8, %v1701_v55  ;;  %v4736_v55 = vld [vmem:[%s8419_s4 + $0x80] sm:$0xff] }
 0x20f   : > { %v1703_v56 = vpop.permute.xlu0 %1702 }
 0x210   : > { %1726 = vst.msk [vmem:[#allocation2 + $0x8] sm:$0xff] %vm1724_vm8, %v1703_v56  ;;  %v2865_v56 = vld [vmem:[%s8421_s5 + $0x78] sm:$0xff] }
 0x211   : > { %v1542_v57 = vpop.permute.xlu1 %1541 }
 0x212   : > { %1564 = vst.msk [vmem:[#allocation2 + $0x10] sm:$0xff] %vm1561_vm7, %v1542_v57  ;;  %v2880_v57 = vld [vmem:[%s8421_s5 + $0xf0] sm:$0xff] }
 0x214   : > { %v1544_v58 = vpop.permute.xlu0 %1543 }
 0x215   : > { %1565 = vst.msk [vmem:[#allocation2 + $0x18] sm:$0xff] %vm1561_vm7, %v1544_v58  ;;  %v1705_v59 = vpop.permute.xlu1 %1704  ;;  %v2864_v58 = vld [vmem:[%s8421_s5 + $0x70] sm:$0xff] }
 0x216   : > { %1727 = vst.msk [vmem:[#allocation2 + $0x10] sm:$0xff] %vm1724_vm8, %v1705_v59  ;;  %v2879_v59 = vld [vmem:[%s8421_s5 + $0xe8] sm:$0xff] }
 0x218   : > { %v1707_v60 = vpop.permute.xlu0 %1706 }
 0x219   : > { %1728 = vst.msk [vmem:[#allocation2 + $0x18] sm:$0xff] %vm1724_vm8, %v1707_v60  ;;  %v1546_v61 = vpop.permute.xlu1 %1545  ;;  %v2863_v60 = vld [vmem:[%s8421_s5 + $0x68] sm:$0xff] }
 0x21a   : > { %1566 = vst.msk [vmem:[#allocation2 + $0x20] sm:$0xff] %vm1561_vm7, %v1546_v61  ;;  %v2878_v61 = vld [vmem:[%s8421_s5 + $0xe0] sm:$0xff] }
 0x21c   : > { %v1548_v62 = vpop.permute.xlu0 %1547 }
 0x21d   : > { %1567 = vst.msk [vmem:[#allocation2 + $0x28] sm:$0xff] %vm1561_vm7, %v1548_v62  ;;  %v1709_v63 = vpop.permute.xlu1 %1708  ;;  %v2862_v62 = vld [vmem:[%s8421_s5 + $0x60] sm:$0xff] }
 0x21e   : > { %1729 = vst.msk [vmem:[#allocation2 + $0x20] sm:$0xff] %vm1724_vm8, %v1709_v63  ;;  %v2877_v63 = vld [vmem:[%s8421_s5 + $0xd8] sm:$0xff] }
 0x220   : > { %v1711_v0 = vpop.permute.xlu0 %1710 }
 0x221   : > { %1730 = vst.msk [vmem:[#allocation2 + $0x28] sm:$0xff] %vm1724_vm8, %v1711_v0  ;;  %v2861_v0 = vld [vmem:[%s8421_s5 + $0x58] sm:$0xff] }
 0x224   : > { %v1550_v1 = vpop.permute.xlu0 %1549  ;;  %v1552_v34 = vpop.permute.xlu1 %1551 }
 0x225   : > { %1568 = vst.msk [vmem:[#allocation2 + $0x30] sm:$0xff] %vm1561_vm7, %v1550_v1  ;;  %1569 = vst.msk [vmem:[#allocation2 + $0x38] sm:$0xff] %vm1561_vm7, %v1552_v34  ;;  %v2876_v1 = vld [vmem:[%s8421_s5 + $0xd0] sm:$0xff] }
 0x226   : > { %v2860_v34 = vld [vmem:[%s8421_s5 + $0x50] sm:$0xff] }
 0x228   : > { %v1864_v35 = vpop.permute.xlu1 %1863  ;;  %v1713_v2 = vpop.permute.xlu0 %1712 }
 0x229   : > { %1888 = vst.msk [vmem:[#allocation2] sm:$0xff] %vm1887_vm9, %v1864_v35  ;;  %v2875_v35 = vld [vmem:[%s8421_s5 + $0xc8] sm:$0xff] }
 0x22a   : > { %1731 = vst.msk [vmem:[#allocation2 + $0x30] sm:$0xff] %vm1724_vm8, %v1713_v2  ;;  %v2859_v2 = vld [vmem:[%s8421_s5 + $0x48] sm:$0xff] }
 0x22c   : > { %v1866_v36 = vpop.permute.xlu1 %1865 }
 0x22d   : > { %1889 = vst.msk [vmem:[#allocation2 + $0x8] sm:$0xff] %vm1887_vm9, %v1866_v36  ;;  %v2874_v36 = vld [vmem:[%s8421_s5 + $0xc0] sm:$0xff] }
 0x230   : > { %v1868_v3 = vpop.permute.xlu1 %1867  ;;  %v1896_v4 = vld [vmem:[#allocation2] sm:$0xff] }
 0x231   : > { %1890 = vst.msk [vmem:[#allocation2 + $0x10] sm:$0xff] %vm1887_vm9, %v1868_v3  ;;  %5666 = vmatprep.mubr.msk.f32.mxu1 %vm1916_vm10, %v1896_v4  ;;  %v4737_v3 = vld [vmem:[%s8419_s4 + $0x88] sm:$0xff]  ;;  %v2858_v4 = vld [vmem:[%s8421_s5 + $0x40] sm:$0xff]  ;;  %s8299_s4 = scalar_lea.hbm %s8401_s10, %s4771_s16 }
 0x234   : > { %v1870_v37 = vpop.permute.xlu1 %1869  ;;  %v1897_v5 = vld [vmem:[#allocation2 + $0x8] sm:$0xff] }
 0x235   : > { %1891 = vst.msk [vmem:[#allocation2 + $0x18] sm:$0xff] %vm1887_vm9, %v1870_v37  ;;  %5667 = vmatmul.mubr.msk.f32.vlgmr.msra.gmra.mxu1 %vm1916_vm10, %v1897_v5  ;;  %v2873_v37 = vld [vmem:[%s8421_s5 + $0xb8] sm:$0xff] }
 0x236   : > { %v2913_v5 = vld [vmem:[%s8421_s5 + $0x1f8] sm:$0xff] }
 0x238   : > { %v1872_v38 = vpop.permute.xlu1 %1871  ;;  %v1898_v6 = vld [vmem:[#allocation2 + $0x10] sm:$0xff] }
 0x239   : > { %1892 = vst.msk [vmem:[#allocation2 + $0x20] sm:$0xff] %vm1887_vm9, %v1872_v38  ;;  %5669 = vmatprep.mubr.msk.f32.mxu1 %vm1916_vm10, %v1898_v6  ;;  %v2857_v38 = vld [vmem:[%s8421_s5 + $0x38] sm:$0xff] }
 0x23a   : > { %v2897_v6 = vld [vmem:[%s8421_s5 + $0x178] sm:$0xff] }
 0x23c   : > { %v1874_v7 = vpop.permute.xlu0 %1873  ;;  %v1899_v8 = vld [vmem:[#allocation2 + $0x18] sm:$0xff]  ;;  %v1715_v9 = vpop.permute.xlu1 %1714 }
 0x23d   : > { %1893 = vst.msk [vmem:[#allocation2 + $0x28] sm:$0xff] %vm1887_vm9, %v1874_v7  ;;  %5670 = vmatmul.mubr.msk.f32.gmra.mxu1 %vm1916_vm10, %v1899_v8  ;;  %v2872_v7 = vld [vmem:[%s8421_s5 + $0xb0] sm:$0xff] }
 0x23e   : > { %1732 = vst.msk [vmem:[#allocation2 + $0x38] sm:$0xff] %vm1724_vm8, %v1715_v9  ;;  %v2912_v8 = vld [vmem:[%s8421_s5 + $0x1f0] sm:$0xff] }
 0x23f   : > { %v2856_v9 = vld [vmem:[%s8421_s5 + $0x30] sm:$0xff] }
 0x240   : > { %v1876_v10 = vpop.permute.xlu0 %1875  ;;  %v1900_v11 = vld [vmem:[#allocation2 + $0x20] sm:$0xff] }
 0x241   : > { %1894 = vst.msk [vmem:[#allocation2 + $0x30] sm:$0xff] %vm1887_vm9, %v1876_v10  ;;  %5672 = vmatprep.mubr.msk.f32.mxu1 %vm1916_vm10, %v1900_v11  ;;  %v2896_v10 = vld [vmem:[%s8421_s5 + $0x170] sm:$0xff]  ;;  %v2871_v11 = vld [vmem:[%s8421_s5 + $0xa8] sm:$0xff] }
 0x244   : > { %v1878_v12 = vpop.permute.xlu1 %1877  ;;  %v1901_v13 = vld [vmem:[#allocation2 + $0x28] sm:$0xff] }
 0x245   : > { %1895 = vst.msk [vmem:[#allocation2 + $0x38] sm:$0xff] %vm1887_vm9, %v1878_v12  ;;  %5673 = vmatmul.mubr.msk.f32.gmra.mxu1 %vm1916_vm10, %v1901_v13  ;;  %v2911_v12 = vld [vmem:[%s8421_s5 + $0x1e8] sm:$0xff] }
 0x246   : > { %v2855_v13 = vld [vmem:[%s8421_s5 + $0x28] sm:$0xff] }
 0x248   : > { %v1902_v14 = vld [vmem:[#allocation2 + $0x30] sm:$0xff] }
 0x249   : > { %5675 = vmatprep.mubr.msk.f32.mxu1 %vm1916_vm10, %v1902_v14  ;;  %v2895_v14 = vld [vmem:[%s8421_s5 + $0x168] sm:$0xff] }
 0x24c   : > { %v1903_v15 = vld [vmem:[#allocation2 + $0x38] sm:$0xff] }
 0x24d   : > { %5676 = vmatmul.mubr.msk.f32.gmra.mxu1 %vm1916_vm10, %v1903_v15  ;;  %v2870_v15 = vld [vmem:[%s8421_s5 + $0xa0] sm:$0xff] }
 0x24e   : > { %5694 = vmatprep.mubr.msk.f32.mxu1 %vm2060_vm11, %v2058_v16  ;;  %v2910_v16 = vld [vmem:[%s8421_s5 + $0x1e0] sm:$0xff] }
 0x2f5   : > { %v5668_v19 = vpop.f32.mrf.mxu1 }
 0x2f6   : > { %v7274_v20 = vadd.f32 %v5668_v19, %v4696_v18  ;;  %v2869_v19 = vld [vmem:[%s8421_s5 + $0x98] sm:$0xff] }
 0x2f7   : > { %v2011_v21 = vpop.f32.mrf.mxu1 }
 0x2f8   : > { %v7276_v22 = vadd.f32 %v4696_v18, %v2011_v21  ;;  %2051 = vst [vmem:[%s7278_s18 + $0x8] sm:$0xff] %v7274_v20  ;;  %v2853_v21 = vld [vmem:[%s8421_s5 + $0x18] sm:$0xff] }
 0x2fa   : > { %2050 = vst [vmem:[%s7278_s18] sm:$0xff] %v7276_v22 }
 0x2fd   : > { %v5671_v23 = vpop.f32.mrf.mxu1 }
 0x2fe   : > { %v7284_v24 = vadd.f32 %v5671_v23, %v4696_v18  ;;  %v2868_v23 = vld [vmem:[%s8421_s5 + $0x90] sm:$0xff] }
 0x2ff   : > { %v2021_v25 = vpop.f32.mrf.mxu1 }
 0x300   : > { %v7286_v26 = vadd.f32 %v4696_v18, %v2021_v25  ;;  %2053 = vst [vmem:[%s7278_s18 + $0x18] sm:$0xff] %v7284_v24  ;;  %v2852_v25 = vld [vmem:[%s8421_s5 + $0x10] sm:$0xff] }
 0x302   : > { %2052 = vst [vmem:[%s7278_s18 + $0x10] sm:$0xff] %v7286_v26 }
 0x305   : > { %v5674_v27 = vpop.f32.mrf.mxu1 }
 0x306   : > { %v7292_v28 = vadd.f32 %v5674_v27, %v4696_v18  ;;  %v2867_v27 = vld [vmem:[%s8421_s5 + $0x88] sm:$0xff] }
 0x307   : > { %v2031_v29 = vpop.f32.mrf.mxu1 }
 0x308   : > { %v7294_v30 = vadd.f32 %v4696_v18, %v2031_v29  ;;  %2055 = vst [vmem:[%s7278_s18 + $0x28] sm:$0xff] %v7292_v28  ;;  %v2851_v29 = vld [vmem:[%s8421_s5 + $0x8] sm:$0xff] }
 0x30a   : > { %2054 = vst [vmem:[%s7278_s18 + $0x20] sm:$0xff] %v7294_v30 }
 0x30d   : > { %v5677_v31 = vpop.f32.mrf.mxu1 }
 0x30e   : > { %v7300_v32 = vadd.f32 %v5677_v31, %v4696_v18  ;;  %v2866_v31 = vld [vmem:[%s8421_s5 + $0x80] sm:$0xff] }
 0x30f   : > { %v2041_v33 = vpop.f32.mrf.mxu1 }
 0x310   : > { %v7302_v39 = vadd.f32 %v4696_v18, %v2041_v33  ;;  %5678 = vmatprep.subr.mxu1 %v7300_v32  ;;  %5697 = vmatprep.subr.mxu0 %v7300_v32  ;;  %2057 = vst [vmem:[%s7278_s18 + $0x38] sm:$0xff] %v7300_v32  ;;  %v2894_v18 = vld [vmem:[%s8421_s5 + $0x160] sm:$0xff] }
 0x311   : > { %5679 = vmatpush3.msra.mxu1 %v7300_v32  ;;  %5698 = vmatpush3.msra.mxu0 %v7300_v32  ;;  %v2850_v33 = vld [vmem:[%s8421_s5] sm:$0xff] }
 0x312   : > { %5680 = vmatprep.subr.mxu1 %v7302_v39  ;;  %5699 = vmatprep.subr.mxu0 %v7302_v39  ;;  %2056 = vst [vmem:[%s7278_s18 + $0x30] sm:$0xff] %v7302_v39  ;;  %s8301_s18 = scalar_lea.sflag [#allocation8], %s4388_s28 }
 0x313   : > { %5681 = vmatpush3.msra.mxu1 %v7302_v39  ;;  %5700 = vmatpush3.msra.mxu0 %v7302_v39 }
 0x314   : > { %5682 = vmatprep.subr.mxu1 %v7292_v28  ;;  %5701 = vmatprep.subr.mxu0 %v7292_v28 }
 0x315   : > { %5683 = vmatpush3.msra.mxu1 %v7292_v28  ;;  %5702 = vmatpush3.msra.mxu0 %v7292_v28 }
 0x316   : > { %5684 = vmatprep.subr.mxu1 %v7294_v30  ;;  %5703 = vmatprep.subr.mxu0 %v7294_v30 }
 0x317   : > { %5685 = vmatpush3.msra.mxu1 %v7294_v30  ;;  %5704 = vmatpush3.msra.mxu0 %v7294_v30 }
 0x318   : > { %5686 = vmatprep.subr.mxu1 %v7284_v24  ;;  %5705 = vmatprep.subr.mxu0 %v7284_v24 }
 0x319   : > { %5687 = vmatpush3.msra.mxu1 %v7284_v24  ;;  %5706 = vmatpush3.msra.mxu0 %v7284_v24 }
 0x31a   : > { %5688 = vmatprep.subr.mxu1 %v7286_v26  ;;  %5707 = vmatprep.subr.mxu0 %v7286_v26 }
 0x31b   : > { %5689 = vmatpush3.msra.mxu1 %v7286_v26  ;;  %5708 = vmatpush3.msra.mxu0 %v7286_v26 }
 0x31c   : > { %5690 = vmatprep.subr.mxu1 %v7274_v20  ;;  %5709 = vmatprep.subr.mxu0 %v7274_v20 }
 0x31d   : > { %5691 = vmatpush3.msra.mxu1 %v7274_v20  ;;  %5710 = vmatpush3.msra.mxu0 %v7274_v20 }
 0x31e   : > { %5692 = vmatprep.subr.mxu1 %v7276_v22  ;;  %5711 = vmatprep.subr.mxu0 %v7276_v22 }
 0x31f   : > { %5693 = vmatpush3.msra.mxu1 %v7276_v22  ;;  %5712 = vmatpush3.msra.mxu0 %v7276_v22 }
 0x320   : > { %5716 = vmatprep.subr.mxu1 %v7300_v32  ;;  %5735 = vmatprep.subr.mxu0 %v7300_v32 }
 0x321   : > { %5695 = vmatmul.mubr.msk.f32.vlgmr.msra.gmra.mxu1 %vm2060_vm11, %v2059_v40  ;;  %5714 = vmatmul.mubr.msk.f32.vlgmr.msra.gmra.mxu0 %vm2060_vm11, %v4709_v41  ;;  %v2905_v40 = vld [vmem:[%s8421_s5 + $0x1b8] sm:$0xff] }
 0x322   : > { %5717 = vmatpush3.msra.mxu1 %v7300_v32  ;;  %5736 = vmatpush3.msra.mxu0 %v7300_v32  ;;  %v2945_v41 = vld [vmem:[%s8421_s5 + $0x2f8] sm:$0xff] }
 0x323   : > { %5718 = vmatprep.subr.mxu1 %v7302_v39  ;;  %5737 = vmatprep.subr.mxu0 %v7302_v39 }
 0x324   : > { %5719 = vmatpush3.msra.mxu1 %v7302_v39  ;;  %5738 = vmatpush3.msra.mxu0 %v7302_v39 }
 0x325   : > { %5720 = vmatprep.subr.mxu1 %v7292_v28  ;;  %5739 = vmatprep.subr.mxu0 %v7292_v28 }
 0x326   : > { %5721 = vmatpush3.msra.mxu1 %v7292_v28  ;;  %5740 = vmatpush3.msra.mxu0 %v7292_v28 }
 0x327   : > { %5722 = vmatprep.subr.mxu1 %v7294_v30  ;;  %5741 = vmatprep.subr.mxu0 %v7294_v30 }
 0x328   : > { %5723 = vmatpush3.msra.mxu1 %v7294_v30  ;;  %5742 = vmatpush3.msra.mxu0 %v7294_v30 }
 0x329   : > { %5724 = vmatprep.subr.mxu1 %v7284_v24  ;;  %5743 = vmatprep.subr.mxu0 %v7284_v24 }
 0x32a   : > { %5725 = vmatpush3.msra.mxu1 %v7284_v24  ;;  %5744 = vmatpush3.msra.mxu0 %v7284_v24 }
 0x32b   : > { %5726 = vmatprep.subr.mxu1 %v7286_v26  ;;  %5745 = vmatprep.subr.mxu0 %v7286_v26 }
 0x32c   : > { %5727 = vmatpush3.msra.mxu1 %v7286_v26  ;;  %5746 = vmatpush3.msra.mxu0 %v7286_v26 }
 0x32d   : > { %5728 = vmatprep.subr.mxu1 %v7274_v20  ;;  %5747 = vmatprep.subr.mxu0 %v7274_v20 }
 0x32e   : > { %5729 = vmatpush3.msra.mxu1 %v7274_v20  ;;  %5748 = vmatpush3.msra.mxu0 %v7274_v20 }
 0x32f   : > { %5730 = vmatprep.subr.mxu1 %v7276_v22  ;;  %5749 = vmatprep.subr.mxu0 %v7276_v22 }
 0x330   : > { %5731 = vmatpush3.msra.mxu1 %v7276_v22  ;;  %5750 = vmatpush3.msra.mxu0 %v7276_v22 }
 0x331   : > { %5751 = vmatprep.mubr.msk.f32.mxu0 %vm2060_vm11, %v4716_v42  ;;  %5732 = vmatprep.mubr.msk.f32.mxu1 %vm2060_vm11, %v4712_v43  ;;  %v2889_v42 = vld [vmem:[%s8421_s5 + $0x138] sm:$0xff]  ;;  %v2904_v43 = vld [vmem:[%s8421_s5 + $0x1b0] sm:$0xff] }
 0x332   : > { %5752 = vmatmul.mubr.msk.f32.vlgmr.msra.gmra.mxu0 %vm2060_vm11, %v4717_v44  ;;  %5754 = vmatprep.subr.mxu1 %v7300_v32  ;;  %v2888_v44 = vld [vmem:[%s8421_s5 + $0x130] sm:$0xff] }
 0x333   : > { %5773 = vmatprep.subr.mxu0 %v7300_v32  ;;  %5733 = vmatmul.mubr.msk.f32.vlgmr.msra.gmra.mxu1 %vm2060_vm11, %v4713_v45  ;;  %v2903_v45 = vld [vmem:[%s8421_s5 + $0x1a8] sm:$0xff] }
 0x334   : > { %5755 = vmatpush3.msra.mxu1 %v7300_v32  ;;  %5774 = vmatpush3.msra.mxu0 %v7300_v32 }
 0x335   : > { %5756 = vmatprep.subr.mxu1 %v7302_v39  ;;  %5775 = vmatprep.subr.mxu0 %v7302_v39 }
 0x336   : > { %5757 = vmatpush3.msra.mxu1 %v7302_v39  ;;  %5776 = vmatpush3.msra.mxu0 %v7302_v39 }
 0x337   : > { %5758 = vmatprep.subr.mxu1 %v7292_v28  ;;  %5777 = vmatprep.subr.mxu0 %v7292_v28 }
 0x338   : > { %5759 = vmatpush3.msra.mxu1 %v7292_v28  ;;  %5778 = vmatpush3.msra.mxu0 %v7292_v28 }
 0x339   : > { %5760 = vmatprep.subr.mxu1 %v7294_v30  ;;  %5779 = vmatprep.subr.mxu0 %v7294_v30 }
 0x33a   : > { %5761 = vmatpush3.msra.mxu1 %v7294_v30  ;;  %5780 = vmatpush3.msra.mxu0 %v7294_v30 }
 0x33b   : > { %5762 = vmatprep.subr.mxu1 %v7284_v24  ;;  %5781 = vmatprep.subr.mxu0 %v7284_v24 }
 0x33c   : > { %5763 = vmatpush3.msra.mxu1 %v7284_v24  ;;  %5782 = vmatpush3.msra.mxu0 %v7284_v24 }
 0x33d   : > { %5764 = vmatprep.subr.mxu1 %v7286_v26  ;;  %5783 = vmatprep.subr.mxu0 %v7286_v26 }
 0x33e   : > { %5765 = vmatpush3.msra.mxu1 %v7286_v26  ;;  %5784 = vmatpush3.msra.mxu0 %v7286_v26 }
 0x33f   : > { %5766 = vmatprep.subr.mxu1 %v7274_v20  ;;  %5785 = vmatprep.subr.mxu0 %v7274_v20 }
 0x340   : > { %5767 = vmatpush3.msra.mxu1 %v7274_v20  ;;  %5786 = vmatpush3.msra.mxu0 %v7274_v20 }
 0x341   : > { %5768 = vmatprep.subr.mxu1 %v7276_v22  ;;  %5787 = vmatprep.subr.mxu0 %v7276_v22 }
 0x342   : > { %5769 = vmatpush3.msra.mxu1 %v7276_v22  ;;  %5788 = vmatpush3.msra.mxu0 %v7276_v22 }
 0x343   : > { %5789 = vmatprep.mubr.msk.f32.mxu0 %vm2060_vm11, %v4724_v46  ;;  %5770 = vmatprep.mubr.msk.f32.mxu1 %vm2060_vm11, %v4720_v47  ;;  %v2887_v46 = vld [vmem:[%s8421_s5 + $0x128] sm:$0xff]  ;;  %v2902_v47 = vld [vmem:[%s8421_s5 + $0x1a0] sm:$0xff] }
 0x344   : > { %5790 = vmatmul.mubr.msk.f32.vlgmr.msra.gmra.mxu0 %vm2060_vm11, %v4725_v48  ;;  %5792 = vmatprep.subr.mxu1 %v7300_v32  ;;  %v2886_v48 = vld [vmem:[%s8421_s5 + $0x120] sm:$0xff] }
 0x345   : > { %5811 = vmatprep.subr.mxu0 %v7300_v32  ;;  %5771 = vmatmul.mubr.msk.f32.vlgmr.msra.gmra.mxu1 %vm2060_vm11, %v4721_v49  ;;  %v2901_v49 = vld [vmem:[%s8421_s5 + $0x198] sm:$0xff] }
 0x346   : > { %5793 = vmatpush3.msra.mxu1 %v7300_v32  ;;  %5812 = vmatpush3.msra.mxu0 %v7300_v32 }
 0x347   : > { %5794 = vmatprep.subr.mxu1 %v7302_v39  ;;  %5813 = vmatprep.subr.mxu0 %v7302_v39 }
 0x348   : > { %5795 = vmatpush3.msra.mxu1 %v7302_v39  ;;  %5814 = vmatpush3.msra.mxu0 %v7302_v39 }
 0x349   : > { %5796 = vmatprep.subr.mxu1 %v7292_v28  ;;  %5815 = vmatprep.subr.mxu0 %v7292_v28 }
 0x34a   : > { %5797 = vmatpush3.msra.mxu1 %v7292_v28  ;;  %5816 = vmatpush3.msra.mxu0 %v7292_v28 }
 0x34b   : > { %5798 = vmatprep.subr.mxu1 %v7294_v30  ;;  %5817 = vmatprep.subr.mxu0 %v7294_v30 }
 0x34c   : > { %5799 = vmatpush3.msra.mxu1 %v7294_v30  ;;  %5818 = vmatpush3.msra.mxu0 %v7294_v30 }
 0x34d   : > { %5800 = vmatprep.subr.mxu1 %v7284_v24  ;;  %5819 = vmatprep.subr.mxu0 %v7284_v24 }
 0x34e   : > { %5801 = vmatpush3.msra.mxu1 %v7284_v24  ;;  %5820 = vmatpush3.msra.mxu0 %v7284_v24 }
 0x34f   : > { %5802 = vmatprep.subr.mxu1 %v7286_v26  ;;  %5821 = vmatprep.subr.mxu0 %v7286_v26 }
 0x350   : > { %5803 = vmatpush3.msra.mxu1 %v7286_v26  ;;  %5822 = vmatpush3.msra.mxu0 %v7286_v26 }
 0x351   : > { %5804 = vmatprep.subr.mxu1 %v7274_v20  ;;  %5823 = vmatprep.subr.mxu0 %v7274_v20 }
 0x352   : > { %5805 = vmatpush3.msra.mxu1 %v7274_v20  ;;  %5824 = vmatpush3.msra.mxu0 %v7274_v20 }
 0x353   : > { %5806 = vmatprep.subr.mxu1 %v7276_v22  ;;  %5825 = vmatprep.subr.mxu0 %v7276_v22 }
 0x354   : > { %5807 = vmatpush3.msra.mxu1 %v7276_v22  ;;  %5826 = vmatpush3.msra.mxu0 %v7276_v22 }
 0x355   : > { %5827 = vmatprep.mubr.msk.f32.mxu0 %vm2060_vm11, %v4732_v50  ;;  %5808 = vmatprep.mubr.msk.f32.mxu1 %vm2060_vm11, %v4728_v51  ;;  %v2885_v50 = vld [vmem:[%s8421_s5 + $0x118] sm:$0xff]  ;;  %v2900_v51 = vld [vmem:[%s8421_s5 + $0x190] sm:$0xff] }
 0x356   : > { %5828 = vmatmul.mubr.msk.f32.vlgmr.msra.gmra.mxu0 %vm2060_vm11, %v4733_v52  ;;  %5830 = vmatprep.subr.mxu1 %v7300_v32  ;;  %v2884_v52 = vld [vmem:[%s8421_s5 + $0x110] sm:$0xff] }
 0x357   : > { %5809 = vmatmul.mubr.msk.f32.vlgmr.msra.gmra.mxu1 %vm2060_vm11, %v4729_v53  ;;  %5380 = vmatprep.subr.mxu0 %v2881_v54  ;;  %v2899_v53 = vld [vmem:[%s8421_s5 + $0x188] sm:$0xff] }
 0x358   : > { %5831 = vmatpush3.msra.mxu1 %v7300_v32  ;;  %5846 = vmatprep.mubr.msk.f32.mxu1 %vm2060_vm11, %v4736_v55  ;;  %v2906_v32 = vld [vmem:[%s8421_s5 + $0x1c0] sm:$0xff]  ;;  %v2883_v54 = vld [vmem:[%s8421_s5 + $0x108] sm:$0xff] }
 0x359   : > { %5832 = vmatprep.subr.mxu1 %v7302_v39  ;;  %5381 = vmatpush3.msra.mxu0 %v2865_v56  ;;  %v2898_v55 = vld [vmem:[%s8421_s5 + $0x180] sm:$0xff] }
 0x35a   : > { %5833 = vmatpush3.msra.mxu1 %v7302_v39  ;;  %5382 = vmatprep.subr.mxu0 %v2880_v57  ;;  %v2890_v39 = vld [vmem:[%s8421_s5 + $0x140] sm:$0xff]  ;;  %v2977_v57 = vld [vmem:[%s8421_s5 + $0x3f8] sm:$0xff] }
 0x35b   : > { %5834 = vmatprep.subr.mxu1 %v7292_v28  ;;  %5383 = vmatpush3.msra.mxu0 %v2864_v58  ;;  %v2882_v56 = vld [vmem:[%s8421_s5 + $0x100] sm:$0xff] }
 0x35c   : > { %5835 = vmatpush3.msra.mxu1 %v7292_v28  ;;  %5384 = vmatprep.subr.mxu0 %v2879_v59  ;;  %v2907_v28 = vld [vmem:[%s8421_s5 + $0x1c8] sm:$0xff] }
 0x35d   : > { %5836 = vmatprep.subr.mxu1 %v7294_v30  ;;  %5385 = vmatpush3.msra.mxu0 %v2863_v60 }
 0x35e   : > { %5837 = vmatpush3.msra.mxu1 %v7294_v30  ;;  %5386 = vmatprep.subr.mxu0 %v2878_v61  ;;  %v2891_v30 = vld [vmem:[%s8421_s5 + $0x148] sm:$0xff] }
 0x35f   : > { %5838 = vmatprep.subr.mxu1 %v7284_v24  ;;  %5387 = vmatpush3.msra.mxu0 %v2862_v62  ;;  %v2929_v62 = vld [vmem:[%s8421_s5 + $0x278] sm:$0xff] }
 0x360   : > { %5839 = vmatpush3.msra.mxu1 %v7284_v24  ;;  %5388 = vmatprep.subr.mxu0 %v2877_v63  ;;  %v2908_v24 = vld [vmem:[%s8421_s5 + $0x1d0] sm:$0xff] }
 0x361   : > { %5840 = vmatprep.subr.mxu1 %v7286_v26  ;;  %5389 = vmatpush3.msra.mxu0 %v2861_v0  ;;  %v2944_v63 = vld [vmem:[%s8421_s5 + $0x2f0] sm:$0xff] }
 0x362   : > { %5841 = vmatpush3.msra.mxu1 %v7286_v26  ;;  %5390 = vmatprep.subr.mxu0 %v2876_v1  ;;  %v2892_v26 = vld [vmem:[%s8421_s5 + $0x150] sm:$0xff]  ;;  %v2943_v1 = vld [vmem:[%s8421_s5 + $0x2e8] sm:$0xff] }
 0x363   : > { %5842 = vmatprep.subr.mxu1 %v7274_v20  ;;  %5391 = vmatpush3.msra.mxu0 %v2860_v34  ;;  %v2928_v0 = vld [vmem:[%s8421_s5 + $0x270] sm:$0xff]  ;;  %v2927_v34 = vld [vmem:[%s8421_s5 + $0x268] sm:$0xff] }
 0x364   : > { %5843 = vmatpush3.msra.mxu1 %v7274_v20  ;;  %5392 = vmatprep.subr.mxu0 %v2875_v35  ;;  %v2909_v20 = vld [vmem:[%s8421_s5 + $0x1d8] sm:$0xff]  ;;  %v2942_v35 = vld [vmem:[%s8421_s5 + $0x2e0] sm:$0xff] }
 0x365   : > { %5844 = vmatprep.subr.mxu1 %v7276_v22  ;;  %5393 = vmatpush3.msra.mxu0 %v2859_v2  ;;  %v2926_v2 = vld [vmem:[%s8421_s5 + $0x260] sm:$0xff] }
 0x366   : > { %5845 = vmatpush3.msra.mxu1 %v7276_v22  ;;  %5394 = vmatprep.subr.mxu0 %v2874_v36  ;;  %v2893_v22 = vld [vmem:[%s8421_s5 + $0x158] sm:$0xff] }
 0x367   : > { %5847 = vmatmul.mubr.msk.f32.vlgmr.msra.gmra.mxu1 %vm2060_vm11, %v4737_v3  ;;  %5395 = vmatpush3.msra.mxu0 %v2858_v4  ;;  %v2941_v36 = vld [vmem:[%s8421_s5 + $0x2d8] sm:$0xff]  ;;  %v2940_v4 = vld [vmem:[%s8421_s5 + $0x2d0] sm:$0xff] }
 0x368   : > { %5396 = vmatprep.subr.mxu0 %v2873_v37  ;;  %5418 = vmatprep.subr.mxu1 %v2913_v5  ;;  %v2925_v3 = vld [vmem:[%s8421_s5 + $0x258] sm:$0xff]  ;;  %v2924_v37 = vld [vmem:[%s8421_s5 + $0x250] sm:$0xff]  ;;  %v2939_v5 = vld [vmem:[%s8421_s5 + $0x2c8] sm:$0xff] }
 0x369   : > { %5397 = vmatpush3.msra.mxu0 %v2857_v38  ;;  %5419 = vmatpush3.msra.mxu1 %v2897_v6  ;;  %v2923_v38 = vld [vmem:[%s8421_s5 + $0x248] sm:$0xff]  ;;  %v2938_v6 = vld [vmem:[%s8421_s5 + $0x2c0] sm:$0xff] }
 0x36a   : > { %5398 = vmatprep.subr.mxu0 %v2872_v7  ;;  %5420 = vmatprep.subr.mxu1 %v2912_v8  ;;  %v2922_v7 = vld [vmem:[%s8421_s5 + $0x240] sm:$0xff] }
 0x36b   : > { %5399 = vmatpush3.msra.mxu0 %v2856_v9  ;;  %5421 = vmatpush3.msra.mxu1 %v2896_v10  ;;  %v2937_v9 = vld [vmem:[%s8421_s5 + $0x2b8] sm:$0xff] }
 0x36c   : > { %5400 = vmatprep.subr.mxu0 %v2871_v11  ;;  %5422 = vmatprep.subr.mxu1 %v2911_v12  ;;  %v2921_v11 = vld [vmem:[%s8421_s5 + $0x238] sm:$0xff] }
 0x36d   : > { %5401 = vmatpush3.msra.mxu0 %v2855_v13  ;;  %5423 = vmatpush3.msra.mxu1 %v2895_v14  ;;  %v2961_v13 = vld [vmem:[%s8421_s5 + $0x378] sm:$0xff]  ;;  %v2936_v14 = vld [vmem:[%s8421_s5 + $0x2b0] sm:$0xff] }
 0x36e   : > { %5402 = vmatprep.subr.mxu0 %v2870_v15  ;;  %5424 = vmatprep.subr.mxu1 %v2910_v16  ;;  %v2976_v16 = vld [vmem:[%s8421_s5 + $0x3f0] sm:$0xff] }
 0x36f   : > { %5403 = vmatpush3.msra.mxu0 %v2854_v17  ;;  %5425 = vmatpush3.msra.mxu1 %v2894_v18  ;;  %v2920_v17 = vld [vmem:[%s8421_s5 + $0x230] sm:$0xff] }
 0x370   : > { %5404 = vmatprep.subr.mxu0 %v2869_v19  ;;  %5426 = vmatprep.subr.mxu1 %v2909_v20  ;;  %v2960_v18 = vld [vmem:[%s8421_s5 + $0x370] sm:$0xff]  ;;  %v2935_v19 = vld [vmem:[%s8421_s5 + $0x2a8] sm:$0xff] }
 0x371   : > { %5405 = vmatpush3.msra.mxu0 %v2853_v21  ;;  %5427 = vmatpush3.msra.mxu1 %v2893_v22  ;;  %v2975_v20 = vld [vmem:[%s8421_s5 + $0x3e8] sm:$0xff] }
 0x372   : > { %5406 = vmatprep.subr.mxu0 %v2868_v23  ;;  %5428 = vmatprep.subr.mxu1 %v2908_v24  ;;  %v2919_v21 = vld [vmem:[%s8421_s5 + $0x228] sm:$0xff]  ;;  %v2934_v23 = vld [vmem:[%s8421_s5 + $0x2a0] sm:$0xff] }
 0x373   : > { %5407 = vmatpush3.msra.mxu0 %v2852_v25  ;;  %5429 = vmatpush3.msra.mxu1 %v2892_v26  ;;  %v2959_v22 = vld [vmem:[%s8421_s5 + $0x368] sm:$0xff]  ;;  %v2974_v24 = vld [vmem:[%s8421_s5 + $0x3e0] sm:$0xff] }
 0x374   : > { %5408 = vmatprep.subr.mxu0 %v2867_v27  ;;  %5430 = vmatprep.subr.mxu1 %v2907_v28  ;;  %v2918_v25 = vld [vmem:[%s8421_s5 + $0x220] sm:$0xff]  ;;  %v2933_v27 = vld [vmem:[%s8421_s5 + $0x298] sm:$0xff] }
 0x375   : > { %5409 = vmatpush3.msra.mxu0 %v2851_v29  ;;  %5431 = vmatpush3.msra.mxu1 %v2891_v30  ;;  %v2958_v26 = vld [vmem:[%s8421_s5 + $0x360] sm:$0xff]  ;;  %v2973_v28 = vld [vmem:[%s8421_s5 + $0x3d8] sm:$0xff] }
 0x376   : > { %5410 = vmatprep.subr.mxu0 %v2866_v31  ;;  %5432 = vmatprep.subr.mxu1 %v2906_v32  ;;  %v2917_v29 = vld [vmem:[%s8421_s5 + $0x218] sm:$0xff]  ;;  %v2932_v31 = vld [vmem:[%s8421_s5 + $0x290] sm:$0xff] }
 0x377   : > { %5411 = vmatpush3.msra.mxu0 %v2850_v33  ;;  %5433 = vmatpush3.msra.mxu1 %v2890_v39  ;;  %v2957_v30 = vld [vmem:[%s8421_s5 + $0x358] sm:$0xff]  ;;  %v2972_v32 = vld [vmem:[%s8421_s5 + $0x3d0] sm:$0xff] }
 0x378   : > { %5434 = vmatprep.subr.mxu1 %v2905_v40  ;;  %5456 = vmatprep.subr.mxu0 %v2945_v41  ;;  %v2916_v33 = vld [vmem:[%s8421_s5 + $0x210] sm:$0xff]  ;;  %v2931_v40 = vld [vmem:[%s8421_s5 + $0x288] sm:$0xff] }
 0x379   : > { %5435 = vmatpush3.msra.mxu1 %v2889_v42  ;;  %v2956_v39 = vld [vmem:[%s8421_s5 + $0x350] sm:$0xff]  ;;  %v2971_v41 = vld [vmem:[%s8421_s5 + $0x3c8] sm:$0xff] }
 0x37a   : > { %5436 = vmatprep.subr.mxu1 %v2904_v43  ;;  %v2915_v42 = vld [vmem:[%s8421_s5 + $0x208] sm:$0xff] }
 0x37b   : > { %5437 = vmatpush3.msra.mxu1 %v2888_v44  ;;  %v2955_v43 = vld [vmem:[%s8421_s5 + $0x348] sm:$0xff]  ;;  %v2930_v44 = vld [vmem:[%s8421_s5 + $0x280] sm:$0xff] }
 0x37c   : > { %5438 = vmatprep.subr.mxu1 %v2903_v45  ;;  %v2970_v45 = vld [vmem:[%s8421_s5 + $0x3c0] sm:$0xff] }
 0x37d   : > { %5439 = vmatpush3.msra.mxu1 %v2887_v46  ;;  %v2914_v46 = vld [vmem:[%s8421_s5 + $0x200] sm:$0xff] }
 0x37e   : > { %5440 = vmatprep.subr.mxu1 %v2902_v47  ;;  %v2954_v47 = vld [vmem:[%s8421_s5 + $0x340] sm:$0xff] }
 0x37f   : > { %5441 = vmatpush3.msra.mxu1 %v2886_v48  ;;  %v2993_v48 = vld [vmem:[%s8421_s5 + $0x478] sm:$0xff] }
 0x380   : > { %5442 = vmatprep.subr.mxu1 %v2901_v49 }
 0x381   : > { %5443 = vmatpush3.msra.mxu1 %v2885_v50  ;;  %v2969_v50 = vld [vmem:[%s8421_s5 + $0x3b8] sm:$0xff] }
 0x382   : > { %5444 = vmatprep.subr.mxu1 %v2900_v51 }
 0x383   : > { %5445 = vmatpush3.msra.mxu1 %v2884_v52  ;;  %v2953_v52 = vld [vmem:[%s8421_s5 + $0x338] sm:$0xff] }
 0x384   : > { %5446 = vmatprep.subr.mxu1 %v2899_v53 }
 0x385   : > { %5447 = vmatpush3.msra.mxu1 %v2883_v54  ;;  %v2968_v54 = vld [vmem:[%s8421_s5 + $0x3b0] sm:$0xff] }
 0x386   : > { %5448 = vmatprep.subr.mxu1 %v2898_v55 }
 0x387   : > { %5449 = vmatpush3.msra.mxu1 %v2882_v56  ;;  %v2992_v56 = vld [vmem:[%s8421_s5 + $0x470] sm:$0xff] }
 0x388   : > { %5494 = vmatprep.subr.mxu1 %v2977_v57  ;;  %v2952_v57 = vld [vmem:[%s8421_s5 + $0x330] sm:$0xff] }
 0x3e1   : > { %v5715_v58 = vpop.f32.mrf.mxu0  ;;  %v5696_v59 = vpop.f32.mrf.mxu1 }
 0x3e3   : > { %v2219_v60 = vpop.f32.mrf.mxu0  ;;  %v2133_v61 = vpop.f32.mrf.mxu1 }
 0x3e4   : > { %3065 = vmatprep.mubr.f32.mxu0 %v2219_v60  ;;  %v2951_v60 = vld [vmem:[%s8421_s5 + $0x328] sm:$0xff] }
 0x3e5   : > { %3066 = vmatmul.mubr.f32.vlgmr.msra.gmra.mxu0 %v2133_v61  ;;  %v2966_v61 = vld [vmem:[%s8421_s5 + $0x3a0] sm:$0xff] }
 0x3e6   : > { %5457 = vmatpush3.msra.mxu0 %v2929_v62  ;;  %3070 = vmatprep.mubr.f32.mxu0 %v5715_v58  ;;  %v2967_v58 = vld [vmem:[%s8421_s5 + $0x3a8] sm:$0xff]  ;;  %v2990_v62 = vld [vmem:[%s8421_s5 + $0x460] sm:$0xff] }
 0x3e7   : > { %5458 = vmatprep.subr.mxu0 %v2944_v63  ;;  %v2950_v63 = vld [vmem:[%s8421_s5 + $0x320] sm:$0xff] }
 0x3e8   : > { %5459 = vmatpush3.msra.mxu0 %v2928_v0  ;;  %v2965_v0 = vld [vmem:[%s8421_s5 + $0x398] sm:$0xff] }
 0x3e9   : > { %5460 = vmatprep.subr.mxu0 %v2943_v1  ;;  %3071 = vmatmul.mubr.f32.gmra.mxu0 %v5696_v59  ;;  %v2991_v59 = vld [vmem:[%s8421_s5 + $0x468] sm:$0xff]  ;;  %v2989_v1 = vld [vmem:[%s8421_s5 + $0x458] sm:$0xff] }
 0x3ea   : > { %5461 = vmatpush3.msra.mxu0 %v2927_v34  ;;  %v2949_v34 = vld [vmem:[%s8421_s5 + $0x318] sm:$0xff] }
 0x3eb   : > { %5462 = vmatprep.subr.mxu0 %v2942_v35  ;;  %v2964_v35 = vld [vmem:[%s8421_s5 + $0x390] sm:$0xff] }
 0x3ec   : > { %5463 = vmatpush3.msra.mxu0 %v2926_v2  ;;  %v2988_v2 = vld [vmem:[%s8421_s5 + $0x450] sm:$0xff] }
 0x3ed   : > { %5464 = vmatprep.subr.mxu0 %v2941_v36  ;;  %v2948_v36 = vld [vmem:[%s8421_s5 + $0x310] sm:$0xff] }
 0x3ee   : > { %5465 = vmatpush3.msra.mxu0 %v2925_v3  ;;  %v2963_v3 = vld [vmem:[%s8421_s5 + $0x388] sm:$0xff] }
 0x3ef   : > { %5466 = vmatprep.subr.mxu0 %v2940_v4  ;;  %v2987_v4 = vld [vmem:[%s8421_s5 + $0x448] sm:$0xff] }
 0x3f0   : > { %5467 = vmatpush3.msra.mxu0 %v2924_v37  ;;  %v2947_v37 = vld [vmem:[%s8421_s5 + $0x308] sm:$0xff] }
 0x3f1   : > { %5468 = vmatprep.subr.mxu0 %v2939_v5  ;;  %v2962_v5 = vld [vmem:[%s8421_s5 + $0x380] sm:$0xff] }
 0x3f2   : > { %v5753_v8 = vpop.f32.mrf.mxu0  ;;  %5469 = vmatpush3.msra.mxu0 %v2923_v38  ;;  %v2986_v38 = vld [vmem:[%s8421_s5 + $0x440] sm:$0xff] }
 0x3f3   : > { %v5734_v10 = vpop.f32.mrf.mxu1  ;;  %5470 = vmatprep.subr.mxu0 %v2938_v6  ;;  %v2946_v6 = vld [vmem:[%s8421_s5 + $0x300] sm:$0xff] }
 0x3f4   : > { %v2391_v12 = vpop.f32.mrf.mxu0  ;;  %5471 = vmatpush3.msra.mxu0 %v2922_v7 }
 0x3f5   : > { %v2305_v15 = vpop.f32.mrf.mxu1  ;;  %3140 = vmatprep.mubr.f32.mxu1 %v2391_v12  ;;  %5472 = vmatprep.subr.mxu0 %v2937_v9 }
 0x3f6   : > { %3141 = vmatmul.mubr.f32.vlgmr.msra.gmra.mxu1 %v2305_v15  ;;  %5473 = vmatpush3.msra.mxu0 %v2921_v11  ;;  %v2984_v11 = vld [vmem:[%s8421_s5 + $0x430] sm:$0xff]  ;;  %v2981_v15 = vld [vmem:[%s8421_s5 + $0x418] sm:$0xff] }
 0x3f7   : > { %5495 = vmatpush3.msra.mxu1 %v2961_v13  ;;  %5474 = vmatprep.subr.mxu0 %v2936_v14  ;;  %v2983_v13 = vld [vmem:[%s8421_s5 + $0x428] sm:$0xff]  ;;  %v2982_v14 = vld [vmem:[%s8421_s5 + $0x420] sm:$0xff] }
 0x3f8   : > { %5496 = vmatprep.subr.mxu1 %v2976_v16  ;;  %3145 = vmatprep.mubr.f32.mxu1 %v5753_v8  ;;  %v2985_v8 = vld [vmem:[%s8421_s5 + $0x438] sm:$0xff]  ;;  %v2980_v16 = vld [vmem:[%s8421_s5 + $0x410] sm:$0xff] }
 0x3f9   : > { %5475 = vmatpush3.msra.mxu0 %v2920_v17  ;;  %5497 = vmatpush3.msra.mxu1 %v2960_v18  ;;  %v2979_v17 = vld [vmem:[%s8421_s5 + $0x408] sm:$0xff]  ;;  %v2978_v18 = vld [vmem:[%s8421_s5 + $0x400] sm:$0xff] }
 0x3fa   : > { %3146 = vmatmul.mubr.f32.gmra.mxu1 %v5734_v10  ;;  %5476 = vmatprep.subr.mxu0 %v2935_v19 }
 0x3fb   : > { %5498 = vmatprep.subr.mxu1 %v2975_v20  ;;  %5477 = vmatpush3.msra.mxu0 %v2919_v21  ;;  %v6155_v21 = vmov 0.0  }
 0x3fc   : > { %5499 = vmatpush3.msra.mxu1 %v2959_v22  ;;  %5478 = vmatprep.subr.mxu0 %v2934_v23 }
 0x3fd   : > { %5500 = vmatprep.subr.mxu1 %v2974_v24  ;;  %5479 = vmatpush3.msra.mxu0 %v2918_v25 }
 0x3fe   : > { %5501 = vmatpush3.msra.mxu1 %v2958_v26  ;;  %5480 = vmatprep.subr.mxu0 %v2933_v27 }
 0x3ff   : > { %5502 = vmatprep.subr.mxu1 %v2973_v28  ;;  %5481 = vmatpush3.msra.mxu0 %v2917_v29 }
 0x400   : > { %5503 = vmatpush3.msra.mxu1 %v2957_v30  ;;  %5482 = vmatprep.subr.mxu0 %v2932_v31 }
 0x401   : > { %5504 = vmatprep.subr.mxu1 %v2972_v32  ;;  %5483 = vmatpush3.msra.mxu0 %v2916_v33 }
 0x402   : > { %5505 = vmatpush3.msra.mxu1 %v2956_v39  ;;  %5484 = vmatprep.subr.mxu0 %v2931_v40 }
 0x403   : > { %5506 = vmatprep.subr.mxu1 %v2971_v41  ;;  %5485 = vmatpush3.msra.mxu0 %v2915_v42 }
 0x404   : > { %v5791_v49 = vpop.f32.mrf.mxu0  ;;  %5507 = vmatpush3.msra.mxu1 %v2955_v43  ;;  %5486 = vmatprep.subr.mxu0 %v2930_v44 }
 0x405   : > { %v5772_v51 = vpop.f32.mrf.mxu1  ;;  %5508 = vmatprep.subr.mxu1 %v2970_v45  ;;  %5487 = vmatpush3.msra.mxu0 %v2914_v46  ;;  %v4740_v45 = vld [vmem:[%s8397_s6] ss:$0 sm:$0xff] }
 0x406   : > { %v2563_v53 = vpop.f32.mrf.mxu0  ;;  %5509 = vmatpush3.msra.mxu1 %v2954_v47  ;;  %5849 = vmatprep.subr.mxu0 %v2993_v48 }
 0x407   : > { %v2477_v55 = vpop.f32.mrf.mxu1  ;;  %3215 = vmatprep.mubr.f32.mxu0 %v2563_v53  ;;  %5510 = vmatprep.subr.mxu1 %v2969_v50 }
 0x408   : > { %3216 = vmatmul.mubr.f32.vlgmr.msra.gmra.mxu0 %v2477_v55  ;;  %5511 = vmatpush3.msra.mxu1 %v2953_v52 }
 0x409   : > { %5850 = vmatpush3.msra.mxu0 %v2993_v48  ;;  %5512 = vmatprep.subr.mxu1 %v2968_v54 }
 0x40a   : > { %5851 = vmatprep.subr.mxu0 %v2992_v56  ;;  %3220 = vmatprep.mubr.f32.mxu0 %v5791_v49 }
 0x40b   : > { %5513 = vmatpush3.msra.mxu1 %v2952_v57  ;;  %5852 = vmatpush3.msra.mxu0 %v2992_v56 }
 0x40c   : > { %3221 = vmatmul.mubr.f32.gmra.mxu0 %v5772_v51  ;;  %5514 = vmatprep.subr.mxu1 %v2967_v58 }
 0x40d   : > { %5853 = vmatprep.subr.mxu0 %v2991_v59  ;;  %5515 = vmatpush3.msra.mxu1 %v2951_v60 }
 0x40e   : > { %5854 = vmatpush3.msra.mxu0 %v2991_v59  ;;  %5516 = vmatprep.subr.mxu1 %v2966_v61 }
 0x40f   : > { %5855 = vmatprep.subr.mxu0 %v2990_v62  ;;  %5517 = vmatpush3.msra.mxu1 %v2950_v63 }
 0x410   : > { %5856 = vmatpush3.msra.mxu0 %v2990_v62  ;;  %5518 = vmatprep.subr.mxu1 %v2965_v0  ;;  %v3378_v0 = vld [vmem:[%s8398_s7] sm:$0xf] }
 0x411   : > { %5857 = vmatprep.subr.mxu0 %v2989_v1  ;;  %5519 = vmatpush3.msra.mxu1 %v2949_v34  ;;  %v4744_v34 = vld [vmem:[%s8398_s7 + $0x8] sm:$0xf] }
 0x412   : > { %5858 = vmatpush3.msra.mxu0 %v2989_v1  ;;  %5520 = vmatprep.subr.mxu1 %v2964_v35  ;;  %v4742_v1 = vld [vmem:[%s8398_s7 + $0x4] sm:$0xf]  ;;  %v4746_v35 = vld [vmem:[%s8398_s7 + $0xc] sm:$0xf] }
 0x413   : > { %5859 = vmatprep.subr.mxu0 %v2988_v2  ;;  %5521 = vmatpush3.msra.mxu1 %v2948_v36  ;;  %v4750_v36 = vld [vmem:[%s8398_s7 + $0x14] sm:$0xf] }
 0x414   : > { %5860 = vmatpush3.msra.mxu0 %v2988_v2  ;;  %5522 = vmatprep.subr.mxu1 %v2963_v3  ;;  %v4748_v2 = vld [vmem:[%s8398_s7 + $0x10] sm:$0xf]  ;;  %v4752_v3 = vld [vmem:[%s8398_s7 + $0x18] sm:$0xf] }
 0x415   : > { %5861 = vmatprep.subr.mxu0 %v2987_v4  ;;  %5523 = vmatpush3.msra.mxu1 %v2947_v37  ;;  %v4756_v37 = vld [vmem:[%s8398_s7 + $0x20] sm:$0xf] }
 0x416   : > { %v5829_v7 = vpop.f32.mrf.mxu0  ;;  %5862 = vmatpush3.msra.mxu0 %v2987_v4  ;;  %5524 = vmatprep.subr.mxu1 %v2962_v5  ;;  %v4754_v4 = vld [vmem:[%s8398_s7 + $0x1c] sm:$0xf] }
 0x417   : > { %v5810_v9 = vpop.f32.mrf.mxu1  ;;  %5863 = vmatprep.subr.mxu0 %v2986_v38  ;;  %5525 = vmatpush3.msra.mxu1 %v2946_v6  ;;  %v4114_v5 = vld [vmem:[%s8399_s8 + $0xf8] sm:$0xff]  ;;  %v4113_v6 = vld [vmem:[%s8399_s8 + $0xf0] sm:$0xff] }
 0x418   : > { %v2735_v10 = vpop.f32.mrf.mxu0  ;;  %5864 = vmatpush3.msra.mxu0 %v2986_v38  ;;  %5884 = vmatprep.subr.mxu1 %v6155_v21  ;;  %v4098_v38 = vld [vmem:[%s8399_s8 + $0x78] sm:$0xff] }
 0x419   : > { %v2649_v12 = vpop.f32.mrf.mxu1  ;;  %3290 = vmatprep.mubr.f32.mxu1 %v2735_v10  ;;  %5865 = vmatprep.subr.mxu0 %v2985_v8  ;;  %v4111_v10 = vld [vmem:[%s8399_s8 + $0xe0] sm:$0xff] }
 0x41a   : > { %3291 = vmatmul.mubr.f32.vlgmr.msra.gmra.mxu1 %v2649_v12  ;;  %5866 = vmatpush3.msra.mxu0 %v2985_v8  ;;  %v4112_v8 = vld [vmem:[%s8399_s8 + $0xe8] sm:$0xff]  ;;  %v4095_v12 = vld [vmem:[%s8399_s8 + $0x60] sm:$0xff] }
 0x41b   : > { %5867 = vmatprep.subr.mxu0 %v2984_v11  ;;  %3295 = vmatprep.mubr.f32.mxu1 %v5829_v7  ;;  %v4097_v7 = vld [vmem:[%s8399_s8 + $0x70] sm:$0xff] }
 0x41c   : > { %5868 = vmatpush3.msra.mxu0 %v2984_v11  ;;  %v4146_v11 = vld [vmem:[%s8399_s8 + $0x1f8] sm:$0xff] }
 0x41d   : > { %5869 = vmatprep.subr.mxu0 %v2983_v13 }
 0x41e   : > { %3296 = vmatmul.mubr.f32.gmra.mxu1 %v5810_v9  ;;  %5870 = vmatpush3.msra.mxu0 %v2983_v13  ;;  %v4096_v9 = vld [vmem:[%s8399_s8 + $0x68] sm:$0xff]  ;;  %v4130_v13 = vld [vmem:[%s8399_s8 + $0x178] sm:$0xff] }
 0x41f   : > { %5871 = vmatprep.subr.mxu0 %v2982_v14  ;;  %5888 = vmatprep.mubr.msk.f32.mxu1 %vm6156_vm12, %v6155_v21 }
 0x420   : > { %5872 = vmatpush3.msra.mxu0 %v2982_v14  ;;  %v4110_v14 = vld [vmem:[%s8399_s8 + $0xd8] sm:$0xff] }
 0x421   : > { %5873 = vmatprep.subr.mxu0 %v2981_v15 }
 0x422   : > { %5874 = vmatpush3.msra.mxu0 %v2981_v15  ;;  %v4145_v15 = vld [vmem:[%s8399_s8 + $0x1f0] sm:$0xff] }
 0x423   : > { %5875 = vmatprep.subr.mxu0 %v2980_v16 }
 0x424   : > { %5876 = vmatpush3.msra.mxu0 %v2980_v16  ;;  %v4129_v16 = vld [vmem:[%s8399_s8 + $0x170] sm:$0xff] }
 0x425   : > { %5877 = vmatprep.subr.mxu0 %v2979_v17 }
 0x426   : > { %5878 = vmatpush3.msra.mxu0 %v2979_v17  ;;  %v4094_v17 = vld [vmem:[%s8399_s8 + $0x58] sm:$0xff] }
 0x427   : > { %v5848_v19 = vpop.f32.mrf.mxu1  ;;  %5879 = vmatprep.subr.mxu0 %v2978_v18 }
 0x428   : > { %5880 = vmatpush3.msra.mxu0 %v2978_v18  ;;  %v4144_v18 = vld [vmem:[%s8399_s8 + $0x1e8] sm:$0xff] }
 0x429   : > { %v2821_v20 = vpop.f32.mrf.mxu1  ;;  %5577 = vmatprep.subr.mxu0 %v4114_v5  ;;  %v4135_v5 = vld [vmem:[%s8399_s8 + $0x1a0] sm:$0xff] }
 0x42a   : > { %5881 = vmatprep.mubr.f32.mxu0 %v2821_v20  ;;  %v4128_v20 = vld [vmem:[%s8399_s8 + $0x168] sm:$0xff] }
 0x42b   : > { %5882 = vmatmul.mubr.f32.vlgmr.msra.gmra.mxu0 %v5848_v19  ;;  %v4109_v19 = vld [vmem:[%s8399_s8 + $0xd0] sm:$0xff] }
 0x42c   : > { %5578 = vmatpush3.msra.mxu0 %v4098_v38  ;;  %v4119_v38 = vld [vmem:[%s8399_s8 + $0x120] sm:$0xff] }
 0x42d   : > { %5579 = vmatprep.subr.mxu0 %v4113_v6  ;;  %v4134_v6 = vld [vmem:[%s8399_s8 + $0x198] sm:$0xff] }
 0x42e   : > { %5580 = vmatpush3.msra.mxu0 %v4097_v7  ;;  %v4118_v7 = vld [vmem:[%s8399_s8 + $0x118] sm:$0xff] }
 0x42f   : > { %5581 = vmatprep.subr.mxu0 %v4112_v8 }
 0x430   : > { %5582 = vmatpush3.msra.mxu0 %v4096_v9  ;;  %v4133_v9 = vld [vmem:[%s8399_s8 + $0x190] sm:$0xff] }
 0x431   : > { %5583 = vmatprep.subr.mxu0 %v4111_v10  ;;  %v4117_v10 = vld [vmem:[%s8399_s8 + $0x110] sm:$0xff] }
 0x432   : > { %5584 = vmatpush3.msra.mxu0 %v4095_v12  ;;  %v4132_v12 = vld [vmem:[%s8399_s8 + $0x188] sm:$0xff] }
 0x433   : > { %5585 = vmatprep.subr.mxu0 %v4110_v14 }
 0x434   : > { %5586 = vmatpush3.msra.mxu0 %v4094_v17 }
 0x435   : > { %5587 = vmatprep.subr.mxu0 %v4109_v19 }
 0x4a5   : > { %v5412_v22 = vpop.f32.mrf.mxu0 }
 0x4a7   : > { %v5413_v23 = vpop.f32.mrf.mxu0 }
 0x4a8   : > { %v5414_v43 = vadd.f32 %v5413_v23, %v5412_v22  ;;  %v4143_v22 = vld [vmem:[%s8399_s8 + $0x1e0] sm:$0xff]  ;;  %v4093_v23 = vld [vmem:[%s8399_s8 + $0x50] sm:$0xff] }
 0x4a9   : > { %v5415_v25 = vpop.f32.mrf.mxu0  ;;  %5588 = vmatpush3.msra.mxu0 %v4093_v23 }
 0x4aa   : > { %v3068_v50 = vadd.f32 %v5414_v43, %v4740_v45  ;;  %v4126_v43 = vld [vmem:[%s8399_s8 + $0x158] sm:$0xff] }
 0x4ab   : > { %v5416_v27 = vpop.f32.mrf.mxu0 }
 0x4ac   : > { %v5417_v41 = vadd.f32 %v5416_v27, %v5415_v25  ;;  %v4108_v25 = vld [vmem:[%s8399_s8 + $0xc8] sm:$0xff]  ;;  %v4107_v27 = vld [vmem:[%s8399_s8 + $0xc0] sm:$0xff] }
 0x4ad   : > { %5589 = vmatprep.subr.mxu0 %v4108_v25 }
 0x4ae   : > { %v3073_v47 = vadd.f32 %v5417_v41, %v4740_v45  ;;  %v4142_v41 = vld [vmem:[%s8399_s8 + $0x1d8] sm:$0xff]  ;;  %v4141_v45 = vld [vmem:[%s8399_s8 + $0x1d0] sm:$0xff] }
 0x4b6   : > { %v5450_v24 = vpop.f32.mrf.mxu1 }
 0x4b8   : > { %v5451_v26 = vpop.f32.mrf.mxu1 }
 0x4b9   : > { %v5452_v48 = vadd.f32 %v5451_v26, %v5450_v24  ;;  %v4127_v24 = vld [vmem:[%s8399_s8 + $0x160] sm:$0xff]  ;;  %v4092_v26 = vld [vmem:[%s8399_s8 + $0x48] sm:$0xff] }
 0x4ba   : > { %v5453_v28 = vpop.f32.mrf.mxu1  ;;  %5590 = vmatpush3.msra.mxu0 %v4092_v26 }
 0x4bb   : > { %v3143_v54 = vadd.f32 %v5452_v48, %v3068_v50  ;;  %5591 = vmatprep.subr.mxu0 %v4107_v27  ;;  %v4125_v48 = vld [vmem:[%s8399_s8 + $0x150] sm:$0xff]  ;;  %v4140_v50 = vld [vmem:[%s8399_s8 + $0x1c8] sm:$0xff] }
 0x4bc   : > { %v5454_v30 = vpop.f32.mrf.mxu1 }
 0x4bd   : > { %v5455_v44 = vadd.f32 %v5454_v30, %v5453_v28  ;;  %v4091_v28 = vld [vmem:[%s8399_s8 + $0x40] sm:$0xff]  ;;  %v4090_v30 = vld [vmem:[%s8399_s8 + $0x38] sm:$0xff] }
 0x4be   : > { %5592 = vmatpush3.msra.mxu0 %v4091_v28 }
 0x4bf   : > { %v3148_v51 = vadd.f32 %v5455_v44, %v3073_v47  ;;  %v4087_v44 = vld [vmem:[%s8399_s8 + $0x20] sm:$0xff] }
 0x4c8   : > { %v5488_v29 = vpop.f32.mrf.mxu0 }
 0x4ca   : > { %v5489_v31 = vpop.f32.mrf.mxu0 }
 0x4cb   : > { %v5490_v52 = vadd.f32 %v5489_v31, %v5488_v29  ;;  %v4106_v29 = vld [vmem:[%s8399_s8 + $0xb8] sm:$0xff]  ;;  %v4105_v31 = vld [vmem:[%s8399_s8 + $0xb0] sm:$0xff] }
 0x4cc   : > { %v5491_v39 = vpop.f32.mrf.mxu0  ;;  %5593 = vmatprep.subr.mxu0 %v4106_v29  ;;  %v4154_v29 = vld [vmem:[%s8399_s8 + $0x238] sm:$0xff] }
 0x4cd   : > { %v3218_v57 = vadd.f32 %v5490_v52, %v3143_v54  ;;  %5594 = vmatpush3.msra.mxu0 %v4090_v30  ;;  %v4124_v52 = vld [vmem:[%s8399_s8 + $0x148] sm:$0xff]  ;;  %v4085_v54 = vld [vmem:[%s8399_s8 + $0x10] sm:$0xff] }
 0x4ce   : > { %v5492_v42 = vpop.f32.mrf.mxu0  ;;  %5595 = vmatprep.subr.mxu0 %v4105_v31  ;;  %v4153_v30 = vld [vmem:[%s8399_s8 + $0x230] sm:$0xff]  ;;  %v4152_v31 = vld [vmem:[%s8399_s8 + $0x228] sm:$0xff] }
 0x4cf   : > { %v5493_v49 = vadd.f32 %v5492_v42, %v5491_v39  ;;  %v4088_v39 = vld [vmem:[%s8399_s8 + $0x28] sm:$0xff]  ;;  %v4103_v42 = vld [vmem:[%s8399_s8 + $0xa0] sm:$0xff] }
 0x4d1   : > { %v3223_v55 = vadd.f32 %v5493_v49, %v3148_v51  ;;  %v4086_v49 = vld [vmem:[%s8399_s8 + $0x18] sm:$0xff]  ;;  %v4101_v51 = vld [vmem:[%s8399_s8 + $0x90] sm:$0xff] }
 0x4da   : > { %v5526_v32 = vpop.f32.mrf.mxu1 }
 0x4dc   : > { %v5527_v33 = vpop.f32.mrf.mxu1 }
 0x4dd   : > { %v5528_v56 = vadd.f32 %v5527_v33, %v5526_v32  ;;  %v4089_v32 = vld [vmem:[%s8399_s8 + $0x30] sm:$0xff]  ;;  %v4104_v33 = vld [vmem:[%s8399_s8 + $0xa8] sm:$0xff] }
 0x4de   : > { %v5529_v40 = vpop.f32.mrf.mxu1  ;;  %5596 = vmatpush3.msra.mxu0 %v4089_v32 }
 0x4df   : > { %v3293_v61 = vadd.f32 %v5528_v56, %v3218_v57  ;;  %5597 = vmatprep.subr.mxu0 %v4104_v33  ;;  %v4100_v56 = vld [vmem:[%s8399_s8 + $0x88] sm:$0xff]  ;;  %v4123_v57 = vld [vmem:[%s8399_s8 + $0x140] sm:$0xff] }
 0x4e0   : > { %v5530_v46 = vpop.f32.mrf.mxu1  ;;  %5598 = vmatpush3.msra.mxu0 %v4088_v39  ;;  %v4151_v33 = vld [vmem:[%s8399_s8 + $0x220] sm:$0xff]  ;;  %v4150_v39 = vld [vmem:[%s8399_s8 + $0x218] sm:$0xff] }
 0x4e1   : > { %v5531_v53 = vadd.f32 %v5530_v46, %v5529_v40  ;;  %5599 = vmatprep.subr.mxu0 %v4103_v42  ;;  %v4102_v46 = vld [vmem:[%s8399_s8 + $0x98] sm:$0xff] }
 0x4e2   : > { %5600 = vmatpush3.msra.mxu0 %v4087_v44 }
 0x4e3   : > { %v3298_v58 = vadd.f32 %v5531_v53, %v3223_v55  ;;  %5601 = vmatprep.subr.mxu0 %v4102_v46  ;;  %v4139_v55 = vld [vmem:[%s8399_s8 + $0x1c0] sm:$0xff] }
 0x4e4   : > { %5602 = vmatpush3.msra.mxu0 %v4086_v49 }
 0x4e5   : > { %5603 = vmatprep.subr.mxu0 %v4101_v51 }
 0x4e6   : > { %5604 = vmatpush3.msra.mxu0 %v4085_v54 }
 0x4e7   : > { %5605 = vmatprep.subr.mxu0 %v4100_v56 }
 0x4eb   : > { %v5883_v59 = vpop.f32.mrf.mxu0 }
 0x4ec   : > { %v3373_v60 = vadd.f32 %v5883_v59, %v3298_v58  ;;  %v4084_v59 = vld [vmem:[%s8399_s8 + $0x8] sm:$0xff] }
 0x4ed   : > { %v3367_v62 = vpop.f32.mrf.mxu0  ;;  %5606 = vmatpush3.msra.mxu0 %v4084_v59 }
 0x4ee   : > { %v7955_v63 = vadd.f32 %v3367_v62, %v3293_v61  ;;  %5885 = vmatpush3.msra.mxu1 %v3373_v60  ;;  %3377 = vst.msk [vmem:[%s7960_s19 + $0x8] sm:$0xff] %vm2060_vm11, %v3373_v60  ;;  %v4099_v61 = vld [vmem:[%s8399_s8 + $0x80] sm:$0xff]  ;;  %v4122_v62 = vld [vmem:[%s8399_s8 + $0x138] sm:$0xff] }
 0x4ef   : > { %5886 = vmatprep.subr.mxu1 %v6155_v21  ;;  %5607 = vmatprep.subr.mxu0 %v4099_v61 }
 0x4f0   : > { %5887 = vmatpush3.msra.mxu1 %v7955_v63  ;;  %3376 = vst.msk [vmem:[%s7960_s19] sm:$0xff] %vm2060_vm11, %v7955_v63 }
 0x4f1   : > { %5889 = vmatmul.mubr.msk.f32.vlgmr.msra.gmra.mxu1 %vm3379_vm13, %v3378_v0  ;;  %5891 = vmatprep.subr.mxu1 %v6155_v21  ;;  %v4083_v0 = vld [vmem:[%s8399_s8] sm:$0xff] }
 0x4f2   : > { %5892 = vmatpush3.msra.mxu1 %v3373_v60  ;;  %5895 = vmatprep.mubr.msk.f32.mxu1 %vm6156_vm12, %v6155_v21 }
 0x4f3   : > { %5893 = vmatprep.subr.mxu1 %v6155_v21  ;;  %5608 = vmatpush3.msra.mxu0 %v4083_v0 }
 0x4f4   : > { %5894 = vmatpush3.msra.mxu1 %v7955_v63  ;;  %5947 = vmatprep.subr.mxu0 %v6155_v21 }
 0x4f5   : > { %5896 = vmatmul.mubr.msk.f32.vlgmr.msra.gmra.mxu1 %vm3379_vm13, %v4742_v1  ;;  %5898 = vmatprep.subr.mxu1 %v6155_v21 }
 0x4f6   : > { %5899 = vmatpush3.msra.mxu1 %v3373_v60  ;;  %5902 = vmatprep.mubr.msk.f32.mxu1 %vm6156_vm12, %v6155_v21 }
 0x4f7   : > { %5900 = vmatprep.subr.mxu1 %v6155_v21 }
 0x4f8   : > { %5901 = vmatpush3.msra.mxu1 %v7955_v63 }
 0x4f9   : > { %5903 = vmatmul.mubr.msk.f32.vlgmr.msra.gmra.mxu1 %vm3379_vm13, %v4744_v34  ;;  %5905 = vmatprep.subr.mxu1 %v6155_v21  ;;  %v4137_v34 = vld [vmem:[%s8399_s8 + $0x1b0] sm:$0xff] }
 0x4fa   : > { %5906 = vmatpush3.msra.mxu1 %v3373_v60  ;;  %5909 = vmatprep.mubr.msk.f32.mxu1 %vm6156_vm12, %v6155_v21 }
 0x4fb   : > { %5907 = vmatprep.subr.mxu1 %v6155_v21 }
 0x4fc   : > { %5908 = vmatpush3.msra.mxu1 %v7955_v63 }
 0x4fd   : > { %5910 = vmatmul.mubr.msk.f32.vlgmr.msra.gmra.mxu1 %vm3379_vm13, %v4746_v35  ;;  %5912 = vmatprep.subr.mxu1 %v6155_v21  ;;  %v4121_v35 = vld [vmem:[%s8399_s8 + $0x130] sm:$0xff] }
 0x4fe   : > { %5913 = vmatpush3.msra.mxu1 %v3373_v60  ;;  %5916 = vmatprep.mubr.msk.f32.mxu1 %vm6156_vm12, %v6155_v21 }
 0x4ff   : > { %5914 = vmatprep.subr.mxu1 %v6155_v21 }
 0x500   : > { %5915 = vmatpush3.msra.mxu1 %v7955_v63 }
 0x501   : > { %5917 = vmatmul.mubr.msk.f32.vlgmr.msra.gmra.mxu1 %vm3379_vm13, %v4748_v2  ;;  %5919 = vmatprep.subr.mxu1 %v6155_v21  ;;  %v4136_v2 = vld [vmem:[%s8399_s8 + $0x1a8] sm:$0xff] }
 0x502   : > { %5920 = vmatpush3.msra.mxu1 %v3373_v60  ;;  %5923 = vmatprep.mubr.msk.f32.mxu1 %vm6156_vm12, %v6155_v21 }
 0x503   : > { %5921 = vmatprep.subr.mxu1 %v6155_v21 }
 0x504   : > { %5922 = vmatpush3.msra.mxu1 %v7955_v63 }
 0x505   : > { %5924 = vmatmul.mubr.msk.f32.vlgmr.msra.gmra.mxu1 %vm3379_vm13, %v4750_v36  ;;  %5926 = vmatprep.subr.mxu1 %v6155_v21 }
 0x506   : > { %5927 = vmatpush3.msra.mxu1 %v3373_v60  ;;  %5930 = vmatprep.mubr.msk.f32.mxu1 %vm6156_vm12, %v6155_v21 }
 0x507   : > { %5928 = vmatprep.subr.mxu1 %v6155_v21 }
 0x508   : > { %5929 = vmatpush3.msra.mxu1 %v7955_v63 }
 0x509   : > { %5931 = vmatmul.mubr.msk.f32.vlgmr.msra.gmra.mxu1 %vm3379_vm13, %v4752_v3  ;;  %5933 = vmatprep.subr.mxu1 %v6155_v21 }
 0x50a   : > { %5934 = vmatpush3.msra.mxu1 %v3373_v60  ;;  %5937 = vmatprep.mubr.msk.f32.mxu1 %vm6156_vm12, %v6155_v21 }
 0x50b   : > { %5935 = vmatprep.subr.mxu1 %v6155_v21 }
 0x50c   : > { %5936 = vmatpush3.msra.mxu1 %v7955_v63 }
 0x50d   : > { %5938 = vmatmul.mubr.msk.f32.vlgmr.msra.gmra.mxu1 %vm3379_vm13, %v4754_v4  ;;  %5940 = vmatprep.subr.mxu1 %v6155_v21  ;;  %v4120_v4 = vld [vmem:[%s8399_s8 + $0x128] sm:$0xff] }
 0x50e   : > { %5941 = vmatpush3.msra.mxu1 %v3373_v60  ;;  %5944 = vmatprep.mubr.msk.f32.mxu1 %vm6156_vm12, %v6155_v21  ;;  %v4138_v60 = vld [vmem:[%s8399_s8 + $0x1b8] sm:$0xff] }
 0x50f   : > { %5942 = vmatprep.subr.mxu1 %v6155_v21 }
 0x510   : > { %5943 = vmatpush3.msra.mxu1 %v7955_v63 }
 0x511   : > { %5945 = vmatmul.mubr.msk.f32.vlgmr.msra.gmra.mxu1 %vm3379_vm13, %v4756_v37  ;;  %5612 = vmatprep.subr.mxu1 %v4146_v11 }
 0x512   : > { %5613 = vmatpush3.msra.mxu1 %v4130_v13  ;;  %v4116_v13 = vld [vmem:[%s8399_s8 + $0x108] sm:$0xff] }
 0x513   : > { %5614 = vmatprep.subr.mxu1 %v4145_v15  ;;  %v4131_v15 = vld [vmem:[%s8399_s8 + $0x180] sm:$0xff] }
 0x514   : > { %5615 = vmatpush3.msra.mxu1 %v4129_v16  ;;  %v4115_v16 = vld [vmem:[%s8399_s8 + $0x100] sm:$0xff] }
 0x515   : > { %5616 = vmatprep.subr.mxu1 %v4144_v18 }
 0x516   : > { %5617 = vmatpush3.msra.mxu1 %v4128_v20 }
 0x517   : > { %5618 = vmatprep.subr.mxu1 %v4143_v22 }
 0x518   : > { %5619 = vmatpush3.msra.mxu1 %v4127_v24 }
 0x519   : > { %5620 = vmatprep.subr.mxu1 %v4142_v41  ;;  %v4148_v41 = vld [vmem:[%s8399_s8 + $0x208] sm:$0xff] }
 0x51a   : > { %5621 = vmatpush3.msra.mxu1 %v4126_v43  ;;  %v4147_v43 = vld [vmem:[%s8399_s8 + $0x200] sm:$0xff] }
 0x51b   : > { %5622 = vmatprep.subr.mxu1 %v4141_v45 }
 0x51c   : > { %5623 = vmatpush3.msra.mxu1 %v4125_v48 }
 0x51d   : > { %5624 = vmatprep.subr.mxu1 %v4140_v50 }
 0x51e   : > { %5625 = vmatpush3.msra.mxu1 %v4124_v52 }
 0x51f   : > { %5626 = vmatprep.subr.mxu1 %v4139_v55 }
 0x520   : > { %5627 = vmatpush3.msra.mxu1 %v4123_v57 }
 0x521   : > { %5628 = vmatprep.subr.mxu1 %v4138_v60 }
 0x522   : > { %5629 = vmatpush3.msra.mxu1 %v4122_v62 }
 0x523   : > { %5630 = vmatprep.subr.mxu1 %v4137_v34 }
 0x524   : > { %5631 = vmatpush3.msra.mxu1 %v4121_v35 }
 0x525   : > { %5632 = vmatprep.subr.mxu1 %v4136_v2 }
 0x526   : > { %5633 = vmatpush3.msra.mxu1 %v4120_v4 }
 0x527   : > { %5634 = vmatprep.subr.mxu1 %v4135_v5 }
 0x528   : > { %5635 = vmatpush3.msra.mxu1 %v4119_v38 }
 0x529   : > { %5636 = vmatprep.subr.mxu1 %v4134_v6 }
 0x52a   : > { %5637 = vmatpush3.msra.mxu1 %v4118_v7 }
 0x52b   : > { %5638 = vmatprep.subr.mxu1 %v4133_v9 }
 0x52c   : > { %5639 = vmatpush3.msra.mxu1 %v4117_v10 }
 0x52d   : > { %5640 = vmatprep.subr.mxu1 %v4132_v12 }
 0x52e   : > { %5641 = vmatpush3.msra.mxu1 %v4116_v13 }
 0x52f   : > { %5642 = vmatprep.subr.mxu1 %v4131_v15 }
 0x530   : > { %5643 = vmatpush3.msra.mxu1 %v4115_v16 }
 0x5b1   : > { %v3449_v40 = vpop.f32.mrf.mxu1 }
 0x5b2   : > { %3454 = vst.msk [vmem:[#allocation4] sm:$0xf] %vm3453_vm14, %v3449_v40  ;;  %v4149_v40 = vld [vmem:[%s8399_s8 + $0x210] sm:$0xff] }
 0x5b3   : > { %v5890_v47 = vpop.f32.mrf.mxu1 }
 0x5b5   : > { %v3526_v53 = vpop.f32.mrf.mxu1 }
 0x5b6   : > { %3531 = vrot.lane.b32.xlu0 %v3526_v53, %s6157_s2 }
 0x5b7   : > { %v5897_v58 = vpop.f32.mrf.mxu1 }
 0x5b9   : > { %v3607_v63 = vpop.f32.mrf.mxu1 }
 0x5ba   : > { %3611 = vst.msk [vmem:[#allocation4 + $0x4] sm:$0xf] %vm3453_vm14, %v3607_v63 }
 0x5bb   : > { %v5904_v1 = vpop.f32.mrf.mxu1 }
 0x5bd   : > { %v3683_v36 = vpop.f32.mrf.mxu1 }
 0x5be   : > { %3688 = vrot.lane.b32.xlu1 %v3683_v36, %s6157_s2 }
 0x5bf   : > { %v5911_v3 = vpop.f32.mrf.mxu1 }
 0x5c1   : > { %v3763_v37 = vpop.f32.mrf.mxu1 }
 0x5c2   : > { %3767 = vst.msk [vmem:[#allocation4 + $0x8] sm:$0xf] %vm3453_vm14, %v3763_v37 }
 0x5c3   : > { %v5918_v8 = vpop.f32.mrf.mxu1 }
 0x5c5   : > { %v3839_v11 = vpop.f32.mrf.mxu1 }
 0x5c6   : > { %3844 = vrot.lane.b32.xlu0 %v3839_v11, %s6157_s2 }
 0x5c7   : > { %v5925_v14 = vpop.f32.mrf.mxu1 }
 0x5c9   : > { %v3919_v17 = vpop.f32.mrf.mxu1 }
 0x5ca   : > { %3923 = vst.msk [vmem:[#allocation4 + $0xc] sm:$0xf] %vm3453_vm14, %v3919_v17 }
 0x5cb   : > { %v5932_v18 = vpop.f32.mrf.mxu1 }
 0x5cd   : > { %v3995_v19 = vpop.f32.mrf.mxu1 }
 0x5ce   : > { %4000 = vrot.lane.b32.xlu1 %v3995_v19, %s6157_s2  ;;  %s4423_s2 = sshll.u32 %s7960_s19, 4  ;;  %s6033_s19 = sshll.u32 %s6158_s29, 4  ;;  %s8294_s2 = int_to_ptr.vmem [resolvable:$true] %s4423_s2  ;;  %s6034_s19 = int_to_ptr.vmem [resolvable:$false] %s6033_s19 }
 0x5cf   : > { %v5939_v20 = vpop.f32.mrf.mxu1  ;;  %s6029_s5 = scalar_lea.vmem %s8294_s2, 256  ;;  %s6035_s1 = scalar_lea.vmem %s6034_s19, 512 }
 0x5d0   : > { %p6030_p11 = scmp.ne.s32.totalorder %s8294_s2, %s6029_s5  ;;  %p6036_p0 = scmp.lt.s32.totalorder %s8294_s2, %s6034_s19 }
 0x5d1   : > { %v4075_v22 = vpop.f32.mrf.mxu1  ;;  %p6037_p1 = scmp.lt.s32.totalorder %s6035_s1, %s6029_s5 }
 0x5d2   : > { %4079 = vst.msk [vmem:[#allocation4 + $0x10] sm:$0xf] %vm3453_vm14, %v4075_v22  ;;  %p6031_p12 = pnand %p6030_p11, %p6267_p5 }
 0x5d3   : > { %v5946_v23 = vpop.f32.mrf.mxu1  ;;  %p6038_p2 = por %p6037_p1, %p6036_p0 }
 0x5d4   : > { %p6032_p13 = pneg %p6031_p12 }
 0x5d6   : > { %p6039_p3 = pnand %p6038_p2, %p6032_p13 }
 0x5d9   : > { %v4082_v45 = vld [vmem:[#allocation4 + $0x10] sm:$0xf] }
 0x628   : > { %v3532_v24 = vpop.permute.xlu0 %3531 }
 0x629   : > { %3535 = vst.msk [vmem:[#allocation4] sm:$0xf] %vm3534_vm15, %v3532_v24 }
 0x630   : > { %v3689_v25 = vpop.permute.xlu1 %3688 }
 0x631   : > { %3691 = vst.msk [vmem:[#allocation4 + $0x4] sm:$0xf] %vm3534_vm15, %v3689_v25 }
 0x638   : > { %v4080_v26 = vld [vmem:[#allocation4] sm:$0xff]  ;;  %v3845_v27 = vpop.permute.xlu0 %3844 }
 0x639   : > { %v4165_v28 = vcombine.high %v4080_v26, %v4080_v26  ;;  %3847 = vst.msk [vmem:[#allocation4 + $0x8] sm:$0xf] %vm3534_vm15, %v3845_v27 }
 0x63b   : > { %4235 = vmatprep.mubr.f32.mxu0 %v4165_v28 }
 0x63c   : > { %4236 = vmatmul.mubr.f32.vlgmr.msra.gmra.mxu0 %v4080_v26 }
 0x63d   : > { %5948 = vmatpush3.msra.mxu0 %v4154_v29  ;;  %5963 = vmatprep.mubr.msk.f32.mxu0 %vm6156_vm12, %v6155_v21 }
 0x63e   : > { %5949 = vmatprep.subr.mxu0 %v6155_v21 }
 0x63f   : > { %5950 = vmatpush3.msra.mxu0 %v4153_v30 }
 0x640   : > { %v4001_v32 = vpop.permute.xlu1 %4000  ;;  %5951 = vmatprep.subr.mxu0 %v6155_v21 }
 0x641   : > { %4003 = vst.msk [vmem:[#allocation4 + $0xc] sm:$0xf] %vm3534_vm15, %v4001_v32  ;;  %5952 = vmatpush3.msra.mxu0 %v4152_v31 }
 0x642   : > { %5953 = vmatprep.subr.mxu0 %v6155_v21 }
 0x643   : > { %5954 = vmatpush3.msra.mxu0 %v4151_v33 }
 0x644   : > { %5955 = vmatprep.subr.mxu0 %v6155_v21 }
 0x645   : > { %5956 = vmatpush3.msra.mxu0 %v4150_v39 }
 0x646   : > { %5957 = vmatprep.subr.mxu0 %v6155_v21 }
 0x647   : > { %5958 = vmatpush3.msra.mxu0 %v4149_v40 }
 0x648   : > { %v4081_v42 = vld [vmem:[#allocation4 + $0x8] sm:$0xff]  ;;  %5959 = vmatprep.subr.mxu0 %v6155_v21 }
 0x649   : > { %v4166_v44 = vcombine.high %v4081_v42, %v4081_v42  ;;  %5960 = vmatpush3.msra.mxu0 %v4148_v41 }
 0x64a   : > { %5961 = vmatprep.subr.mxu0 %v6155_v21 }
 0x64b   : > { %4305 = vmatprep.mubr.f32.mxu1 %v4166_v44  ;;  %5962 = vmatpush3.msra.mxu0 %v4147_v43 }
 0x64c   : > { %4306 = vmatmul.mubr.f32.vlgmr.msra.gmra.mxu1 %v4081_v42  ;;  %5964 = vmatmul.mubr.msk.f32.vlgmr.msra.gmra.mxu0 %vm2060_vm11, %v4082_v45 }
 0x64d   : > { %6042 = shalt.err (!%p6039_p3)
}
 0x64e   : > { %s6043_s28 = scalar_lea.hbm %s8290_s15, 256  ;;  %s6047_s17 = scalar_lea.hbm %s8402_s11, 512 }
 0x64f   : > { %p6044_p4 = scmp.ne.s32.totalorder %s8290_s15, %s6043_s28  ;;  %p6048_p9 = scmp.lt.s32.totalorder %s8290_s15, %s8402_s11 }
 0x650   : > { %p6049_p10 = scmp.lt.s32.totalorder %s6047_s17, %s6043_s28 }
 0x651   : > { %p6045_p7 = pnand %p6044_p4, %p6267_p5 }
 0x652   : > { %p6050_p11 = por %p6049_p10, %p6048_p9 }
 0x653   : > { %p6046_p8 = pneg %p6045_p7 }
 0x655   : > { %p6051_p12 = pnand %p6050_p11, %p6046_p8 }
 0x657   : > { %6054 = shalt.err (!%p6051_p12)
}
 0x658   : > { %s8407_s5 = smov 128   ;;  %s8422_s19 = smov 8  }
 0x659   : > { %5967 = dma.vmem_to_hbm [thread:$0]  (%p6267_p5), %s8294_s2, 256, %s8290_s15, %s8301_s18, %s8407_s5, %s8407_s5, %s8422_s19  }
 0x65a   : > { %s4384_s1 = scalar_lea.sflag [#allocation6], %s7268_s20  ;;  %s6055_s28 = scalar_lea.vmem %s8285_s26, 1024 }
 0x65b   : > { %p6056_p13 = scmp.ne.s32.totalorder %s8285_s26, %s6055_s28  ;;  %s6160_s0 = smov [#allocation5]  }
 0x65c   : > { %s6059_s16 = sshll.u32 %s6160_s0, 4  ;;  %s6060_s16 = int_to_ptr.vmem [resolvable:$false] %s6059_s16 }
 0x65d   : > { %p6057_p0 = pnand %p6056_p13, %p6267_p5  ;;  %s6061_s17 = scalar_lea.vmem %s6060_s16, 2048 }
 0x65e   : > { %p6062_p2 = scmp.lt.s32.totalorder %s8285_s26, %s6060_s16  ;;  %p6063_p3 = scmp.lt.s32.totalorder %s6061_s17, %s6055_s28 }
 0x65f   : > { %p6058_p1 = pneg %p6057_p0 }
 0x660   : > { %p6064_p4 = por %p6063_p3, %p6062_p2 }
 0x662   : > { %p6065_p7 = pnand %p6064_p4, %p6058_p1 }
 0x664   : > { %6068 = shalt.err (!%p6065_p7)
}
 0x665   : > { %s6069_s15 = scalar_lea.hbm %s8299_s4, 1024  ;;  %s6073_s29 = scalar_lea.hbm %s8401_s10, 2048 }
 0x666   : > { %p6070_p8 = scmp.ne.s32.totalorder %s8299_s4, %s6069_s15  ;;  %p6074_p11 = scmp.lt.s32.totalorder %s8299_s4, %s8401_s10 }
 0x667   : > { %p6075_p12 = scmp.lt.s32.totalorder %s6073_s29, %s6069_s15 }
 0x668   : > { %p6071_p9 = pnand %p6070_p8, %p6267_p5 }
 0x669   : > { %p6076_p13 = por %p6075_p12, %p6074_p11 }
 0x66a   : > { %p6072_p10 = pneg %p6071_p9 }
 0x66c   : > { %p6077_p0 = pnand %p6076_p13, %p6072_p10 }
 0x66e   : > { %6080 = shalt.err (!%p6077_p0)
}
 0x66f   : > { %s8423_s28 = smov 128   ;;  %s4565_s16 = sshll.u32 %s7268_s20, 2  ;;  %v4758_v48 = vld [vmem:[%s8400_s9] ss:$0 sm:$0xff]  ;;  %vm4381_vm0 = vcmask 257024  }
 0x670   : > { %5966 = dma.vmem_to_hbm [thread:$0]  (%p6267_p5), %s8285_s26, 1024, %s8299_s4, %s4384_s1, %s8423_s28, %s8423_s28, %s8422_s19  }
 0x671   : > { %s4767_s15 = sshll.u32 %s6248_s25, 6  ;;  %s424_s2 = scalar_lea.vmem [#allocation9], %s4565_s16 }
 0x672   : > { %s4439_s3 = sshll.u32 %s424_s2, 4  ;;  %s4437_s26 = scalar_lea.hbm %s8403_s12, %s4767_s15  ;;  %s4440_s3 = int_to_ptr.vmem [resolvable:$true] %s4439_s3 }
 0x673   : > { %s6081_s19 = scalar_lea.vmem %s4440_s3, 64  ;;  %s6161_s1 = smov [#allocation9]  }
 0x674   : > { %p6082_p1 = scmp.ne.s32.totalorder %s4440_s3, %s6081_s19  ;;  %s6085_s29 = sshll.u32 %s6161_s1, 4  ;;  %s6086_s29 = int_to_ptr.vmem [resolvable:$false] %s6085_s29 }
 0x675   : > { %s6087_s25 = scalar_lea.vmem %s6086_s29, 128  ;;  %p6088_p4 = scmp.lt.s32.totalorder %s4440_s3, %s6086_s29 }
 0x676   : > { %p6083_p2 = pnand %p6082_p1, %p6267_p5  ;;  %p6089_p7 = scmp.lt.s32.totalorder %s6087_s25, %s6081_s19 }
 0x678   : > { %p6084_p3 = pneg %p6083_p2  ;;  %p6090_p8 = por %p6089_p7, %p6088_p4 }
 0x67a   : > { %p6091_p9 = pnand %p6090_p8, %p6084_p3 }
 0x6fc   : > { %v5609_v21 = vpop.f32.mrf.mxu0 }
 0x6fe   : > { %v5610_v46 = vpop.f32.mrf.mxu0 }
 0x6ff   : > { %v5611_v47 = vadd.f32 %v5610_v46, %v5609_v21 }
 0x701   : > { %v4238_v53 = vadd.f32 %v5611_v47, %v4758_v48 }
 0x70c   : > { %v5644_v49 = vpop.f32.mrf.mxu1  ;;  %v4377_v50 = vpop.f32.mrf.mxu0 }
 0x70e   : > { %v5645_v51 = vpop.f32.mrf.mxu1  ;;  %v5965_v52 = vpop.f32.mrf.mxu0 }
 0x70f   : > { %v5646_v54 = vadd.f32 %v5645_v51, %v5644_v49 }
 0x711   : > { %v4308_v55 = vadd.f32 %v5646_v54, %v4238_v53 }
 0x713   : > { %v4378_v56 = vadd.f32 %v4377_v50, %v4308_v55 }
 0x715   : > { %4382 = vst.msk [vmem:[%s424_s2] sm:$0xf] %vm4381_vm0, %v4378_v56 }
 0x716   : > { %6094 = shalt.err (!%p6091_p9)
}
 0x717   : > { %s6095_s0 = scalar_lea.hbm %s4437_s26, 64  ;;  %s6099_s5 = scalar_lea.hbm %s8403_s12, 128 }
 0x718   : > { %p6096_p10 = scmp.ne.s32.totalorder %s4437_s26, %s6095_s0  ;;  %p6100_p13 = scmp.lt.s32.totalorder %s4437_s26, %s8403_s12 }
 0x719   : > { %p6101_p0 = scmp.lt.s32.totalorder %s6099_s5, %s6095_s0 }
 0x71a   : > { %p6097_p11 = pnand %p6096_p10, %p6267_p5 }
 0x71b   : > { %p6102_p1 = por %p6101_p0, %p6100_p13 }
 0x71c   : > { %p6098_p12 = pneg %p6097_p11 }
 0x71e   : > { %p6103_p2 = pnand %p6102_p1, %p6098_p12 }
 0x720   : > { %6106 = shalt.err (!%p6103_p2)
}
 0x721   : > { %5968 = dma.vmem_to_hbm [thread:$0]  (%p6267_p5), %s4440_s3, 64, %s4437_s26, %s8301_s18  }
 0x722 PF: > { %p5982_p3 = scmp.ge.s32.totalorder %s6145_s24, 2  ;;  %s4451_s2 = sand.u32 1, %s6133_s21  }
 0x723   : > { %s4452_s4 = scalar_lea.sflag [#allocation6], %s4451_s2 }
 0x724   : > { %p5973_p4 = pnand %p5982_p3, %p6271_p6 }
 0x726   : > { %p5974_p7 = pneg %p5973_p4 }
 0x728   : > { %6124 = dma.done.wait (%p5974_p7), %s4452_s4, 1024  }
 0x729   : > { %6126 = vsyncadd (%p5974_p7), %s4452_s4, 4294966272  ;;  %s8424_s20 = sadd.s32 4294967294, %s6145_s24  }
 0x72a   : > { %s4460_s19 = sand.u32 1, %s8424_s20  }
 0x72b   : > { %s4461_s1 = scalar_lea.sflag [#allocation8], %s4460_s19 }
 0x72c   : > { %6128 = dma.done.wait (%p5974_p7), %s4461_s1, 320  }
 0x72d   : > { %6130 = vsyncadd (%p5974_p7), %s4461_s1, 4294966976  ;;  %p26_p5 = scmp.ge.s32.totalorder %s6252_s27, 4   ;;  %s8425_s21 = smov %s6137_s22 }
 0x72e   : > { %s8426_s22 = smov %s6141_s23  ;;  %s8427_s23 = smov %s6265_s30 }
 0x72f   : > { %s8428_s24 = smov %s6252_s27  ;;  %28 = sbr.rel (!%p26_p5) target bundleno = 12 (0xc), region = 151 }
 0x734   :  { %4475 = vsyncpa [#allocation6], 1 }
 0x735   :  { %4477 = vsyncpa [#allocation6 + $0x1], 1 }
 0x736   :  { %4478 = vsyncpa [#allocation8], 1 }
 0x737   :  { %4480 = vsyncpa [#allocation8 + $0x1], 1 }

</bundles_post_ra>
